<compile_context>
chip_gen: v7x
topology: tpu7x:2x2x1
jax: 0.10.0
libtpu: 0.0.40
codegen_flags: <defaults>
</compile_context>

<pallas_src>
import functools
import math

import jax
import jax.numpy as jnp
from jax import lax
from jax.experimental import pallas as pl
from jax.experimental.pallas import tpu as pltpu

N_NODES = 55                       # fixed by the module (att is 55x55)
_CHUNK_B = 8                       # batch elements aggregated per MXU matmul
_TILE_BUDGET = 8 * 1024 * 1024     # target bytes for double-buffered x/out tiles
_VMEM_LIMIT = 32 * 1024 * 1024     # <= scoped/physical VMEM on v5e/v6e/v7x


def gcn_att_kernel(x_ref, w_ref, katt_ref, b_ref, o_ref, *,
                   num_chunks, chunk_rows):
    """One grid step processes TB = num_chunks * 8 batch elements.

    x_ref:    (TB*N, F_in)   rows ordered (batch, node)
    w_ref:    (F_in, F_out)  grid-invariant
    katt_ref: (8*N, 8*N)     grid-invariant, kron(I_8, att)
    b_ref:    (1, F_out)     grid-invariant
    o_ref:    (TB*N, F_out)
    """
    w = w_ref[...]
    katt = katt_ref[...]
    b = b_ref[...]

    def do_chunk(r0):
        x_c = x_ref[pl.ds(r0, chunk_rows), :]
        # support = x @ W : one (440, F_in) x (F_in, F_out) MXU matmul.
        sup = jnp.dot(x_c, w, preferred_element_type=jnp.float32)
        # out = att @ support for 8 batch elements at once via the
        # block-diagonal kron(I_8, att) -- a single dense (440,440)x(440,F_out)
        # MXU matmul, reference order preserved.
        out = jnp.dot(katt, sup, preferred_element_type=jnp.float32)
        o_ref[pl.ds(r0, chunk_rows), :] = (out + b).astype(o_ref.dtype)

    if num_chunks <= 32:
        for c in range(num_chunks):            # static unroll, LLO visibility
            do_chunk(c * chunk_rows)
    else:
        def body(c, carry):
            do_chunk(pl.multiple_of(c * chunk_rows, 8))
            return carry
        lax.fori_loop(0, num_chunks, body, 0)


def _pick_batch_tile(B, F_in, F_out):
    """Batch elements per grid step: multiple of 8, VMEM-budgeted, dividing B
    when possible (no padding), leaving >= 2 grid steps when B allows."""
    per_elem = 2 * 2 * N_NODES * (F_in + F_out) * 4   # double-buffered in+out
    cap = max(_CHUNK_B, (_TILE_BUDGET // per_elem) // _CHUNK_B * _CHUNK_B)
    if B >= 2 * _CHUNK_B:                             # keep both TCs busy
        cap = min(cap, max(_CHUNK_B, (B // 2) // _CHUNK_B * _CHUNK_B))
    cap = min(cap, -(-B // _CHUNK_B) * _CHUNK_B)
    for tb in range(cap, _CHUNK_B - 1, -_CHUNK_B):
        if B % tb == 0:
            return tb                                 # divides B -> no padding
    return cap                                        # rare fallback (pads B)


def graph_convolution_att(x, weight, att, bias=None):
    """x: (B, N, F_in) f32, weight: (F_in, F_out), att: (N, N), bias: (F_out,)
    -> (B, N, F_out) f32  ( = att @ (x @ weight) + bias per batch element )."""
    B, N, F_in = x.shape
    F_out = weight.shape[1]
    assert att.shape == (N, N)
    if bias is None:
        bias = jnp.zeros((F_out,), x.dtype)

    tb = _pick_batch_tile(B, F_in, F_out)
    num_tiles = -(-B // tb)
    B_pad = num_tiles * tb
    if B_pad != B:  # only when no multiple-of-8 tile divides B
        x = jnp.pad(x, ((0, B_pad - B), (0, 0), (0, 0)))

    num_chunks = tb // _CHUNK_B
    chunk_rows = _CHUNK_B * N

    # Free row-major views -- no transposes, no extra HBM copies.
    x2d = x.reshape(B_pad * N, F_in)
    bias2d = bias.reshape(1, F_out)
    # Block-diagonal aggregation operand (grid-invariant, VMEM resident).
    katt = jnp.kron(jnp.eye(_CHUNK_B, dtype=att.dtype), att)

    kernel = functools.partial(gcn_att_kernel,
                               num_chunks=num_chunks, chunk_rows=chunk_rows)

    out2d = pl.pallas_call(
        kernel,
        out_shape=jax.ShapeDtypeStruct((B_pad * N, F_out), jnp.float32),
        grid_spec=pltpu.PrefetchScalarGridSpec(
            num_scalar_prefetch=0,
            grid=(num_tiles,),
            in_specs=[
                pl.BlockSpec((tb * N, F_in), lambda i: (i, 0)),
                pl.BlockSpec((F_in, F_out), lambda i: (0, 0)),
                pl.BlockSpec((chunk_rows, chunk_rows), lambda i: (0, 0)),
                pl.BlockSpec((1, F_out), lambda i: (0, 0)),
            ],
            out_specs=pl.BlockSpec((tb * N, F_out), lambda i: (i, 0)),
        ),
        compiler_params=pltpu.CompilerParams(
            dimension_semantics=("parallel",),
            vmem_limit_bytes=_VMEM_LIMIT,
        ),
    )(x2d, weight, katt, bias2d)

    out = out2d.reshape(B_pad, N, F_out)
    return out[:B] if B_pad != B else out


def init_params(key, in_features, out_features):
    """Deterministic init matching reset_parameters(): U(-stdv, stdv)."""
    stdv = 1.0 / math.sqrt(out_features)
    k_w, k_a, k_b = jax.random.split(key, 3)
    weight = jax.random.uniform(
        k_w, (in_features, out_features), jnp.float32, -stdv, stdv)
    att = jax.random.uniform(
        k_a, (N_NODES, N_NODES), jnp.float32, -stdv, stdv)
    bias = jax.random.uniform(
        k_b, (out_features,), jnp.float32, -stdv, stdv)
    return weight, att, bias


if __name__ == "__main__":
    key = jax.random.PRNGKey(0)
    k_p1, k_p2, k_x1, k_x2 = jax.random.split(key, 4)

    # Case 1: B divisible by 8 -> no padding, grid of 2 steps, 2 chunks/step.
    B, f_in, f_out = 32, 32, 32
    weight, att, bias = init_params(k_p1, f_in, f_out)
    x = jax.random.normal(k_x1, (B, N_NODES, f_in), jnp.float32)
    out = jax.block_until_ready(graph_convolution_att(x, weight, att, bias))
    ref = jnp.matmul(att, jnp.matmul(x, weight)) + bias
    assert out.shape == (B, N_NODES, f_out)
    assert jnp.allclose(out, ref, atol=1e-4, rtol=1e-4)

    # Case 2: B not a multiple of 8 (pad fallback) and rectangular features.
    B2, f_in2, f_out2 = 6, 16, 48
    weight2, att2, bias2 = init_params(k_p2, f_in2, f_out2)
    x2 = jax.random.normal(k_x2, (B2, N_NODES, f_in2), jnp.float32)
    out2 = jax.block_until_ready(graph_convolution_att(x2, weight2, att2, bias2))
    ref2 = jnp.matmul(att2, jnp.matmul(x2, weight2)) + bias2
    assert out2.shape == (B2, N_NODES, f_out2)
    assert jnp.allclose(out2, ref2, atol=1e-4, rtol=1e-4)

    print("KERNEL_OK")
</pallas_src>

<mosaic_0001>
module attributes {stable_mosaic.version = 11 : i64} {
  func.func @gcn_att_kernel(%arg0: i32, %arg1: memref<880x32xf32, #tpu.memory_space<vmem>>, %arg2: memref<32x32xf32, #tpu.memory_space<vmem>>, %arg3: memref<440x440xf32, #tpu.memory_space<vmem>>, %arg4: memref<1x32xf32, #tpu.memory_space<vmem>>, %arg5: memref<880x32xf32, #tpu.memory_space<vmem>>) attributes {dimension_semantics = [#tpu.dimension_semantics<parallel>], iteration_bounds = array<i64: 2>, scalar_prefetch = 0 : i64, scratch_operands = 0 : i64, tpu.core_type = #tpu.core_type<tc>, window_params = [{transform_indices = @transform_0, window_bounds = array<i64: 880, 32>}, {pipeline_mode = #tpu.pipeline_mode<synchronous>, transform_indices = @transform_1, window_bounds = array<i64: 32, 32>}, {pipeline_mode = #tpu.pipeline_mode<synchronous>, transform_indices = @transform_2, window_bounds = array<i64: 440, 440>}, {pipeline_mode = #tpu.pipeline_mode<synchronous>, transform_indices = @transform_3, window_bounds = array<i64: 1, 32>}, {transform_indices = @transform_4, window_bounds = array<i64: 880, 32>}]} {
    %c0 = arith.constant 0 : index
    %c0_0 = arith.constant 0 : index
    %0 = vector.load %arg2[%c0, %c0_0] : memref<32x32xf32, #tpu.memory_space<vmem>>, vector<32x32xf32>
    %c0_1 = arith.constant 0 : index
    %c0_2 = arith.constant 0 : index
    %1 = vector.load %arg3[%c0_1, %c0_2] : memref<440x440xf32, #tpu.memory_space<vmem>>, vector<440x440xf32>
    %c0_3 = arith.constant 0 : index
    %c0_4 = arith.constant 0 : index
    %2 = vector.load %arg4[%c0_3, %c0_4] : memref<1x32xf32, #tpu.memory_space<vmem>>, vector<1x32xf32>
    %c0_5 = arith.constant 0 : index
    %c0_6 = arith.constant 0 : index
    %3 = vector.load %arg1[%c0_5, %c0_6] : memref<880x32xf32, #tpu.memory_space<vmem>>, vector<440x32xf32>
    %cst = arith.constant dense<0.000000e+00> : vector<440x32xf32>
    %4 = tpu.matmul %3, %0, %cst {dimension_numbers = #tpu.dot_dimension_numbers<[1], [0], [0], [1], [0, 0, 1, 1], [], []>} : vector<440x32xf32>, vector<32x32xf32>, vector<440x32xf32> -> vector<440x32xf32>
    %cst_7 = arith.constant dense<0.000000e+00> : vector<440x32xf32>
    %5 = tpu.matmul %1, %4, %cst_7 {dimension_numbers = #tpu.dot_dimension_numbers<[1], [0], [0], [1], [0, 0, 1, 1], [], []>} : vector<440x440xf32>, vector<440x32xf32>, vector<440x32xf32> -> vector<440x32xf32>
    %6 = vector.broadcast %2 : vector<1x32xf32> to vector<440x32xf32>
    %7 = arith.addf %5, %6 : vector<440x32xf32>
    %c0_8 = arith.constant 0 : index
    %c0_9 = arith.constant 0 : index
    %8 = vector.load %arg5[%c0_8, %c0_9] : memref<880x32xf32, #tpu.memory_space<vmem>>, vector<440x32xf32>
    tpu.vector_store %arg5[%c0_8, %c0_9], %7 {strides = array<i32>} : memref<880x32xf32, #tpu.memory_space<vmem>>, vector<440x32xf32>,
    %c440 = arith.constant 440 : index
    %c0_10 = arith.constant 0 : index
    %9 = vector.load %arg1[%c440, %c0_10] : memref<880x32xf32, #tpu.memory_space<vmem>>, vector<440x32xf32>
    %cst_11 = arith.constant dense<0.000000e+00> : vector<440x32xf32>
    %10 = tpu.matmul %9, %0, %cst_11 {dimension_numbers = #tpu.dot_dimension_numbers<[1], [0], [0], [1], [0, 0, 1, 1], [], []>} : vector<440x32xf32>, vector<32x32xf32>, vector<440x32xf32> -> vector<440x32xf32>
    %cst_12 = arith.constant dense<0.000000e+00> : vector<440x32xf32>
    %11 = tpu.matmul %1, %10, %cst_12 {dimension_numbers = #tpu.dot_dimension_numbers<[1], [0], [0], [1], [0, 0, 1, 1], [], []>} : vector<440x440xf32>, vector<440x32xf32>, vector<440x32xf32> -> vector<440x32xf32>
    %12 = vector.broadcast %2 : vector<1x32xf32> to vector<440x32xf32>
    %13 = arith.addf %11, %12 : vector<440x32xf32>
    %c440_13 = arith.constant 440 : index
    %c0_14 = arith.constant 0 : index
    %14 = vector.load %arg5[%c440_13, %c0_14] : memref<880x32xf32, #tpu.memory_space<vmem>>, vector<440x32xf32>
    tpu.vector_store %arg5[%c440_13, %c0_14], %13 {strides = array<i32>} : memref<880x32xf32, #tpu.memory_space<vmem>>, vector<440x32xf32>,
    return
  }
  func.func @transform_0(%arg0: i32) -> (i32, i32) {
    %c0_i32 = arith.constant 0 : i32
    %c0_i32_0 = arith.constant 0 : i32
    return %arg0, %c0_i32 : i32, i32
  }
  func.func @transform_1(%arg0: i32) -> (i32, i32) {
    %c0_i32 = arith.constant 0 : i32
    %c0_i32_0 = arith.constant 0 : i32
    %c0_i32_1 = arith.constant 0 : i32
    return %c0_i32, %c0_i32_0 : i32, i32
  }
  func.func @transform_2(%arg0: i32) -> (i32, i32) {
    %c0_i32 = arith.constant 0 : i32
    %c0_i32_0 = arith.constant 0 : i32
    %c0_i32_1 = arith.constant 0 : i32
    return %c0_i32, %c0_i32_0 : i32, i32
  }
  func.func @transform_3(%arg0: i32) -> (i32, i32) {
    %c0_i32 = arith.constant 0 : i32
    %c0_i32_0 = arith.constant 0 : i32
    %c0_i32_1 = arith.constant 0 : i32
    return %c0_i32, %c0_i32_0 : i32, i32
  }
  func.func @transform_4(%arg0: i32) -> (i32, i32) {
    %c0_i32 = arith.constant 0 : i32
    %c0_i32_0 = arith.constant 0 : i32
    return %arg0, %c0_i32 : i32, i32
  }
}

</mosaic_0001>

<bundles_post_ra>
// kernel: tpu_custom_call.1
= control target key start
LH: loop header
LB: loop body
LE: loop exit
PB: predicated region body
PF: predicated region fallthrough
CT: control target
= control target key end

     0   :  { %s4490_s15 = smov 0   ;;  %s6135_s0 = inlined_call_operand.vmem [shape: f32[1760,32], index: 0, kind: input, shape index: {}]   ;;  %s6136_s1 = inlined_call_operand.vmem [shape: f32[32,32], index: 1, kind: input, shape index: {}]   ;;  %s6137_s2 = inlined_call_operand.vmem [shape: f32[440,440], index: 2, kind: input, shape index: {}]   ;;  %s6138_s3 = inlined_call_operand.vmem [shape: f32[1,32], index: 3, kind: input, shape index: {}]   ;;  %s6139_s4 = inlined_call_operand.vmem [shape: f32[1760,32], index: 4, kind: output, shape index: {}]  }
   0x1 LB: > { %s3245_s16 = sadd.s32 4294967295, %s4460_s15   ;;  %p3249_p0 = scmp.ge.s32.totalorder %s4460_s15, 1  ;;  %s4460_s15 = sphi %s4490_s15, %s14_s15  }
   0x2   : > { %p163_p1 = scmp.lt.s32.totalorder %s4460_s15, 3 }
   0x4   : > { %p164_p2 = pnand %p3249_p0, %p163_p1 }
   0x5   : > { %v201_v0 = vld [vmem:[%s6136_s1] sm:$0xff] (!%p164_p2)  ;;  %v202_v1 = vld [vmem:[%s6136_s1 + $0x8] sm:$0xff] (!%p164_p2)  ;;  %v203_v2 = vld [vmem:[%s6136_s1 + $0x10] sm:$0xff] (!%p164_p2)  ;;  %v4462_v3 = vmov (!%p164_p2), 0.0|0.0   ;;  %s189_s25 = smul.u32 (!%p164_p2), 110, %s3245_s16  ;;  %vm4463_vm0 = vmmov (!%p164_p2), 0  }
   0x6   : > { %167 = sbr.rel (%p164_p2) target bundleno = 1009 (0x3f1), region = 36  ;;  %3939 = vmatprep.subr.bf16.mxu1 (!%p164_p2), %v4462_v3  ;;  %4026 = vmatprep.subr.bf16.mxu0 (!%p164_p2), %v4462_v3  ;;  %v3940_v4 = vpack.c.bf16 (!%p164_p2), %v202_v1, %v201_v0  ;;  %v204_v5 = vld [vmem:[%s6136_s1 + $0x18] sm:$0xff] (!%p164_p2)  ;;  %v4464_v6 = vmov (!%p164_p2), 0.0   ;;  %vm481_vm1 = vcmask (!%p164_p2), 261120   ;;  %vm993_vm2 = vcmask (!%p164_p2), 457728  }
   0x7   : > { %3601 = vmatprep.mubr.msk.f32.mxu1 (!%p164_p2), %vm4463_vm0, %v4464_v6  ;;  %3774 = vmatprep.mubr.msk.f32.mxu0 (!%p164_p2), %vm4463_vm0, %v4464_v6  ;;  %v3943_v7 = vpack.c.bf16 (!%p164_p2), %v204_v5, %v203_v2  ;;  %p190_p3 = scmp.lt.s32.totalorder (!%p164_p2), %s189_s25, 219 }
   0x8   : > { %3941 = vmatpush3.bf16.msra.mxu1 (!%p164_p2), %v3940_v4  ;;  %4028 = vmatpush3.bf16.msra.mxu0 (!%p164_p2), %v3940_v4 }
   0x9   : > { %3942 = vmatprep.subr.bf16.mxu1 (!%p164_p2), %v4462_v3  ;;  %4029 = vmatprep.subr.bf16.mxu0 (!%p164_p2), %v4462_v3 }
   0xc   : > { %3944 = vmatpush3.bf16.msra.mxu1 (!%p164_p2), %v3943_v7  ;;  %4031 = vmatpush3.bf16.msra.mxu0 (!%p164_p2), %v3943_v7 }
   0xd   : > { %s6141_s25 = smov (!%p190_p3, %s189_s25), 219  ;;  %3945 = vmatprep.subr.bf16.mxu1 %v4462_v3  ;;  %4032 = vmatprep.subr.bf16.mxu0 %v4462_v3 }
   0xe   : > { %s3250_s26 = sshll.u32 %s6141_s25, 3 }
   0xf   : > { %s4526_s29 = scalar_lea.vmem %s6135_s0, %s3250_s26  ;;  %s5795_s9 = scalar_lea.vmem %s6139_s4, %s3250_s26 }
  0x10   : > { %v426_v8 = vld [vmem:[%s4526_s29] sm:$0xff]  ;;  %v1894_v9 = vld [vmem:[%s4526_s29 + $0x1b8] sm:$0xff]  ;;  %v427_v10 = vld [vmem:[%s4526_s29 + $0x8] sm:$0xff] }
  0x11   : > { %3602 = vmatmul.mubr.msk.f32.vlgmr.msra.gmra.mrb[0].mxu1 %vm481_vm1, %v426_v8  ;;  %3775 = vmatmul.mubr.msk.f32.vlgmr.msra.gmra.mrb[0].mxu0 %vm481_vm1, %v1894_v9  ;;  %v1895_v11 = vld [vmem:[%s4526_s29 + $0x1c0] sm:$0xff]  ;;  %v428_v12 = vld [vmem:[%s4526_s29 + $0x10] sm:$0xff]  ;;  %v1896_v13 = vld [vmem:[%s4526_s29 + $0x1c8] sm:$0xff] }
  0x12   : > { %3604 = vmatprep.mubr.msk.f32.mxu1 %vm4463_vm0, %v4464_v6  ;;  %3777 = vmatprep.mubr.msk.f32.mxu0 %vm4463_vm0, %v4464_v6  ;;  %v429_v14 = vld [vmem:[%s4526_s29 + $0x18] sm:$0xff]  ;;  %v1897_v15 = vld [vmem:[%s4526_s29 + $0x1d0] sm:$0xff]  ;;  %v430_v16 = vld [vmem:[%s4526_s29 + $0x20] sm:$0xff] }
  0x13   : > { %v1898_v17 = vld [vmem:[%s4526_s29 + $0x1d8] sm:$0xff]  ;;  %v431_v18 = vld [vmem:[%s4526_s29 + $0x28] sm:$0xff]  ;;  %v1899_v19 = vld [vmem:[%s4526_s29 + $0x1e0] sm:$0xff] }
  0x14   : > { %v432_v20 = vld [vmem:[%s4526_s29 + $0x30] sm:$0xff]  ;;  %v1900_v21 = vld [vmem:[%s4526_s29 + $0x1e8] sm:$0xff]  ;;  %v433_v22 = vld [vmem:[%s4526_s29 + $0x38] sm:$0xff] }
  0x15   : > { %3605 = vmatmul.mubr.msk.f32.gmra.mrb[2].mxu1 %vm481_vm1, %v427_v10  ;;  %3778 = vmatmul.mubr.msk.f32.gmra.mrb[2].mxu0 %vm481_vm1, %v1895_v11  ;;  %v1901_v23 = vld [vmem:[%s4526_s29 + $0x1f0] sm:$0xff]  ;;  %v434_v24 = vld [vmem:[%s4526_s29 + $0x40] sm:$0xff]  ;;  %v1902_v25 = vld [vmem:[%s4526_s29 + $0x1f8] sm:$0xff] }
  0x16   : > { %3607 = vmatprep.mubr.msk.f32.mxu1 %vm4463_vm0, %v4464_v6  ;;  %3780 = vmatprep.mubr.msk.f32.mxu0 %vm4463_vm0, %v4464_v6  ;;  %v435_v26 = vld [vmem:[%s4526_s29 + $0x48] sm:$0xff]  ;;  %v1903_v27 = vld [vmem:[%s4526_s29 + $0x200] sm:$0xff]  ;;  %v436_v28 = vld [vmem:[%s4526_s29 + $0x50] sm:$0xff] }
  0x17   : > { %v1904_v29 = vld [vmem:[%s4526_s29 + $0x208] sm:$0xff]  ;;  %v437_v30 = vld [vmem:[%s4526_s29 + $0x58] sm:$0xff]  ;;  %v1905_v31 = vld [vmem:[%s4526_s29 + $0x210] sm:$0xff] }
  0x18   : > { %v438_v32 = vld [vmem:[%s4526_s29 + $0x60] sm:$0xff]  ;;  %v1906_v33 = vld [vmem:[%s4526_s29 + $0x218] sm:$0xff]  ;;  %v439_v34 = vld [vmem:[%s4526_s29 + $0x68] sm:$0xff] }
  0x19   : > { %3608 = vmatmul.mubr.msk.f32.gmra.mrb[4].mxu1 %vm481_vm1, %v428_v12  ;;  %3781 = vmatmul.mubr.msk.f32.gmra.mrb[4].mxu0 %vm481_vm1, %v1896_v13  ;;  %v1907_v35 = vld [vmem:[%s4526_s29 + $0x220] sm:$0xff]  ;;  %v440_v36 = vld [vmem:[%s4526_s29 + $0x70] sm:$0xff]  ;;  %v1908_v37 = vld [vmem:[%s4526_s29 + $0x228] sm:$0xff] }
  0x1a   : > { %3610 = vmatprep.mubr.msk.f32.mxu1 %vm4463_vm0, %v4464_v6  ;;  %3783 = vmatprep.mubr.msk.f32.mxu0 %vm4463_vm0, %v4464_v6  ;;  %v441_v38 = vld [vmem:[%s4526_s29 + $0x78] sm:$0xff]  ;;  %v1909_v39 = vld [vmem:[%s4526_s29 + $0x230] sm:$0xff]  ;;  %v442_v40 = vld [vmem:[%s4526_s29 + $0x80] sm:$0xff] }
  0x1b   : > { %v1910_v41 = vld [vmem:[%s4526_s29 + $0x238] sm:$0xff]  ;;  %v443_v42 = vld [vmem:[%s4526_s29 + $0x88] sm:$0xff]  ;;  %v1911_v43 = vld [vmem:[%s4526_s29 + $0x240] sm:$0xff] }
  0x1c   : > { %v444_v44 = vld [vmem:[%s4526_s29 + $0x90] sm:$0xff]  ;;  %v1912_v45 = vld [vmem:[%s4526_s29 + $0x248] sm:$0xff]  ;;  %v445_v46 = vld [vmem:[%s4526_s29 + $0x98] sm:$0xff] }
  0x1d   : > { %3611 = vmatmul.mubr.msk.f32.gmra.mrb[6].mxu1 %vm481_vm1, %v429_v14  ;;  %3784 = vmatmul.mubr.msk.f32.gmra.mrb[6].mxu0 %vm481_vm1, %v1897_v15  ;;  %v1913_v47 = vld [vmem:[%s4526_s29 + $0x250] sm:$0xff]  ;;  %v446_v48 = vld [vmem:[%s4526_s29 + $0xa0] sm:$0xff]  ;;  %v1914_v49 = vld [vmem:[%s4526_s29 + $0x258] sm:$0xff] }
  0x1e   : > { %3613 = vmatprep.mubr.msk.f32.mxu1 %vm4463_vm0, %v4464_v6  ;;  %3786 = vmatprep.mubr.msk.f32.mxu0 %vm4463_vm0, %v4464_v6  ;;  %v447_v50 = vld [vmem:[%s4526_s29 + $0xa8] sm:$0xff]  ;;  %v1915_v51 = vld [vmem:[%s4526_s29 + $0x260] sm:$0xff]  ;;  %v448_v52 = vld [vmem:[%s4526_s29 + $0xb0] sm:$0xff] }
  0x1f   : > { %v1916_v53 = vld [vmem:[%s4526_s29 + $0x268] sm:$0xff]  ;;  %v449_v54 = vld [vmem:[%s4526_s29 + $0xb8] sm:$0xff]  ;;  %v1917_v55 = vld [vmem:[%s4526_s29 + $0x270] sm:$0xff] }
  0x20   : > { %v450_v56 = vld [vmem:[%s4526_s29 + $0xc0] sm:$0xff]  ;;  %v1918_v57 = vld [vmem:[%s4526_s29 + $0x278] sm:$0xff]  ;;  %v451_v58 = vld [vmem:[%s4526_s29 + $0xc8] sm:$0xff] }
  0x21   : > { %3614 = vmatmul.mubr.msk.f32.gmra.mrb[8].mxu1 %vm481_vm1, %v430_v16  ;;  %3787 = vmatmul.mubr.msk.f32.gmra.mrb[8].mxu0 %vm481_vm1, %v1898_v17  ;;  %v1919_v59 = vld [vmem:[%s4526_s29 + $0x280] sm:$0xff]  ;;  %v452_v60 = vld [vmem:[%s4526_s29 + $0xd0] sm:$0xff]  ;;  %v1920_v61 = vld [vmem:[%s4526_s29 + $0x288] sm:$0xff] }
  0x22   : > { %3616 = vmatprep.mubr.msk.f32.mxu1 %vm4463_vm0, %v4464_v6  ;;  %3789 = vmatprep.mubr.msk.f32.mxu0 %vm4463_vm0, %v4464_v6  ;;  %v453_v62 = vld [vmem:[%s4526_s29 + $0xd8] sm:$0xff]  ;;  %v1921_v63 = vld [vmem:[%s4526_s29 + $0x290] sm:$0xff]  ;;  %v454_v0 = vld [vmem:[%s4526_s29 + $0xe0] sm:$0xff] }
  0x23   : > { %v1922_v1 = vld [vmem:[%s4526_s29 + $0x298] sm:$0xff]  ;;  %v455_v2 = vld [vmem:[%s4526_s29 + $0xe8] sm:$0xff]  ;;  %v1923_v4 = vld [vmem:[%s4526_s29 + $0x2a0] sm:$0xff] }
  0x24   : > { %v456_v5 = vld [vmem:[%s4526_s29 + $0xf0] sm:$0xff]  ;;  %v1924_v7 = vld [vmem:[%s4526_s29 + $0x2a8] sm:$0xff]  ;;  %v457_v8 = vld [vmem:[%s4526_s29 + $0xf8] sm:$0xff] }
  0x25   : > { %3617 = vmatmul.mubr.msk.f32.gmra.mrb[10].mxu1 %vm481_vm1, %v431_v18  ;;  %3790 = vmatmul.mubr.msk.f32.gmra.mrb[10].mxu0 %vm481_vm1, %v1899_v19  ;;  %v1925_v9 = vld [vmem:[%s4526_s29 + $0x2b0] sm:$0xff]  ;;  %v458_v10 = vld [vmem:[%s4526_s29 + $0x100] sm:$0xff]  ;;  %v1926_v11 = vld [vmem:[%s4526_s29 + $0x2b8] sm:$0xff] }
  0x26   : > { %3619 = vmatprep.mubr.msk.f32.mxu1 %vm4463_vm0, %v4464_v6  ;;  %3792 = vmatprep.mubr.msk.f32.mxu0 %vm4463_vm0, %v4464_v6  ;;  %v459_v12 = vld [vmem:[%s4526_s29 + $0x108] sm:$0xff]  ;;  %v1927_v13 = vld [vmem:[%s4526_s29 + $0x2c0] sm:$0xff]  ;;  %v460_v14 = vld [vmem:[%s4526_s29 + $0x110] sm:$0xff] }
  0x27   : > { %v1928_v15 = vld [vmem:[%s4526_s29 + $0x2c8] sm:$0xff]  ;;  %v461_v16 = vld [vmem:[%s4526_s29 + $0x118] sm:$0xff]  ;;  %v1929_v17 = vld [vmem:[%s4526_s29 + $0x2d0] sm:$0xff] }
  0x28   : > { %v462_v18 = vld [vmem:[%s4526_s29 + $0x120] sm:$0xff]  ;;  %v1930_v19 = vld [vmem:[%s4526_s29 + $0x2d8] sm:$0xff] }
  0x29   : > { %3620 = vmatmul.mubr.msk.f32.gmra.mrb[12].mxu1 %vm481_vm1, %v432_v20  ;;  %3793 = vmatmul.mubr.msk.f32.gmra.mrb[12].mxu0 %vm481_vm1, %v1900_v21  ;;  %v463_v20 = vld [vmem:[%s4526_s29 + $0x128] sm:$0xff]  ;;  %v1931_v21 = vld [vmem:[%s4526_s29 + $0x2e0] sm:$0xff] }
  0x2a   : > { %3622 = vmatprep.mubr.msk.f32.mxu1 %vm4463_vm0, %v4464_v6  ;;  %3795 = vmatprep.mubr.msk.f32.mxu0 %vm4463_vm0, %v4464_v6 }
  0x2d   : > { %3623 = vmatmul.mubr.msk.f32.gmra.mrb[14].mxu1 %vm481_vm1, %v433_v22  ;;  %3796 = vmatmul.mubr.msk.f32.gmra.mrb[14].mxu0 %vm481_vm1, %v1901_v23  ;;  %v464_v22 = vld [vmem:[%s4526_s29 + $0x130] sm:$0xff]  ;;  %v1932_v23 = vld [vmem:[%s4526_s29 + $0x2e8] sm:$0xff] }
  0x2e   : > { %3625 = vmatprep.mubr.msk.f32.mxu1 %vm4463_vm0, %v4464_v6  ;;  %3798 = vmatprep.mubr.msk.f32.mxu0 %vm4463_vm0, %v4464_v6 }
  0x31   : > { %3626 = vmatmul.mubr.msk.f32.gmra.mrb[16].mxu1 %vm481_vm1, %v434_v24  ;;  %3799 = vmatmul.mubr.msk.f32.gmra.mrb[16].mxu0 %vm481_vm1, %v1902_v25  ;;  %v465_v24 = vld [vmem:[%s4526_s29 + $0x138] sm:$0xff]  ;;  %v1933_v25 = vld [vmem:[%s4526_s29 + $0x2f0] sm:$0xff] }
  0x32   : > { %3628 = vmatprep.mubr.msk.f32.mxu1 %vm4463_vm0, %v4464_v6  ;;  %3801 = vmatprep.mubr.msk.f32.mxu0 %vm4463_vm0, %v4464_v6 }
  0x35   : > { %3629 = vmatmul.mubr.msk.f32.gmra.mrb[18].mxu1 %vm481_vm1, %v435_v26  ;;  %3802 = vmatmul.mubr.msk.f32.gmra.mrb[18].mxu0 %vm481_vm1, %v1903_v27  ;;  %v466_v26 = vld [vmem:[%s4526_s29 + $0x140] sm:$0xff]  ;;  %v1934_v27 = vld [vmem:[%s4526_s29 + $0x2f8] sm:$0xff] }
  0x36   : > { %3631 = vmatprep.mubr.msk.f32.mxu1 %vm4463_vm0, %v4464_v6  ;;  %3804 = vmatprep.mubr.msk.f32.mxu0 %vm4463_vm0, %v4464_v6 }
  0x39   : > { %3632 = vmatmul.mubr.msk.f32.gmra.mrb[20].mxu1 %vm481_vm1, %v436_v28  ;;  %3805 = vmatmul.mubr.msk.f32.gmra.mrb[20].mxu0 %vm481_vm1, %v1904_v29  ;;  %v467_v28 = vld [vmem:[%s4526_s29 + $0x148] sm:$0xff]  ;;  %v1935_v29 = vld [vmem:[%s4526_s29 + $0x300] sm:$0xff] }
  0x3a   : > { %3634 = vmatprep.mubr.msk.f32.mxu1 %vm4463_vm0, %v4464_v6  ;;  %3807 = vmatprep.mubr.msk.f32.mxu0 %vm4463_vm0, %v4464_v6 }
  0x3d   : > { %3635 = vmatmul.mubr.msk.f32.gmra.mrb[22].mxu1 %vm481_vm1, %v437_v30  ;;  %3808 = vmatmul.mubr.msk.f32.gmra.mrb[22].mxu0 %vm481_vm1, %v1905_v31  ;;  %v468_v30 = vld [vmem:[%s4526_s29 + $0x150] sm:$0xff]  ;;  %v1936_v31 = vld [vmem:[%s4526_s29 + $0x308] sm:$0xff] }
  0x3e   : > { %3637 = vmatprep.mubr.msk.f32.mxu1 %vm4463_vm0, %v4464_v6  ;;  %3810 = vmatprep.mubr.msk.f32.mxu0 %vm4463_vm0, %v4464_v6 }
  0x41   : > { %3638 = vmatmul.mubr.msk.f32.gmra.mrb[24].mxu1 %vm481_vm1, %v438_v32  ;;  %3811 = vmatmul.mubr.msk.f32.gmra.mrb[24].mxu0 %vm481_vm1, %v1906_v33  ;;  %v469_v32 = vld [vmem:[%s4526_s29 + $0x158] sm:$0xff]  ;;  %v1937_v33 = vld [vmem:[%s4526_s29 + $0x310] sm:$0xff] }
  0x42   : > { %3640 = vmatprep.mubr.msk.f32.mxu1 %vm4463_vm0, %v4464_v6  ;;  %3813 = vmatprep.mubr.msk.f32.mxu0 %vm4463_vm0, %v4464_v6 }
  0x45   : > { %3641 = vmatmul.mubr.msk.f32.gmra.mrb[26].mxu1 %vm481_vm1, %v439_v34  ;;  %3814 = vmatmul.mubr.msk.f32.gmra.mrb[26].mxu0 %vm481_vm1, %v1907_v35  ;;  %v470_v34 = vld [vmem:[%s4526_s29 + $0x160] sm:$0xff]  ;;  %v1938_v35 = vld [vmem:[%s4526_s29 + $0x318] sm:$0xff] }
  0x46   : > { %3643 = vmatprep.mubr.msk.f32.mxu1 %vm4463_vm0, %v4464_v6  ;;  %3816 = vmatprep.mubr.msk.f32.mxu0 %vm4463_vm0, %v4464_v6 }
  0x49   : > { %3644 = vmatmul.mubr.msk.f32.gmra.mrb[28].mxu1 %vm481_vm1, %v440_v36  ;;  %3817 = vmatmul.mubr.msk.f32.gmra.mrb[28].mxu0 %vm481_vm1, %v1908_v37  ;;  %v471_v36 = vld [vmem:[%s4526_s29 + $0x168] sm:$0xff]  ;;  %v1939_v37 = vld [vmem:[%s4526_s29 + $0x320] sm:$0xff] }
  0x4a   : > { %3646 = vmatprep.mubr.msk.f32.mxu1 %vm4463_vm0, %v4464_v6  ;;  %3819 = vmatprep.mubr.msk.f32.mxu0 %vm4463_vm0, %v4464_v6 }
  0x4d   : > { %3647 = vmatmul.mubr.msk.f32.gmra.mrb[30].mxu1 %vm481_vm1, %v441_v38  ;;  %3820 = vmatmul.mubr.msk.f32.gmra.mrb[30].mxu0 %vm481_vm1, %v1909_v39  ;;  %v472_v38 = vld [vmem:[%s4526_s29 + $0x170] sm:$0xff]  ;;  %v1940_v39 = vld [vmem:[%s4526_s29 + $0x328] sm:$0xff] }
  0x4e   : > { %3649 = vmatprep.mubr.msk.f32.mxu1 %vm4463_vm0, %v4464_v6  ;;  %3822 = vmatprep.mubr.msk.f32.mxu0 %vm4463_vm0, %v4464_v6 }
  0x51   : > { %3650 = vmatmul.mubr.msk.f32.gmra.mrb[32].mxu1 %vm481_vm1, %v442_v40  ;;  %3823 = vmatmul.mubr.msk.f32.gmra.mrb[32].mxu0 %vm481_vm1, %v1910_v41  ;;  %v473_v40 = vld [vmem:[%s4526_s29 + $0x178] sm:$0xff]  ;;  %v1941_v41 = vld [vmem:[%s4526_s29 + $0x330] sm:$0xff] }
  0x52   : > { %3652 = vmatprep.mubr.msk.f32.mxu1 %vm4463_vm0, %v4464_v6  ;;  %3825 = vmatprep.mubr.msk.f32.mxu0 %vm4463_vm0, %v4464_v6 }
  0x55   : > { %3653 = vmatmul.mubr.msk.f32.gmra.mrb[34].mxu1 %vm481_vm1, %v443_v42  ;;  %3826 = vmatmul.mubr.msk.f32.gmra.mrb[34].mxu0 %vm481_vm1, %v1911_v43  ;;  %v474_v42 = vld [vmem:[%s4526_s29 + $0x180] sm:$0xff]  ;;  %v1942_v43 = vld [vmem:[%s4526_s29 + $0x338] sm:$0xff] }
  0x56   : > { %3655 = vmatprep.mubr.msk.f32.mxu1 %vm4463_vm0, %v4464_v6  ;;  %3828 = vmatprep.mubr.msk.f32.mxu0 %vm4463_vm0, %v4464_v6 }
  0x59   : > { %3656 = vmatmul.mubr.msk.f32.gmra.mrb[36].mxu1 %vm481_vm1, %v444_v44  ;;  %3829 = vmatmul.mubr.msk.f32.gmra.mrb[36].mxu0 %vm481_vm1, %v1912_v45  ;;  %v475_v44 = vld [vmem:[%s4526_s29 + $0x188] sm:$0xff]  ;;  %v1943_v45 = vld [vmem:[%s4526_s29 + $0x340] sm:$0xff] }
  0x5a   : > { %3658 = vmatprep.mubr.msk.f32.mxu1 %vm4463_vm0, %v4464_v6  ;;  %3831 = vmatprep.mubr.msk.f32.mxu0 %vm4463_vm0, %v4464_v6 }
  0x5d   : > { %3659 = vmatmul.mubr.msk.f32.gmra.mrb[38].mxu1 %vm481_vm1, %v445_v46  ;;  %3832 = vmatmul.mubr.msk.f32.gmra.mrb[38].mxu0 %vm481_vm1, %v1913_v47  ;;  %v476_v46 = vld [vmem:[%s4526_s29 + $0x190] sm:$0xff]  ;;  %v1944_v47 = vld [vmem:[%s4526_s29 + $0x348] sm:$0xff] }
  0x5e   : > { %3661 = vmatprep.mubr.msk.f32.mxu1 %vm4463_vm0, %v4464_v6  ;;  %3834 = vmatprep.mubr.msk.f32.mxu0 %vm4463_vm0, %v4464_v6 }
  0x61   : > { %3662 = vmatmul.mubr.msk.f32.gmra.mrb[40].mxu1 %vm481_vm1, %v446_v48  ;;  %3835 = vmatmul.mubr.msk.f32.gmra.mrb[40].mxu0 %vm481_vm1, %v1914_v49  ;;  %v477_v48 = vld [vmem:[%s4526_s29 + $0x198] sm:$0xff]  ;;  %v1945_v49 = vld [vmem:[%s4526_s29 + $0x350] sm:$0xff] }
  0x62   : > { %3664 = vmatprep.mubr.msk.f32.mxu1 %vm4463_vm0, %v4464_v6  ;;  %3837 = vmatprep.mubr.msk.f32.mxu0 %vm4463_vm0, %v4464_v6 }
  0x65   : > { %3665 = vmatmul.mubr.msk.f32.gmra.mrb[42].mxu1 %vm481_vm1, %v447_v50  ;;  %3838 = vmatmul.mubr.msk.f32.gmra.mrb[42].mxu0 %vm481_vm1, %v1915_v51  ;;  %v478_v50 = vld [vmem:[%s4526_s29 + $0x1a0] sm:$0xff]  ;;  %v1946_v51 = vld [vmem:[%s4526_s29 + $0x358] sm:$0xff] }
  0x66   : > { %3667 = vmatprep.mubr.msk.f32.mxu1 %vm4463_vm0, %v4464_v6  ;;  %3840 = vmatprep.mubr.msk.f32.mxu0 %vm4463_vm0, %v4464_v6 }
  0x69   : > { %3668 = vmatmul.mubr.msk.f32.gmra.mrb[44].mxu1 %vm481_vm1, %v448_v52  ;;  %3841 = vmatmul.mubr.msk.f32.gmra.mrb[44].mxu0 %vm481_vm1, %v1916_v53  ;;  %v479_v52 = vld [vmem:[%s4526_s29 + $0x1a8] sm:$0xff]  ;;  %v1947_v53 = vld [vmem:[%s4526_s29 + $0x360] sm:$0xff] }
  0x6a   : > { %3670 = vmatprep.mubr.msk.f32.mxu1 %vm4463_vm0, %v4464_v6  ;;  %3843 = vmatprep.mubr.msk.f32.mxu0 %vm4463_vm0, %v4464_v6 }
  0x6d   : > { %3671 = vmatmul.mubr.msk.f32.gmra.mrb[46].mxu1 %vm481_vm1, %v449_v54  ;;  %3844 = vmatmul.mubr.msk.f32.gmra.mrb[46].mxu0 %vm481_vm1, %v1917_v55 }
  0x6e   : > { %3673 = vmatprep.mubr.msk.f32.mxu1 %vm4463_vm0, %v4464_v6  ;;  %3846 = vmatprep.mubr.msk.f32.mxu0 %vm4463_vm0, %v4464_v6 }
  0x71   : > { %3674 = vmatmul.mubr.msk.f32.gmra.mrb[48].mxu1 %vm481_vm1, %v450_v56  ;;  %3847 = vmatmul.mubr.msk.f32.gmra.mrb[48].mxu0 %vm481_vm1, %v1918_v57 }
  0x72   : > { %3676 = vmatprep.mubr.msk.f32.mxu1 %vm4463_vm0, %v4464_v6  ;;  %3849 = vmatprep.mubr.msk.f32.mxu0 %vm4463_vm0, %v4464_v6 }
  0x75   : > { %3677 = vmatmul.mubr.msk.f32.gmra.mrb[50].mxu1 %vm481_vm1, %v451_v58  ;;  %3850 = vmatmul.mubr.msk.f32.gmra.mrb[50].mxu0 %vm481_vm1, %v1919_v59  ;;  %v480_v58 = vld [vmem:[%s4526_s29 + $0x1b0] sm:$0xff]  ;;  %v1948_v59 = vld [vmem:[%s4526_s29 + $0x368] sm:$0xff] }
  0x76   : > { %3679 = vmatprep.mubr.msk.f32.mxu1 %vm4463_vm0, %v4464_v6  ;;  %3852 = vmatprep.mubr.msk.f32.mxu0 %vm4463_vm0, %v4464_v6 }
  0x79   : > { %3680 = vmatmul.mubr.msk.f32.gmra.mrb[52].mxu1 %vm481_vm1, %v452_v60  ;;  %3853 = vmatmul.mubr.msk.f32.gmra.mrb[52].mxu0 %vm481_vm1, %v1920_v61  ;;  %v206_v60 = vld [vmem:[%s6137_s2 + $0x8] sm:$0xff] }
  0x7a   : > { %3682 = vmatprep.mubr.msk.f32.mxu1 %vm4463_vm0, %v4464_v6  ;;  %3855 = vmatprep.mubr.msk.f32.mxu0 %vm4463_vm0, %v4464_v6 }
  0x7d   : > { %3683 = vmatmul.mubr.msk.f32.gmra.mrb[54].mxu1 %vm481_vm1, %v453_v62  ;;  %3856 = vmatmul.mubr.msk.f32.gmra.mrb[54].mxu0 %vm481_vm1, %v1921_v63 }
  0x7e   : > { %3685 = vmatprep.mubr.msk.f32.mxu1 %vm4463_vm0, %v4464_v6  ;;  %3858 = vmatprep.mubr.msk.f32.mxu0 %vm4463_vm0, %v4464_v6 }
  0x81   : > { %3686 = vmatmul.mubr.msk.f32.gmra.mrb[56].mxu1 %vm481_vm1, %v454_v0  ;;  %3859 = vmatmul.mubr.msk.f32.gmra.mrb[56].mxu0 %vm481_vm1, %v1922_v1 }
  0x82   : > { %3688 = vmatprep.mubr.msk.f32.mxu1 %vm4463_vm0, %v4464_v6  ;;  %3861 = vmatprep.mubr.msk.f32.mxu0 %vm4463_vm0, %v4464_v6 }
  0x85   : > { %3689 = vmatmul.mubr.msk.f32.gmra.mrb[58].mxu1 %vm481_vm1, %v455_v2  ;;  %3862 = vmatmul.mubr.msk.f32.gmra.mrb[58].mxu0 %vm481_vm1, %v1923_v4 }
  0x86   : > { %3691 = vmatprep.mubr.msk.f32.mxu1 %vm4463_vm0, %v4464_v6  ;;  %3864 = vmatprep.mubr.msk.f32.mxu0 %vm4463_vm0, %v4464_v6 }
  0x89   : > { %3692 = vmatmul.mubr.msk.f32.gmra.mrb[60].mxu1 %vm481_vm1, %v456_v5  ;;  %3865 = vmatmul.mubr.msk.f32.gmra.mrb[60].mxu0 %vm481_vm1, %v1924_v7 }
  0x8a   : > { %3694 = vmatprep.mubr.msk.f32.mxu1 %vm4463_vm0, %v4464_v6  ;;  %3867 = vmatprep.mubr.msk.f32.mxu0 %vm4463_vm0, %v4464_v6 }
  0x8d   : > { %3695 = vmatmul.mubr.msk.f32.gmra.mrb[62].mxu1 %vm481_vm1, %v457_v8  ;;  %3868 = vmatmul.mubr.msk.f32.gmra.mrb[62].mxu0 %vm481_vm1, %v1925_v9 }
  0x8e   : > { %3697 = vmatprep.mubr.msk.f32.mxu1 %vm4463_vm0, %v4464_v6  ;;  %3870 = vmatprep.mubr.msk.f32.mxu0 %vm4463_vm0, %v4464_v6 }
  0x91   : > { %3698 = vmatmul.mubr.msk.f32.gmra.mrb[64].mxu1 %vm481_vm1, %v458_v10  ;;  %3871 = vmatmul.mubr.msk.f32.gmra.mrb[64].mxu0 %vm481_vm1, %v1926_v11 }
  0x92   : > { %3700 = vmatprep.mubr.msk.f32.mxu1 %vm4463_vm0, %v4464_v6  ;;  %3873 = vmatprep.mubr.msk.f32.mxu0 %vm4463_vm0, %v4464_v6 }
  0x95   : > { %3701 = vmatmul.mubr.msk.f32.gmra.mrb[66].mxu1 %vm481_vm1, %v459_v12  ;;  %3874 = vmatmul.mubr.msk.f32.gmra.mrb[66].mxu0 %vm481_vm1, %v1927_v13 }
  0x96   : > { %3703 = vmatprep.mubr.msk.f32.mxu1 %vm4463_vm0, %v4464_v6  ;;  %3876 = vmatprep.mubr.msk.f32.mxu0 %vm4463_vm0, %v4464_v6 }
  0x99   : > { %3704 = vmatmul.mubr.msk.f32.gmra.mrb[68].mxu1 %vm481_vm1, %v460_v14  ;;  %3877 = vmatmul.mubr.msk.f32.gmra.mrb[68].mxu0 %vm481_vm1, %v1928_v15 }
  0x9a   : > { %3706 = vmatprep.mubr.msk.f32.mxu1 %vm4463_vm0, %v4464_v6  ;;  %3879 = vmatprep.mubr.msk.f32.mxu0 %vm4463_vm0, %v4464_v6 }
  0x9d   : > { %3707 = vmatmul.mubr.msk.f32.gmra.mrb[70].mxu1 %vm481_vm1, %v461_v16  ;;  %3880 = vmatmul.mubr.msk.f32.gmra.mrb[70].mxu0 %vm481_vm1, %v1929_v17 }
  0x9e   : > { %3709 = vmatprep.mubr.msk.f32.mxu1 %vm4463_vm0, %v4464_v6  ;;  %3882 = vmatprep.mubr.msk.f32.mxu0 %vm4463_vm0, %v4464_v6 }
  0xa1   : > { %3710 = vmatmul.mubr.msk.f32.gmra.mrb[72].mxu1 %vm481_vm1, %v462_v18  ;;  %3883 = vmatmul.mubr.msk.f32.gmra.mrb[72].mxu0 %vm481_vm1, %v1930_v19 }
  0xa2   : > { %3712 = vmatprep.mubr.msk.f32.mxu1 %vm4463_vm0, %v4464_v6  ;;  %3885 = vmatprep.mubr.msk.f32.mxu0 %vm4463_vm0, %v4464_v6 }
  0xa5   : > { %3713 = vmatmul.mubr.msk.f32.gmra.mrb[74].mxu1 %vm481_vm1, %v463_v20  ;;  %3886 = vmatmul.mubr.msk.f32.gmra.mrb[74].mxu0 %vm481_vm1, %v1931_v21 }
  0xa6   : > { %3715 = vmatprep.mubr.msk.f32.mxu1 %vm4463_vm0, %v4464_v6  ;;  %3888 = vmatprep.mubr.msk.f32.mxu0 %vm4463_vm0, %v4464_v6 }
  0xa9   : > { %3716 = vmatmul.mubr.msk.f32.gmra.mrb[76].mxu1 %vm481_vm1, %v464_v22  ;;  %3889 = vmatmul.mubr.msk.f32.gmra.mrb[76].mxu0 %vm481_vm1, %v1932_v23 }
  0xaa   : > { %3718 = vmatprep.mubr.msk.f32.mxu1 %vm4463_vm0, %v4464_v6  ;;  %3891 = vmatprep.mubr.msk.f32.mxu0 %vm4463_vm0, %v4464_v6 }
  0xad   : > { %3719 = vmatmul.mubr.msk.f32.gmra.mrb[78].mxu1 %vm481_vm1, %v465_v24  ;;  %3892 = vmatmul.mubr.msk.f32.gmra.mrb[78].mxu0 %vm481_vm1, %v1933_v25 }
  0xae   : > { %3721 = vmatprep.mubr.msk.f32.mxu1 %vm4463_vm0, %v4464_v6  ;;  %3894 = vmatprep.mubr.msk.f32.mxu0 %vm4463_vm0, %v4464_v6 }
  0xb1   : > { %3722 = vmatmul.mubr.msk.f32.gmra.mrb[80].mxu1 %vm481_vm1, %v466_v26  ;;  %3895 = vmatmul.mubr.msk.f32.gmra.mrb[80].mxu0 %vm481_vm1, %v1934_v27 }
  0xb2   : > { %3724 = vmatprep.mubr.msk.f32.mxu1 %vm4463_vm0, %v4464_v6  ;;  %3897 = vmatprep.mubr.msk.f32.mxu0 %vm4463_vm0, %v4464_v6 }
  0xb5   : > { %3725 = vmatmul.mubr.msk.f32.gmra.mrb[82].mxu1 %vm481_vm1, %v467_v28  ;;  %3898 = vmatmul.mubr.msk.f32.gmra.mrb[82].mxu0 %vm481_vm1, %v1935_v29 }
  0xb6   : > { %3727 = vmatprep.mubr.msk.f32.mxu1 %vm4463_vm0, %v4464_v6  ;;  %3900 = vmatprep.mubr.msk.f32.mxu0 %vm4463_vm0, %v4464_v6 }
  0xb9   : > { %3728 = vmatmul.mubr.msk.f32.gmra.mrb[84].mxu1 %vm481_vm1, %v468_v30  ;;  %3901 = vmatmul.mubr.msk.f32.gmra.mrb[84].mxu0 %vm481_vm1, %v1936_v31 }
  0xba   : > { %3730 = vmatprep.mubr.msk.f32.mxu1 %vm4463_vm0, %v4464_v6  ;;  %3903 = vmatprep.mubr.msk.f32.mxu0 %vm4463_vm0, %v4464_v6 }
  0xbd   : > { %3731 = vmatmul.mubr.msk.f32.gmra.mrb[86].mxu1 %vm481_vm1, %v469_v32  ;;  %3904 = vmatmul.mubr.msk.f32.gmra.mrb[86].mxu0 %vm481_vm1, %v1937_v33 }
  0xbe   : > { %3733 = vmatprep.mubr.msk.f32.mxu1 %vm4463_vm0, %v4464_v6  ;;  %3906 = vmatprep.mubr.msk.f32.mxu0 %vm4463_vm0, %v4464_v6 }
  0xc1   : > { %3734 = vmatmul.mubr.msk.f32.gmra.mrb[88].mxu1 %vm481_vm1, %v470_v34  ;;  %3907 = vmatmul.mubr.msk.f32.gmra.mrb[88].mxu0 %vm481_vm1, %v1938_v35 }
  0xc2   : > { %3736 = vmatprep.mubr.msk.f32.mxu1 %vm4463_vm0, %v4464_v6  ;;  %3909 = vmatprep.mubr.msk.f32.mxu0 %vm4463_vm0, %v4464_v6 }
  0xc5   : > { %3737 = vmatmul.mubr.msk.f32.gmra.mrb[90].mxu1 %vm481_vm1, %v471_v36  ;;  %3910 = vmatmul.mubr.msk.f32.gmra.mrb[90].mxu0 %vm481_vm1, %v1939_v37 }
  0xc6   : > { %3739 = vmatprep.mubr.msk.f32.mxu1 %vm4463_vm0, %v4464_v6  ;;  %3912 = vmatprep.mubr.msk.f32.mxu0 %vm4463_vm0, %v4464_v6 }
  0xc9   : > { %3740 = vmatmul.mubr.msk.f32.gmra.mrb[92].mxu1 %vm481_vm1, %v472_v38  ;;  %3913 = vmatmul.mubr.msk.f32.gmra.mrb[92].mxu0 %vm481_vm1, %v1940_v39 }
  0xca   : > { %3742 = vmatprep.mubr.msk.f32.mxu1 %vm4463_vm0, %v4464_v6  ;;  %3915 = vmatprep.mubr.msk.f32.mxu0 %vm4463_vm0, %v4464_v6 }
  0xcd   : > { %3743 = vmatmul.mubr.msk.f32.gmra.mrb[94].mxu1 %vm481_vm1, %v473_v40  ;;  %3916 = vmatmul.mubr.msk.f32.gmra.mrb[94].mxu0 %vm481_vm1, %v1941_v41 }
  0xce   : > { %3745 = vmatprep.mubr.msk.f32.mxu1 %vm4463_vm0, %v4464_v6  ;;  %3918 = vmatprep.mubr.msk.f32.mxu0 %vm4463_vm0, %v4464_v6 }
  0xd1   : > { %3746 = vmatmul.mubr.msk.f32.gmra.mrb[96].mxu1 %vm481_vm1, %v474_v42  ;;  %3919 = vmatmul.mubr.msk.f32.gmra.mrb[96].mxu0 %vm481_vm1, %v1942_v43 }
  0xd2   : > { %3748 = vmatprep.mubr.msk.f32.mxu1 %vm4463_vm0, %v4464_v6  ;;  %3921 = vmatprep.mubr.msk.f32.mxu0 %vm4463_vm0, %v4464_v6 }
  0xd5   : > { %3749 = vmatmul.mubr.msk.f32.gmra.mrb[98].mxu1 %vm481_vm1, %v475_v44  ;;  %3922 = vmatmul.mubr.msk.f32.gmra.mrb[98].mxu0 %vm481_vm1, %v1943_v45 }
  0xd6   : > { %3751 = vmatprep.mubr.msk.f32.mxu1 %vm4463_vm0, %v4464_v6  ;;  %3924 = vmatprep.mubr.msk.f32.mxu0 %vm4463_vm0, %v4464_v6 }
  0xd9   : > { %3752 = vmatmul.mubr.msk.f32.gmra.mrb[100].mxu1 %vm481_vm1, %v476_v46  ;;  %3925 = vmatmul.mubr.msk.f32.gmra.mrb[100].mxu0 %vm481_vm1, %v1944_v47 }
  0xda   : > { %3754 = vmatprep.mubr.msk.f32.mxu1 %vm4463_vm0, %v4464_v6  ;;  %3927 = vmatprep.mubr.msk.f32.mxu0 %vm4463_vm0, %v4464_v6 }
  0xdd   : > { %3755 = vmatmul.mubr.msk.f32.gmra.mrb[102].mxu1 %vm481_vm1, %v477_v48  ;;  %3928 = vmatmul.mubr.msk.f32.gmra.mrb[102].mxu0 %vm481_vm1, %v1945_v49 }
  0xde   : > { %3757 = vmatprep.mubr.msk.f32.mxu1 %vm4463_vm0, %v4464_v6  ;;  %3930 = vmatprep.mubr.msk.f32.mxu0 %vm4463_vm0, %v4464_v6 }
  0xe1   : > { %3758 = vmatmul.mubr.msk.f32.gmra.mrb[104].mxu1 %vm481_vm1, %v478_v50  ;;  %3931 = vmatmul.mubr.msk.f32.gmra.mrb[104].mxu0 %vm481_vm1, %v1946_v51 }
  0xe2   : > { %3760 = vmatprep.mubr.msk.f32.mxu1 %vm4463_vm0, %v4464_v6  ;;  %3933 = vmatprep.mubr.msk.f32.mxu0 %vm4463_vm0, %v4464_v6 }
  0xe4   : > { %v713_v54 = vpop.f32.mrb[0].mxu1  ;;  %v2180_v55 = vpop.f32.mrb[0].mxu0 }
  0xe5   : > { %v3603_v56 = vpop.f32.mrb[1].mxu1  ;;  %v3776_v57 = vpop.f32.mrb[1].mxu0  ;;  %3761 = vmatmul.mubr.msk.f32.gmra.mrb[106].mxu1 %vm481_vm1, %v479_v52  ;;  %3934 = vmatmul.mubr.msk.f32.gmra.mrb[106].mxu0 %vm481_vm1, %v1947_v53 }
  0xe6   : > { %3763 = vmatprep.mubr.msk.f32.mxu1 %vm4463_vm0, %v4464_v6  ;;  %3936 = vmatprep.mubr.msk.f32.mxu0 %vm4463_vm0, %v4464_v6 }
  0xe8   : > { %v718_v61 = vpop.f32.mrb[2].mxu1  ;;  %v2185_v62 = vpop.f32.mrb[2].mxu0 }
  0xe9   : > { %v3946_v63 = vpack.c.bf16 %v718_v61, %v713_v54  ;;  %v4033_v0 = vpack.c.bf16 %v2185_v62, %v2180_v55  ;;  %v3606_v1 = vpop.f32.mrb[3].mxu1  ;;  %v3779_v2 = vpop.f32.mrb[3].mxu0  ;;  %3764 = vmatmul.mubr.msk.f32.gmra.mrb[108].mxu1 %vm481_vm1, %v480_v58  ;;  %3937 = vmatmul.mubr.msk.f32.gmra.mrb[108].mxu0 %vm481_vm1, %v1948_v59 }
  0xea   : > { %1223 = vmatprep.mubr.f32.mxu1 %v206_v60  ;;  %2518 = vmatprep.mubr.f32.mxu0 %v206_v60 }
  0xeb   : > { %3947 = vmatpush1.bf16.msra.mxu1 %v3946_v63  ;;  %4034 = vmatpush1.bf16.msra.mxu0 %v4033_v0 }
  0xec   : > { %v723_v4 = vpop.f32.mrb[4].mxu1  ;;  %v2190_v5 = vpop.f32.mrb[4].mxu0  ;;  %3948 = vmatprep.subr.bf16.mxu1 %v4462_v3  ;;  %4035 = vmatprep.subr.bf16.mxu0 %v4462_v3 }
  0xed   : > { %v3609_v7 = vpop.f32.mrb[5].mxu1  ;;  %v3782_v8 = vpop.f32.mrb[5].mxu0 }
  0xf0   : > { %v728_v9 = vpop.f32.mrb[6].mxu1  ;;  %v2195_v10 = vpop.f32.mrb[6].mxu0 }
  0xf1   : > { %v3949_v11 = vpack.c.bf16 %v728_v9, %v723_v4  ;;  %v4036_v12 = vpack.c.bf16 %v2195_v10, %v2190_v5  ;;  %v3612_v13 = vpop.f32.mrb[7].mxu1  ;;  %v3785_v14 = vpop.f32.mrb[7].mxu0 }
  0xf3   : > { %3950 = vmatpush1.bf16.msra.mxu1 %v3949_v11  ;;  %4037 = vmatpush1.bf16.msra.mxu0 %v4036_v12 }
  0xf4   : > { %v733_v15 = vpop.f32.mrb[8].mxu1  ;;  %v2200_v16 = vpop.f32.mrb[8].mxu0  ;;  %3951 = vmatprep.subr.bf16.mxu1 %v4462_v3  ;;  %4038 = vmatprep.subr.bf16.mxu0 %v4462_v3 }
  0xf5   : > { %v3615_v17 = vpop.f32.mrb[9].mxu1  ;;  %v3788_v18 = vpop.f32.mrb[9].mxu0 }
  0xf8   : > { %v738_v19 = vpop.f32.mrb[10].mxu1  ;;  %v2205_v20 = vpop.f32.mrb[10].mxu0 }
  0xf9   : > { %v3952_v21 = vpack.c.bf16 %v738_v19, %v733_v15  ;;  %v4039_v22 = vpack.c.bf16 %v2205_v20, %v2200_v16  ;;  %v3618_v23 = vpop.f32.mrb[11].mxu1  ;;  %v3791_v24 = vpop.f32.mrb[11].mxu0 }
  0xfb   : > { %3953 = vmatpush1.bf16.msra.mxu1 %v3952_v21  ;;  %4040 = vmatpush1.bf16.msra.mxu0 %v4039_v22 }
  0xfc   : > { %v743_v25 = vpop.f32.mrb[12].mxu1  ;;  %v2210_v26 = vpop.f32.mrb[12].mxu0  ;;  %3954 = vmatprep.subr.bf16.mxu1 %v4462_v3  ;;  %4041 = vmatprep.subr.bf16.mxu0 %v4462_v3 }
  0xfd   : > { %v3621_v27 = vpop.f32.mrb[13].mxu1  ;;  %v3794_v28 = vpop.f32.mrb[13].mxu0 }
 0x100   : > { %v748_v29 = vpop.f32.mrb[14].mxu1  ;;  %v2215_v30 = vpop.f32.mrb[14].mxu0 }
 0x101   : > { %v3955_v31 = vpack.c.bf16 %v748_v29, %v743_v25  ;;  %v4042_v32 = vpack.c.bf16 %v2215_v30, %v2210_v26  ;;  %v3624_v33 = vpop.f32.mrb[15].mxu1  ;;  %v3797_v34 = vpop.f32.mrb[15].mxu0 }
 0x103   : > { %3956 = vmatpush1.bf16.msra.mxu1 %v3955_v31  ;;  %4043 = vmatpush1.bf16.msra.mxu0 %v4042_v32 }
 0x104   : > { %v753_v35 = vpop.f32.mrb[16].mxu1  ;;  %v2220_v36 = vpop.f32.mrb[16].mxu0  ;;  %3957 = vmatprep.subr.bf16.mxu1 %v4462_v3  ;;  %4044 = vmatprep.subr.bf16.mxu0 %v4462_v3 }
 0x105   : > { %v3627_v37 = vpop.f32.mrb[17].mxu1  ;;  %v3800_v38 = vpop.f32.mrb[17].mxu0 }
 0x108   : > { %v758_v39 = vpop.f32.mrb[18].mxu1  ;;  %v2225_v40 = vpop.f32.mrb[18].mxu0 }
 0x109   : > { %v3958_v41 = vpack.c.bf16 %v758_v39, %v753_v35  ;;  %v4045_v42 = vpack.c.bf16 %v2225_v40, %v2220_v36  ;;  %v3630_v43 = vpop.f32.mrb[19].mxu1  ;;  %v3803_v44 = vpop.f32.mrb[19].mxu0 }
 0x10b   : > { %3959 = vmatpush1.bf16.msra.mxu1 %v3958_v41  ;;  %4046 = vmatpush1.bf16.msra.mxu0 %v4045_v42 }
 0x10c   : > { %v763_v45 = vpop.f32.mrb[20].mxu1  ;;  %v2230_v46 = vpop.f32.mrb[20].mxu0  ;;  %3960 = vmatprep.subr.bf16.mxu1 %v4462_v3  ;;  %4047 = vmatprep.subr.bf16.mxu0 %v4462_v3 }
 0x10d   : > { %v3633_v47 = vpop.f32.mrb[21].mxu1  ;;  %v3806_v48 = vpop.f32.mrb[21].mxu0 }
 0x110   : > { %v768_v49 = vpop.f32.mrb[22].mxu1  ;;  %v2235_v50 = vpop.f32.mrb[22].mxu0 }
 0x111   : > { %v3961_v51 = vpack.c.bf16 %v768_v49, %v763_v45  ;;  %v4048_v52 = vpack.c.bf16 %v2235_v50, %v2230_v46  ;;  %v3636_v53 = vpop.f32.mrb[23].mxu1  ;;  %v3809_v54 = vpop.f32.mrb[23].mxu0 }
 0x113   : > { %3962 = vmatpush1.bf16.msra.mxu1 %v3961_v51  ;;  %4049 = vmatpush1.bf16.msra.mxu0 %v4048_v52 }
 0x114   : > { %v773_v55 = vpop.f32.mrb[24].mxu1  ;;  %v2240_v56 = vpop.f32.mrb[24].mxu0  ;;  %3963 = vmatprep.subr.bf16.mxu1 %v4462_v3  ;;  %4050 = vmatprep.subr.bf16.mxu0 %v4462_v3 }
 0x115   : > { %v3639_v57 = vpop.f32.mrb[25].mxu1  ;;  %v3812_v58 = vpop.f32.mrb[25].mxu0 }
 0x118   : > { %v778_v59 = vpop.f32.mrb[26].mxu1  ;;  %v2245_v60 = vpop.f32.mrb[26].mxu0 }
 0x119   : > { %v3964_v61 = vpack.c.bf16 %v778_v59, %v773_v55  ;;  %v4051_v62 = vpack.c.bf16 %v2245_v60, %v2240_v56  ;;  %v3642_v63 = vpop.f32.mrb[27].mxu1  ;;  %v3815_v0 = vpop.f32.mrb[27].mxu0 }
 0x11b   : > { %3965 = vmatpush1.bf16.msra.mxu1 %v3964_v61  ;;  %4052 = vmatpush1.bf16.msra.mxu0 %v4051_v62 }
 0x11c   : > { %v783_v1 = vpop.f32.mrb[28].mxu1  ;;  %v2250_v2 = vpop.f32.mrb[28].mxu0  ;;  %3966 = vmatprep.subr.bf16.mxu1 %v4462_v3  ;;  %4053 = vmatprep.subr.bf16.mxu0 %v4462_v3 }
 0x11d   : > { %v3645_v4 = vpop.f32.mrb[29].mxu1  ;;  %v3818_v5 = vpop.f32.mrb[29].mxu0 }
 0x120   : > { %v788_v7 = vpop.f32.mrb[30].mxu1  ;;  %v2255_v8 = vpop.f32.mrb[30].mxu0 }
 0x121   : > { %v3967_v9 = vpack.c.bf16 %v788_v7, %v783_v1  ;;  %v4054_v10 = vpack.c.bf16 %v2255_v8, %v2250_v2  ;;  %v3648_v11 = vpop.f32.mrb[31].mxu1  ;;  %v3821_v12 = vpop.f32.mrb[31].mxu0 }
 0x123   : > { %3968 = vmatpush1.bf16.msra.mxu1 %v3967_v9  ;;  %4055 = vmatpush1.bf16.msra.mxu0 %v4054_v10 }
 0x124   : > { %v793_v13 = vpop.f32.mrb[32].mxu1  ;;  %v2260_v14 = vpop.f32.mrb[32].mxu0  ;;  %3969 = vmatprep.subr.bf16.mxu1 %v4462_v3  ;;  %4056 = vmatprep.subr.bf16.mxu0 %v4462_v3 }
 0x125   : > { %v3651_v15 = vpop.f32.mrb[33].mxu1  ;;  %v3824_v16 = vpop.f32.mrb[33].mxu0 }
 0x128   : > { %v798_v17 = vpop.f32.mrb[34].mxu1  ;;  %v2265_v18 = vpop.f32.mrb[34].mxu0 }
 0x129   : > { %v3970_v19 = vpack.c.bf16 %v798_v17, %v793_v13  ;;  %v4057_v20 = vpack.c.bf16 %v2265_v18, %v2260_v14  ;;  %v3654_v21 = vpop.f32.mrb[35].mxu1  ;;  %v3827_v22 = vpop.f32.mrb[35].mxu0 }
 0x12b   : > { %3971 = vmatpush1.bf16.msra.mxu1 %v3970_v19  ;;  %4058 = vmatpush1.bf16.msra.mxu0 %v4057_v20 }
 0x12c   : > { %v803_v23 = vpop.f32.mrb[36].mxu1  ;;  %v2270_v24 = vpop.f32.mrb[36].mxu0  ;;  %3972 = vmatprep.subr.bf16.mxu1 %v4462_v3  ;;  %4059 = vmatprep.subr.bf16.mxu0 %v4462_v3 }
 0x12d   : > { %v3657_v25 = vpop.f32.mrb[37].mxu1  ;;  %v3830_v26 = vpop.f32.mrb[37].mxu0 }
 0x130   : > { %v808_v27 = vpop.f32.mrb[38].mxu1  ;;  %v2275_v28 = vpop.f32.mrb[38].mxu0 }
 0x131   : > { %v3973_v29 = vpack.c.bf16 %v808_v27, %v803_v23  ;;  %v4060_v30 = vpack.c.bf16 %v2275_v28, %v2270_v24  ;;  %v3660_v31 = vpop.f32.mrb[39].mxu1  ;;  %v3833_v32 = vpop.f32.mrb[39].mxu0 }
 0x132   : > { %v205_v31 = vld [vmem:[%s6137_s2] sm:$0xff]  ;;  %v210_v32 = vld [vmem:[%s6137_s2 + $0x28] sm:$0xff] }
 0x133   : > { %3974 = vmatpush1.bf16.msra.mxu1 %v3973_v29  ;;  %4061 = vmatpush1.bf16.msra.mxu0 %v4060_v30 }
 0x134   : > { %v813_v33 = vpop.f32.mrb[40].mxu1  ;;  %v2280_v34 = vpop.f32.mrb[40].mxu0  ;;  %3975 = vmatprep.subr.bf16.mxu1 %v4462_v3  ;;  %4062 = vmatprep.subr.bf16.mxu0 %v4462_v3 }
 0x135   : > { %v3663_v35 = vpop.f32.mrb[41].mxu1  ;;  %v3836_v36 = vpop.f32.mrb[41].mxu0 }
 0x138   : > { %v818_v37 = vpop.f32.mrb[42].mxu1  ;;  %v2285_v38 = vpop.f32.mrb[42].mxu0 }
 0x139   : > { %v3976_v39 = vpack.c.bf16 %v818_v37, %v813_v33  ;;  %v4063_v40 = vpack.c.bf16 %v2285_v38, %v2280_v34  ;;  %v3666_v41 = vpop.f32.mrb[43].mxu1  ;;  %v3839_v42 = vpop.f32.mrb[43].mxu0  ;;  %v209_v37 = vld [vmem:[%s6137_s2 + $0x20] sm:$0xff]  ;;  %v214_v38 = vld [vmem:[%s6137_s2 + $0x48] sm:$0xff] }
 0x13b   : > { %3977 = vmatpush1.bf16.msra.mxu1 %v3976_v39  ;;  %4064 = vmatpush1.bf16.msra.mxu0 %v4063_v40 }
 0x13c   : > { %v823_v43 = vpop.f32.mrb[44].mxu1  ;;  %v2290_v44 = vpop.f32.mrb[44].mxu0  ;;  %3978 = vmatprep.subr.bf16.mxu1 %v4462_v3  ;;  %4065 = vmatprep.subr.bf16.mxu0 %v4462_v3 }
 0x13d   : > { %v3669_v45 = vpop.f32.mrb[45].mxu1  ;;  %v3842_v46 = vpop.f32.mrb[45].mxu0 }
 0x13e   : > { %v213_v45 = vld [vmem:[%s6137_s2 + $0x40] sm:$0xff]  ;;  %v218_v46 = vld [vmem:[%s6137_s2 + $0x68] sm:$0xff] }
 0x140   : > { %v828_v47 = vpop.f32.mrb[46].mxu1  ;;  %v2295_v48 = vpop.f32.mrb[46].mxu0 }
 0x141   : > { %v3979_v49 = vpack.c.bf16 %v828_v47, %v823_v43  ;;  %v4066_v50 = vpack.c.bf16 %v2295_v48, %v2290_v44  ;;  %v3672_v51 = vpop.f32.mrb[47].mxu1  ;;  %v3845_v52 = vpop.f32.mrb[47].mxu0 }
 0x142   : > { %v217_v51 = vld [vmem:[%s6137_s2 + $0x60] sm:$0xff]  ;;  %v222_v52 = vld [vmem:[%s6137_s2 + $0x88] sm:$0xff] }
 0x143   : > { %3980 = vmatpush1.bf16.msra.mxu1 %v3979_v49  ;;  %4067 = vmatpush1.bf16.msra.mxu0 %v4066_v50 }
 0x144   : > { %v833_v53 = vpop.f32.mrb[48].mxu1  ;;  %v2300_v54 = vpop.f32.mrb[48].mxu0  ;;  %3981 = vmatprep.subr.bf16.mxu1 %v4462_v3  ;;  %4068 = vmatprep.subr.bf16.mxu0 %v4462_v3 }
 0x145   : > { %v3675_v55 = vpop.f32.mrb[49].mxu1  ;;  %v3848_v56 = vpop.f32.mrb[49].mxu0 }
 0x148   : > { %v838_v57 = vpop.f32.mrb[50].mxu1  ;;  %v2305_v58 = vpop.f32.mrb[50].mxu0 }
 0x149   : > { %v3982_v59 = vpack.c.bf16 %v838_v57, %v833_v53  ;;  %v4069_v60 = vpack.c.bf16 %v2305_v58, %v2300_v54  ;;  %v3678_v61 = vpop.f32.mrb[51].mxu1  ;;  %v3851_v62 = vpop.f32.mrb[51].mxu0 }
 0x14b   : > { %3983 = vmatpush1.bf16.msra.mxu1 %v3982_v59  ;;  %4070 = vmatpush1.bf16.msra.mxu0 %v4069_v60  ;;  %v221_v59 = vld [vmem:[%s6137_s2 + $0x80] sm:$0xff]  ;;  %v226_v60 = vld [vmem:[%s6137_s2 + $0xa8] sm:$0xff] }
 0x14c   : > { %v843_v63 = vpop.f32.mrb[52].mxu1  ;;  %v2310_v0 = vpop.f32.mrb[52].mxu0  ;;  %3984 = vmatprep.subr.bf16.mxu1 %v4462_v3  ;;  %4071 = vmatprep.subr.bf16.mxu0 %v4462_v3 }
 0x14d   : > { %v3681_v1 = vpop.f32.mrb[53].mxu1  ;;  %v3854_v2 = vpop.f32.mrb[53].mxu0 }
 0x14e   : > { %v225_v1 = vld [vmem:[%s6137_s2 + $0xa0] sm:$0xff]  ;;  %v230_v2 = vld [vmem:[%s6137_s2 + $0xc8] sm:$0xff] }
 0x150   : > { %v848_v4 = vpop.f32.mrb[54].mxu1  ;;  %v2315_v5 = vpop.f32.mrb[54].mxu0 }
 0x151   : > { %v3985_v7 = vpack.c.bf16 %v848_v4, %v843_v63  ;;  %v4072_v8 = vpack.c.bf16 %v2315_v5, %v2310_v0  ;;  %v3684_v9 = vpop.f32.mrb[55].mxu1  ;;  %v3857_v10 = vpop.f32.mrb[55].mxu0 }
 0x153   : > { %3986 = vmatpush1.bf16.msra.mxu1 %v3985_v7  ;;  %4073 = vmatpush1.bf16.msra.mxu0 %v4072_v8 }
 0x154   : > { %v853_v11 = vpop.f32.mrb[56].mxu1  ;;  %v2320_v12 = vpop.f32.mrb[56].mxu0  ;;  %3987 = vmatprep.subr.bf16.mxu1 %v4462_v3  ;;  %4074 = vmatprep.subr.bf16.mxu0 %v4462_v3 }
 0x155   : > { %v3687_v13 = vpop.f32.mrb[57].mxu1  ;;  %v3860_v14 = vpop.f32.mrb[57].mxu0 }
 0x158   : > { %v858_v15 = vpop.f32.mrb[58].mxu1  ;;  %v2325_v16 = vpop.f32.mrb[58].mxu0 }
 0x159   : > { %v3988_v17 = vpack.c.bf16 %v858_v15, %v853_v11  ;;  %v4075_v18 = vpack.c.bf16 %v2325_v16, %v2320_v12  ;;  %v3690_v19 = vpop.f32.mrb[59].mxu1  ;;  %v3863_v20 = vpop.f32.mrb[59].mxu0  ;;  %v229_v11 = vld [vmem:[%s6137_s2 + $0xc0] sm:$0xff]  ;;  %v234_v12 = vld [vmem:[%s6137_s2 + $0xe8] sm:$0xff] }
 0x15b   : > { %3989 = vmatpush1.bf16.msra.mxu1 %v3988_v17  ;;  %4076 = vmatpush1.bf16.msra.mxu0 %v4075_v18  ;;  %v233_v17 = vld [vmem:[%s6137_s2 + $0xe0] sm:$0xff]  ;;  %v238_v18 = vld [vmem:[%s6137_s2 + $0x108] sm:$0xff] }
 0x15c   : > { %v863_v21 = vpop.f32.mrb[60].mxu1  ;;  %v2330_v22 = vpop.f32.mrb[60].mxu0  ;;  %3990 = vmatprep.subr.bf16.mxu1 %v4462_v3  ;;  %4077 = vmatprep.subr.bf16.mxu0 %v4462_v3 }
 0x15d   : > { %v3693_v23 = vpop.f32.mrb[61].mxu1  ;;  %v3866_v24 = vpop.f32.mrb[61].mxu0 }
 0x160   : > { %v868_v25 = vpop.f32.mrb[62].mxu1  ;;  %v2335_v26 = vpop.f32.mrb[62].mxu0 }
 0x161   : > { %v3991_v27 = vpack.c.bf16 %v868_v25, %v863_v21  ;;  %v4078_v28 = vpack.c.bf16 %v2335_v26, %v2330_v22  ;;  %v3696_v29 = vpop.f32.mrb[63].mxu1  ;;  %v3869_v30 = vpop.f32.mrb[63].mxu0  ;;  %v237_v25 = vld [vmem:[%s6137_s2 + $0x100] sm:$0xff]  ;;  %v242_v26 = vld [vmem:[%s6137_s2 + $0x128] sm:$0xff] }
 0x163   : > { %3992 = vmatpush1.bf16.msra.mxu1 %v3991_v27  ;;  %4079 = vmatpush1.bf16.msra.mxu0 %v4078_v28 }
 0x164   : > { %v873_v33 = vpop.f32.mrb[64].mxu1  ;;  %v2340_v34 = vpop.f32.mrb[64].mxu0  ;;  %3993 = vmatprep.subr.bf16.mxu1 %v4462_v3  ;;  %4080 = vmatprep.subr.bf16.mxu0 %v4462_v3 }
 0x165   : > { %v3699_v35 = vpop.f32.mrb[65].mxu1  ;;  %v3872_v36 = vpop.f32.mrb[65].mxu0 }
 0x166   : > { %1224 = vmatmul.mubr.f32.vlgmr.msra.gmra.mrb[110].mxu1 %v205_v31  ;;  %2519 = vmatmul.mubr.f32.vlgmr.msra.gmra.mrb[110].mxu0 %v205_v31  ;;  %v241_v31 = vld [vmem:[%s6137_s2 + $0x120] sm:$0xff] }
 0x167   : > { %1228 = vmatprep.mubr.f32.mxu1 %v210_v32  ;;  %2523 = vmatprep.mubr.f32.mxu0 %v210_v32  ;;  %v246_v32 = vld [vmem:[%s6137_s2 + $0x148] sm:$0xff] }
 0x168   : > { %v878_v39 = vpop.f32.mrb[66].mxu1  ;;  %v2345_v40 = vpop.f32.mrb[66].mxu0 }
 0x169   : > { %v3994_v41 = vpack.c.bf16 %v878_v39, %v873_v33  ;;  %v4081_v42 = vpack.c.bf16 %v2345_v40, %v2340_v34  ;;  %v3702_v43 = vpop.f32.mrb[67].mxu1  ;;  %v3875_v44 = vpop.f32.mrb[67].mxu0  ;;  %v245_v39 = vld [vmem:[%s6137_s2 + $0x140] sm:$0xff]  ;;  %v250_v40 = vld [vmem:[%s6137_s2 + $0x168] sm:$0xff] }
 0x16a   : > { %1229 = vmatmul.mubr.f32.gmra.mrb[112].mxu1 %v209_v37  ;;  %2524 = vmatmul.mubr.f32.gmra.mrb[112].mxu0 %v209_v37 }
 0x16b   : > { %1233 = vmatprep.mubr.f32.mxu1 %v214_v38  ;;  %2528 = vmatprep.mubr.f32.mxu0 %v214_v38 }
 0x16c   : > { %3995 = vmatpush1.bf16.msra.mxu1 %v3994_v41  ;;  %4082 = vmatpush1.bf16.msra.mxu0 %v4081_v42  ;;  %v883_v47 = vpop.f32.mrb[68].mxu1  ;;  %v2350_v48 = vpop.f32.mrb[68].mxu0 }
 0x16d   : > { %v3705_v49 = vpop.f32.mrb[69].mxu1  ;;  %v3878_v50 = vpop.f32.mrb[69].mxu0  ;;  %3996 = vmatprep.subr.bf16.mxu1 %v4462_v3  ;;  %4083 = vmatprep.subr.bf16.mxu0 %v4462_v3 }
 0x16e   : > { %1234 = vmatmul.mubr.f32.gmra.mrb[114].mxu1 %v213_v45  ;;  %2529 = vmatmul.mubr.f32.gmra.mrb[114].mxu0 %v213_v45  ;;  %v249_v45 = vld [vmem:[%s6137_s2 + $0x160] sm:$0xff] }
 0x16f   : > { %1238 = vmatprep.mubr.f32.mxu1 %v218_v46  ;;  %2533 = vmatprep.mubr.f32.mxu0 %v218_v46  ;;  %v254_v46 = vld [vmem:[%s6137_s2 + $0x188] sm:$0xff] }
 0x170   : > { %v888_v53 = vpop.f32.mrb[70].mxu1  ;;  %v2355_v54 = vpop.f32.mrb[70].mxu0 }
 0x171   : > { %v3997_v55 = vpack.c.bf16 %v888_v53, %v883_v47  ;;  %v4084_v56 = vpack.c.bf16 %v2355_v54, %v2350_v48  ;;  %v3708_v57 = vpop.f32.mrb[71].mxu1  ;;  %v3881_v58 = vpop.f32.mrb[71].mxu0  ;;  %v253_v53 = vld [vmem:[%s6137_s2 + $0x180] sm:$0xff]  ;;  %v258_v54 = vld [vmem:[%s6137_s2 + $0x1a8] sm:$0xff] }
 0x172   : > { %1239 = vmatmul.mubr.f32.gmra.mrb[116].mxu1 %v217_v51  ;;  %2534 = vmatmul.mubr.f32.gmra.mrb[116].mxu0 %v217_v51 }
 0x173   : > { %1243 = vmatprep.mubr.f32.mxu1 %v222_v52  ;;  %2538 = vmatprep.mubr.f32.mxu0 %v222_v52 }
 0x174   : > { %3998 = vmatpush1.bf16.msra.mxu1 %v3997_v55  ;;  %4085 = vmatpush1.bf16.msra.mxu0 %v4084_v56  ;;  %v893_v61 = vpop.f32.mrb[72].mxu1  ;;  %v2360_v62 = vpop.f32.mrb[72].mxu0 }
 0x175   : > { %v3711_v63 = vpop.f32.mrb[73].mxu1  ;;  %v3884_v0 = vpop.f32.mrb[73].mxu0  ;;  %3999 = vmatprep.subr.bf16.mxu1 %v4462_v3  ;;  %4086 = vmatprep.subr.bf16.mxu0 %v4462_v3 }
 0x176   : > { %1244 = vmatmul.mubr.f32.gmra.mrb[118].mxu1 %v221_v59  ;;  %2539 = vmatmul.mubr.f32.gmra.mrb[118].mxu0 %v221_v59  ;;  %v257_v59 = vld [vmem:[%s6137_s2 + $0x1a0] sm:$0xff] }
 0x177   : > { %1248 = vmatprep.mubr.f32.mxu1 %v226_v60  ;;  %2543 = vmatprep.mubr.f32.mxu0 %v226_v60  ;;  %v262_v60 = vld [vmem:[%s6137_s2 + $0x1c8] sm:$0xff] }
 0x178   : > { %v898_v4 = vpop.f32.mrb[74].mxu1  ;;  %v2365_v5 = vpop.f32.mrb[74].mxu0 }
 0x179   : > { %v4000_v7 = vpack.c.bf16 %v898_v4, %v893_v61  ;;  %v4087_v8 = vpack.c.bf16 %v2365_v5, %v2360_v62  ;;  %v3714_v9 = vpop.f32.mrb[75].mxu1  ;;  %v3887_v10 = vpop.f32.mrb[75].mxu0  ;;  %v261_v4 = vld [vmem:[%s6137_s2 + $0x1c0] sm:$0xff]  ;;  %v266_v5 = vld [vmem:[%s6137_s2 + $0x1e8] sm:$0xff] }
 0x17a   : > { %1249 = vmatmul.mubr.f32.gmra.mrb[120].mxu1 %v225_v1  ;;  %2544 = vmatmul.mubr.f32.gmra.mrb[120].mxu0 %v225_v1 }
 0x17b   : > { %1253 = vmatprep.mubr.f32.mxu1 %v230_v2  ;;  %2548 = vmatprep.mubr.f32.mxu0 %v230_v2 }
 0x17c   : > { %4001 = vmatpush1.bf16.msra.mxu1 %v4000_v7  ;;  %4088 = vmatpush1.bf16.msra.mxu0 %v4087_v8  ;;  %v903_v13 = vpop.f32.mrb[76].mxu1  ;;  %v2370_v14 = vpop.f32.mrb[76].mxu0 }
 0x17d   : > { %v3717_v15 = vpop.f32.mrb[77].mxu1  ;;  %v3890_v16 = vpop.f32.mrb[77].mxu0  ;;  %4002 = vmatprep.subr.bf16.mxu1 %v4462_v3  ;;  %4089 = vmatprep.subr.bf16.mxu0 %v4462_v3 }
 0x17e   : > { %1254 = vmatmul.mubr.f32.gmra.mrb[122].mxu1 %v229_v11  ;;  %2549 = vmatmul.mubr.f32.gmra.mrb[122].mxu0 %v229_v11  ;;  %v265_v11 = vld [vmem:[%s6137_s2 + $0x1e0] sm:$0xff] }
 0x17f   : > { %1258 = vmatprep.mubr.f32.mxu1 %v234_v12  ;;  %2553 = vmatprep.mubr.f32.mxu0 %v234_v12  ;;  %v270_v12 = vld [vmem:[%s6137_s2 + $0x208] sm:$0xff] }
 0x180   : > { %v908_v19 = vpop.f32.mrb[78].mxu1  ;;  %v2375_v20 = vpop.f32.mrb[78].mxu0 }
 0x181   : > { %v4003_v21 = vpack.c.bf16 %v908_v19, %v903_v13  ;;  %v4090_v22 = vpack.c.bf16 %v2375_v20, %v2370_v14  ;;  %v3720_v23 = vpop.f32.mrb[79].mxu1  ;;  %v3893_v24 = vpop.f32.mrb[79].mxu0  ;;  %v269_v19 = vld [vmem:[%s6137_s2 + $0x200] sm:$0xff]  ;;  %v274_v20 = vld [vmem:[%s6137_s2 + $0x228] sm:$0xff] }
 0x182   : > { %1259 = vmatmul.mubr.f32.gmra.mrb[124].mxu1 %v233_v17  ;;  %2554 = vmatmul.mubr.f32.gmra.mrb[124].mxu0 %v233_v17 }
 0x183   : > { %1263 = vmatprep.mubr.f32.mxu1 %v238_v18  ;;  %2558 = vmatprep.mubr.f32.mxu0 %v238_v18 }
 0x184   : > { %4004 = vmatpush1.bf16.msra.mxu1 %v4003_v21  ;;  %4091 = vmatpush1.bf16.msra.mxu0 %v4090_v22  ;;  %v913_v27 = vpop.f32.mrb[80].mxu1  ;;  %v2380_v28 = vpop.f32.mrb[80].mxu0 }
 0x185   : > { %v3723_v29 = vpop.f32.mrb[81].mxu1  ;;  %v3896_v30 = vpop.f32.mrb[81].mxu0  ;;  %4005 = vmatprep.subr.bf16.mxu1 %v4462_v3  ;;  %4092 = vmatprep.subr.bf16.mxu0 %v4462_v3 }
 0x186   : > { %1264 = vmatmul.mubr.f32.gmra.mrb[126].mxu1 %v237_v25  ;;  %2559 = vmatmul.mubr.f32.gmra.mrb[126].mxu0 %v237_v25  ;;  %v273_v25 = vld [vmem:[%s6137_s2 + $0x220] sm:$0xff] }
 0x187   : > { %1268 = vmatprep.mubr.f32.mxu1 %v242_v26  ;;  %2563 = vmatprep.mubr.f32.mxu0 %v242_v26  ;;  %v278_v26 = vld [vmem:[%s6137_s2 + $0x248] sm:$0xff] }
 0x188   : > { %v918_v33 = vpop.f32.mrb[82].mxu1  ;;  %v2385_v34 = vpop.f32.mrb[82].mxu0 }
 0x189   : > { %v4006_v35 = vpack.c.bf16 %v918_v33, %v913_v27  ;;  %v4093_v36 = vpack.c.bf16 %v2385_v34, %v2380_v28  ;;  %v3726_v37 = vpop.f32.mrb[83].mxu1  ;;  %v3899_v38 = vpop.f32.mrb[83].mxu0  ;;  %v277_v33 = vld [vmem:[%s6137_s2 + $0x240] sm:$0xff]  ;;  %v282_v34 = vld [vmem:[%s6137_s2 + $0x268] sm:$0xff] }
 0x18a   : > { %1269 = vmatmul.mubr.f32.gmra.mrb[128].mxu1 %v241_v31  ;;  %2564 = vmatmul.mubr.f32.gmra.mrb[128].mxu0 %v241_v31 }
 0x18b   : > { %1273 = vmatprep.mubr.f32.mxu1 %v246_v32  ;;  %2568 = vmatprep.mubr.f32.mxu0 %v246_v32 }
 0x18c   : > { %4007 = vmatpush1.bf16.msra.mxu1 %v4006_v35  ;;  %4094 = vmatpush1.bf16.msra.mxu0 %v4093_v36  ;;  %v923_v41 = vpop.f32.mrb[84].mxu1  ;;  %v2390_v42 = vpop.f32.mrb[84].mxu0 }
 0x18d   : > { %v3729_v43 = vpop.f32.mrb[85].mxu1  ;;  %v3902_v44 = vpop.f32.mrb[85].mxu0  ;;  %4008 = vmatprep.subr.bf16.mxu1 %v4462_v3  ;;  %4095 = vmatprep.subr.bf16.mxu0 %v4462_v3 }
 0x18e   : > { %1274 = vmatmul.mubr.f32.gmra.mrb[130].mxu1 %v245_v39  ;;  %2569 = vmatmul.mubr.f32.gmra.mrb[130].mxu0 %v245_v39  ;;  %v281_v39 = vld [vmem:[%s6137_s2 + $0x260] sm:$0xff] }
 0x18f   : > { %1278 = vmatprep.mubr.f32.mxu1 %v250_v40  ;;  %2573 = vmatprep.mubr.f32.mxu0 %v250_v40  ;;  %v286_v40 = vld [vmem:[%s6137_s2 + $0x288] sm:$0xff] }
 0x190   : > { %v928_v47 = vpop.f32.mrb[86].mxu1  ;;  %v2395_v48 = vpop.f32.mrb[86].mxu0 }
 0x191   : > { %v4009_v49 = vpack.c.bf16 %v928_v47, %v923_v41  ;;  %v4096_v50 = vpack.c.bf16 %v2395_v48, %v2390_v42  ;;  %v3732_v51 = vpop.f32.mrb[87].mxu1  ;;  %v3905_v52 = vpop.f32.mrb[87].mxu0  ;;  %v285_v47 = vld [vmem:[%s6137_s2 + $0x280] sm:$0xff]  ;;  %v290_v48 = vld [vmem:[%s6137_s2 + $0x2a8] sm:$0xff] }
 0x192   : > { %1279 = vmatmul.mubr.f32.gmra.mrb[132].mxu1 %v249_v45  ;;  %2574 = vmatmul.mubr.f32.gmra.mrb[132].mxu0 %v249_v45 }
 0x193   : > { %1283 = vmatprep.mubr.f32.mxu1 %v254_v46  ;;  %2578 = vmatprep.mubr.f32.mxu0 %v254_v46 }
 0x194   : > { %4010 = vmatpush1.bf16.msra.mxu1 %v4009_v49  ;;  %4097 = vmatpush1.bf16.msra.mxu0 %v4096_v50  ;;  %v933_v55 = vpop.f32.mrb[88].mxu1  ;;  %v2400_v56 = vpop.f32.mrb[88].mxu0 }
 0x195   : > { %v3735_v57 = vpop.f32.mrb[89].mxu1  ;;  %v3908_v58 = vpop.f32.mrb[89].mxu0  ;;  %4011 = vmatprep.subr.bf16.mxu1 %v4462_v3  ;;  %4098 = vmatprep.subr.bf16.mxu0 %v4462_v3 }
 0x196   : > { %1284 = vmatmul.mubr.f32.gmra.mrb[134].mxu1 %v253_v53  ;;  %2579 = vmatmul.mubr.f32.gmra.mrb[134].mxu0 %v253_v53  ;;  %v289_v53 = vld [vmem:[%s6137_s2 + $0x2a0] sm:$0xff] }
 0x197   : > { %1288 = vmatprep.mubr.f32.mxu1 %v258_v54  ;;  %2583 = vmatprep.mubr.f32.mxu0 %v258_v54  ;;  %v294_v54 = vld [vmem:[%s6137_s2 + $0x2c8] sm:$0xff] }
 0x198   : > { %v938_v61 = vpop.f32.mrb[90].mxu1  ;;  %v2405_v62 = vpop.f32.mrb[90].mxu0 }
 0x199   : > { %v4012_v63 = vpack.c.bf16 %v938_v61, %v933_v55  ;;  %v4099_v0 = vpack.c.bf16 %v2405_v62, %v2400_v56  ;;  %v3738_v1 = vpop.f32.mrb[91].mxu1  ;;  %v3911_v2 = vpop.f32.mrb[91].mxu0  ;;  %v298_v61 = vld [vmem:[%s6137_s2 + $0x2e8] sm:$0xff] }
 0x19a   : > { %1289 = vmatmul.mubr.f32.gmra.mrb[136].mxu1 %v257_v59  ;;  %2584 = vmatmul.mubr.f32.gmra.mrb[136].mxu0 %v257_v59  ;;  %v297_v2 = vld [vmem:[%s6137_s2 + $0x2e0] sm:$0xff] }
 0x19b   : > { %1293 = vmatprep.mubr.f32.mxu1 %v262_v60  ;;  %2588 = vmatprep.mubr.f32.mxu0 %v262_v60 }
 0x19c   : > { %v943_v7 = vpop.f32.mrb[92].mxu1  ;;  %v2410_v8 = vpop.f32.mrb[92].mxu0  ;;  %4013 = vmatpush1.bf16.msra.mxu1 %v4012_v63  ;;  %4100 = vmatpush1.bf16.msra.mxu0 %v4099_v0 }
 0x19d   : > { %v3741_v9 = vpop.f32.mrb[93].mxu1  ;;  %v3914_v10 = vpop.f32.mrb[93].mxu0  ;;  %4014 = vmatprep.subr.bf16.mxu1 %v4462_v3  ;;  %4101 = vmatprep.subr.bf16.mxu0 %v4462_v3 }
 0x19e   : > { %1294 = vmatmul.mubr.f32.gmra.mrb[138].mxu1 %v261_v4  ;;  %2589 = vmatmul.mubr.f32.gmra.mrb[138].mxu0 %v261_v4  ;;  %v302_v4 = vld [vmem:[%s6137_s2 + $0x308] sm:$0xff]  ;;  %v309_v9 = vld [vmem:[%s6137_s2 + $0x340] sm:$0xff] }
 0x19f   : > { %1298 = vmatprep.mubr.f32.mxu1 %v266_v5  ;;  %2593 = vmatprep.mubr.f32.mxu0 %v266_v5  ;;  %v306_v5 = vld [vmem:[%s6137_s2 + $0x328] sm:$0xff] }
 0x1a0   : > { %v948_v13 = vpop.f32.mrb[94].mxu1  ;;  %v2415_v14 = vpop.f32.mrb[94].mxu0  ;;  %v314_v10 = vld [vmem:[%s6137_s2 + $0x368] sm:$0xff] }
 0x1a1   : > { %v4015_v15 = vpack.c.bf16 %v948_v13, %v943_v7  ;;  %v4102_v16 = vpack.c.bf16 %v2415_v14, %v2410_v8  ;;  %v3744_v17 = vpop.f32.mrb[95].mxu1  ;;  %v3917_v18 = vpop.f32.mrb[95].mxu0  ;;  %v305_v7 = vld [vmem:[%s6137_s2 + $0x320] sm:$0xff]  ;;  %v310_v8 = vld [vmem:[%s6137_s2 + $0x348] sm:$0xff] }
 0x1a2   : > { %1299 = vmatmul.mubr.f32.gmra.mrb[140].mxu1 %v265_v11  ;;  %2594 = vmatmul.mubr.f32.gmra.mrb[140].mxu0 %v265_v11  ;;  %v313_v11 = vld [vmem:[%s6137_s2 + $0x360] sm:$0xff]  ;;  %v322_v14 = vld [vmem:[%s6137_s2 + $0x3a8] sm:$0xff] }
 0x1a3   : > { %1303 = vmatprep.mubr.f32.mxu1 %v270_v12  ;;  %2598 = vmatprep.mubr.f32.mxu0 %v270_v12  ;;  %v318_v12 = vld [vmem:[%s6137_s2 + $0x388] sm:$0xff]  ;;  %v317_v13 = vld [vmem:[%s6137_s2 + $0x380] sm:$0xff] }
 0x1a4   : > { %v953_v21 = vpop.f32.mrb[96].mxu1  ;;  %v2420_v22 = vpop.f32.mrb[96].mxu0  ;;  %4016 = vmatpush1.bf16.msra.mxu1 %v4015_v15  ;;  %4103 = vmatpush1.bf16.msra.mxu0 %v4102_v16  ;;  %v321_v15 = vld [vmem:[%s6137_s2 + $0x3a0] sm:$0xff]  ;;  %v326_v16 = vld [vmem:[%s6137_s2 + $0x3c8] sm:$0xff] }
 0x1a5   : > { %v3747_v23 = vpop.f32.mrb[97].mxu1  ;;  %v3920_v24 = vpop.f32.mrb[97].mxu0  ;;  %4017 = vmatprep.subr.bf16.mxu1 %v4462_v3  ;;  %4104 = vmatprep.subr.bf16.mxu0 %v4462_v3  ;;  %v325_v17 = vld [vmem:[%s6137_s2 + $0x3c0] sm:$0xff]  ;;  %v330_v18 = vld [vmem:[%s6137_s2 + $0x3e8] sm:$0xff] }
 0x1a6   : > { %1304 = vmatmul.mubr.f32.gmra.mrb[142].mxu1 %v269_v19  ;;  %2599 = vmatmul.mubr.f32.gmra.mrb[142].mxu0 %v269_v19  ;;  %v329_v19 = vld [vmem:[%s6137_s2 + $0x3e0] sm:$0xff]  ;;  %v342_v24 = vld [vmem:[%s6137_s2 + $0x448] sm:$0xff] }
 0x1a7   : > { %1308 = vmatprep.mubr.f32.mxu1 %v274_v20  ;;  %2603 = vmatprep.mubr.f32.mxu0 %v274_v20  ;;  %v334_v20 = vld [vmem:[%s6137_s2 + $0x408] sm:$0xff]  ;;  %v337_v23 = vld [vmem:[%s6137_s2 + $0x420] sm:$0xff] }
 0x1a8   : > { %v958_v27 = vpop.f32.mrb[98].mxu1  ;;  %v2425_v28 = vpop.f32.mrb[98].mxu0 }
 0x1a9   : > { %v4018_v29 = vpack.c.bf16 %v958_v27, %v953_v21  ;;  %v4105_v30 = vpack.c.bf16 %v2425_v28, %v2420_v22  ;;  %v3750_v31 = vpop.f32.mrb[99].mxu1  ;;  %v3923_v32 = vpop.f32.mrb[99].mxu0  ;;  %v333_v21 = vld [vmem:[%s6137_s2 + $0x400] sm:$0xff]  ;;  %v338_v22 = vld [vmem:[%s6137_s2 + $0x428] sm:$0xff] }
 0x1aa   : > { %1309 = vmatmul.mubr.f32.gmra.mrb[144].mxu1 %v273_v25  ;;  %2604 = vmatmul.mubr.f32.gmra.mrb[144].mxu0 %v273_v25  ;;  %v341_v25 = vld [vmem:[%s6137_s2 + $0x440] sm:$0xff]  ;;  %v350_v28 = vld [vmem:[%s6137_s2 + $0x488] sm:$0xff] }
 0x1ab   : > { %1313 = vmatprep.mubr.f32.mxu1 %v278_v26  ;;  %2608 = vmatprep.mubr.f32.mxu0 %v278_v26  ;;  %v346_v26 = vld [vmem:[%s6137_s2 + $0x468] sm:$0xff]  ;;  %v345_v27 = vld [vmem:[%s6137_s2 + $0x460] sm:$0xff] }
 0x1ac   : > { %v963_v35 = vpop.f32.mrb[100].mxu1  ;;  %v2430_v36 = vpop.f32.mrb[100].mxu0  ;;  %4019 = vmatpush1.bf16.msra.mxu1 %v4018_v29  ;;  %4106 = vmatpush1.bf16.msra.mxu0 %v4105_v30  ;;  %v349_v29 = vld [vmem:[%s6137_s2 + $0x480] sm:$0xff]  ;;  %v354_v30 = vld [vmem:[%s6137_s2 + $0x4a8] sm:$0xff] }
 0x1ad   : > { %v3753_v37 = vpop.f32.mrb[101].mxu1  ;;  %v3926_v38 = vpop.f32.mrb[101].mxu0  ;;  %4020 = vmatprep.subr.bf16.mxu1 %v4462_v3  ;;  %4107 = vmatprep.subr.bf16.mxu0 %v4462_v3  ;;  %v353_v31 = vld [vmem:[%s6137_s2 + $0x4a0] sm:$0xff]  ;;  %v358_v32 = vld [vmem:[%s6137_s2 + $0x4c8] sm:$0xff] }
 0x1ae   : > { %1314 = vmatmul.mubr.f32.gmra.mrb[146].mxu1 %v277_v33  ;;  %2609 = vmatmul.mubr.f32.gmra.mrb[146].mxu0 %v277_v33  ;;  %v357_v33 = vld [vmem:[%s6137_s2 + $0x4c0] sm:$0xff]  ;;  %v370_v38 = vld [vmem:[%s6137_s2 + $0x528] sm:$0xff] }
 0x1af   : > { %1318 = vmatprep.mubr.f32.mxu1 %v282_v34  ;;  %2613 = vmatprep.mubr.f32.mxu0 %v282_v34  ;;  %v362_v34 = vld [vmem:[%s6137_s2 + $0x4e8] sm:$0xff]  ;;  %v365_v37 = vld [vmem:[%s6137_s2 + $0x500] sm:$0xff] }
 0x1b0   : > { %v968_v41 = vpop.f32.mrb[102].mxu1  ;;  %v2435_v42 = vpop.f32.mrb[102].mxu0 }
 0x1b1   : > { %v4021_v43 = vpack.c.bf16 %v968_v41, %v963_v35  ;;  %v4108_v44 = vpack.c.bf16 %v2435_v42, %v2430_v36  ;;  %v3756_v45 = vpop.f32.mrb[103].mxu1  ;;  %v3929_v46 = vpop.f32.mrb[103].mxu0  ;;  %v361_v35 = vld [vmem:[%s6137_s2 + $0x4e0] sm:$0xff]  ;;  %v366_v36 = vld [vmem:[%s6137_s2 + $0x508] sm:$0xff] }
 0x1b2   : > { %1319 = vmatmul.mubr.f32.gmra.mrb[148].mxu1 %v281_v39  ;;  %2614 = vmatmul.mubr.f32.gmra.mrb[148].mxu0 %v281_v39  ;;  %v369_v39 = vld [vmem:[%s6137_s2 + $0x520] sm:$0xff]  ;;  %v378_v42 = vld [vmem:[%s6137_s2 + $0x568] sm:$0xff] }
 0x1b3   : > { %1323 = vmatprep.mubr.f32.mxu1 %v286_v40  ;;  %2618 = vmatprep.mubr.f32.mxu0 %v286_v40  ;;  %v374_v40 = vld [vmem:[%s6137_s2 + $0x548] sm:$0xff]  ;;  %v373_v41 = vld [vmem:[%s6137_s2 + $0x540] sm:$0xff] }
 0x1b4   : > { %v973_v49 = vpop.f32.mrb[104].mxu1  ;;  %v2440_v50 = vpop.f32.mrb[104].mxu0  ;;  %4022 = vmatpush1.bf16.msra.mxu1 %v4021_v43  ;;  %4109 = vmatpush1.bf16.msra.mxu0 %v4108_v44  ;;  %v377_v43 = vld [vmem:[%s6137_s2 + $0x560] sm:$0xff]  ;;  %v382_v44 = vld [vmem:[%s6137_s2 + $0x588] sm:$0xff] }
 0x1b5   : > { %v3759_v51 = vpop.f32.mrb[105].mxu1  ;;  %v3932_v52 = vpop.f32.mrb[105].mxu0  ;;  %4023 = vmatprep.subr.bf16.mxu1 %v4462_v3  ;;  %4110 = vmatprep.subr.bf16.mxu0 %v4462_v3  ;;  %v293_v3 = vld [vmem:[%s6137_s2 + $0x2c0] sm:$0xff]  ;;  %v386_v46 = vld [vmem:[%s6137_s2 + $0x5a8] sm:$0xff] }
 0x1b6   : > { %1324 = vmatmul.mubr.f32.gmra.mrb[150].mxu1 %v285_v47  ;;  %2619 = vmatmul.mubr.f32.gmra.mrb[150].mxu0 %v285_v47  ;;  %v381_v45 = vld [vmem:[%s6137_s2 + $0x580] sm:$0xff]  ;;  %v398_v52 = vld [vmem:[%s6137_s2 + $0x608] sm:$0xff] }
 0x1b7   : > { %1328 = vmatprep.mubr.f32.mxu1 %v290_v48  ;;  %2623 = vmatprep.mubr.f32.mxu0 %v290_v48  ;;  %v385_v47 = vld [vmem:[%s6137_s2 + $0x5a0] sm:$0xff]  ;;  %v390_v48 = vld [vmem:[%s6137_s2 + $0x5c8] sm:$0xff] }
 0x1b8   : > { %v978_v55 = vpop.f32.mrb[106].mxu1  ;;  %v2445_v56 = vpop.f32.mrb[106].mxu0  ;;  %v393_v51 = vld [vmem:[%s6137_s2 + $0x5e0] sm:$0xff] }
 0x1b9   : > { %v4024_v57 = vpack.c.bf16 %v978_v55, %v973_v49  ;;  %v4111_v58 = vpack.c.bf16 %v2445_v56, %v2440_v50  ;;  %v3762_v59 = vpop.f32.mrb[107].mxu1  ;;  %v3935_v60 = vpop.f32.mrb[107].mxu0  ;;  %v389_v49 = vld [vmem:[%s6137_s2 + $0x5c0] sm:$0xff]  ;;  %v394_v50 = vld [vmem:[%s6137_s2 + $0x5e8] sm:$0xff] }
 0x1ba   : > { %1329 = vmatmul.mubr.f32.gmra.mrb[152].mxu1 %v289_v53  ;;  %2624 = vmatmul.mubr.f32.gmra.mrb[152].mxu0 %v289_v53  ;;  %v397_v53 = vld [vmem:[%s6137_s2 + $0x600] sm:$0xff]  ;;  %v406_v56 = vld [vmem:[%s6137_s2 + $0x648] sm:$0xff] }
 0x1bb   : > { %1333 = vmatprep.mubr.f32.mxu1 %v294_v54  ;;  %2628 = vmatprep.mubr.f32.mxu0 %v294_v54  ;;  %v402_v54 = vld [vmem:[%s6137_s2 + $0x628] sm:$0xff]  ;;  %v401_v55 = vld [vmem:[%s6137_s2 + $0x620] sm:$0xff] }
 0x1bc   : > { %4025 = vmatpush1.bf16.msra.mxu1 %v4024_v57  ;;  %4112 = vmatpush1.bf16.msra.mxu0 %v4111_v58  ;;  %v983_v62 = vpop.f32.mrb[108].mxu1  ;;  %v2450_v63 = vpop.f32.mrb[108].mxu0  ;;  %v405_v57 = vld [vmem:[%s6137_s2 + $0x640] sm:$0xff]  ;;  %v410_v58 = vld [vmem:[%s6137_s2 + $0x668] sm:$0xff] }
 0x1bd   : > { %1543 = vmatprep.subr.mxu1 %v4464_v6  ;;  %2838 = vmatprep.subr.mxu0 %v4464_v6  ;;  %v3765_v0 = vpop.f32.mrb[109].mxu1  ;;  %v3938_v1 = vpop.f32.mrb[109].mxu0  ;;  %v301_v6 = vld [vmem:[%s6137_s2 + $0x300] sm:$0xff]  ;;  %v414_v60 = vld [vmem:[%s6137_s2 + $0x688] sm:$0xff] }
 0x1be   : > { %1334 = vmatmul.mubr.f32.gmra.mrb[154].mxu1 %v293_v3  ;;  %2629 = vmatmul.mubr.f32.gmra.mrb[154].mxu0 %v293_v3  ;;  %v409_v59 = vld [vmem:[%s6137_s2 + $0x660] sm:$0xff]  ;;  %v208_v1 = vld [vmem:[%s6137_s2 + $0x18] sm:$0xff] }
 0x1bf   : > { %1338 = vmatprep.mubr.f32.mxu1 %v298_v61  ;;  %2633 = vmatprep.mubr.f32.mxu0 %v298_v61  ;;  %v413_v3 = vld [vmem:[%s6137_s2 + $0x680] sm:$0xff]  ;;  %v418_v61 = vld [vmem:[%s6137_s2 + $0x6a8] sm:$0xff] }
 0x1c0   : > { %1544 = vmatpush1.msra.mxu1 %v983_v62  ;;  %2839 = vmatpush1.msra.mxu0 %v2450_v63  ;;  %v417_v62 = vld [vmem:[%s6137_s2 + $0x6a0] sm:$0xff]  ;;  %v422_v63 = vld [vmem:[%s6137_s2 + $0x6c8] sm:$0xff] }
 0x1c1   : > { %v421_v0 = vld [vmem:[%s6137_s2 + $0x6c0] sm:$0xff] }
 0x1c2   : > { %1339 = vmatmul.mubr.f32.gmra.mrb[156].mxu1 %v297_v2  ;;  %2634 = vmatmul.mubr.f32.gmra.mrb[156].mxu0 %v297_v2  ;;  %v207_v2 = vld [vmem:[%s6137_s2 + $0x10] sm:$0xff] }
 0x1c3   : > { %1343 = vmatprep.mubr.f32.mxu1 %v302_v4  ;;  %2638 = vmatprep.mubr.f32.mxu0 %v302_v4  ;;  %v212_v4 = vld [vmem:[%s6137_s2 + $0x38] sm:$0xff] }
 0x1c6   : > { %1344 = vmatmul.mubr.f32.gmra.mrb[158].mxu1 %v301_v6  ;;  %2639 = vmatmul.mubr.f32.gmra.mrb[158].mxu0 %v301_v6  ;;  %v211_v6 = vld [vmem:[%s6137_s2 + $0x30] sm:$0xff] }
 0x1c7   : > { %1348 = vmatprep.mubr.f32.mxu1 %v306_v5  ;;  %2643 = vmatprep.mubr.f32.mxu0 %v306_v5  ;;  %v216_v5 = vld [vmem:[%s6137_s2 + $0x58] sm:$0xff] }
 0x1ca   : > { %1349 = vmatmul.mubr.f32.gmra.mrb[160].mxu1 %v305_v7  ;;  %2644 = vmatmul.mubr.f32.gmra.mrb[160].mxu0 %v305_v7  ;;  %v215_v7 = vld [vmem:[%s6137_s2 + $0x50] sm:$0xff] }
 0x1cb   : > { %1353 = vmatprep.mubr.f32.mxu1 %v310_v8  ;;  %2648 = vmatprep.mubr.f32.mxu0 %v310_v8  ;;  %v220_v8 = vld [vmem:[%s6137_s2 + $0x78] sm:$0xff] }
 0x1ce   : > { %1354 = vmatmul.mubr.f32.gmra.mrb[162].mxu1 %v309_v9  ;;  %2649 = vmatmul.mubr.f32.gmra.mrb[162].mxu0 %v309_v9  ;;  %v219_v9 = vld [vmem:[%s6137_s2 + $0x70] sm:$0xff] }
 0x1cf   : > { %1358 = vmatprep.mubr.f32.mxu1 %v314_v10  ;;  %2653 = vmatprep.mubr.f32.mxu0 %v314_v10  ;;  %v224_v10 = vld [vmem:[%s6137_s2 + $0x98] sm:$0xff] }
 0x1d2   : > { %1359 = vmatmul.mubr.f32.gmra.mrb[164].mxu1 %v313_v11  ;;  %2654 = vmatmul.mubr.f32.gmra.mrb[164].mxu0 %v313_v11  ;;  %v223_v11 = vld [vmem:[%s6137_s2 + $0x90] sm:$0xff] }
 0x1d3   : > { %1363 = vmatprep.mubr.f32.mxu1 %v318_v12  ;;  %2658 = vmatprep.mubr.f32.mxu0 %v318_v12  ;;  %v228_v12 = vld [vmem:[%s6137_s2 + $0xb8] sm:$0xff] }
 0x1d6   : > { %1364 = vmatmul.mubr.f32.gmra.mrb[166].mxu1 %v317_v13  ;;  %2659 = vmatmul.mubr.f32.gmra.mrb[166].mxu0 %v317_v13  ;;  %v227_v13 = vld [vmem:[%s6137_s2 + $0xb0] sm:$0xff] }
 0x1d7   : > { %1368 = vmatprep.mubr.f32.mxu1 %v322_v14  ;;  %2663 = vmatprep.mubr.f32.mxu0 %v322_v14  ;;  %v232_v14 = vld [vmem:[%s6137_s2 + $0xd8] sm:$0xff] }
 0x1da   : > { %1369 = vmatmul.mubr.f32.gmra.mrb[168].mxu1 %v321_v15  ;;  %2664 = vmatmul.mubr.f32.gmra.mrb[168].mxu0 %v321_v15  ;;  %v231_v15 = vld [vmem:[%s6137_s2 + $0xd0] sm:$0xff] }
 0x1db   : > { %1373 = vmatprep.mubr.f32.mxu1 %v326_v16  ;;  %2668 = vmatprep.mubr.f32.mxu0 %v326_v16  ;;  %v236_v16 = vld [vmem:[%s6137_s2 + $0xf8] sm:$0xff] }
 0x1de   : > { %1374 = vmatmul.mubr.f32.gmra.mrb[170].mxu1 %v325_v17  ;;  %2669 = vmatmul.mubr.f32.gmra.mrb[170].mxu0 %v325_v17  ;;  %v235_v17 = vld [vmem:[%s6137_s2 + $0xf0] sm:$0xff] }
 0x1df   : > { %1378 = vmatprep.mubr.f32.mxu1 %v330_v18  ;;  %2673 = vmatprep.mubr.f32.mxu0 %v330_v18  ;;  %v240_v18 = vld [vmem:[%s6137_s2 + $0x118] sm:$0xff] }
 0x1e2   : > { %1379 = vmatmul.mubr.f32.gmra.mrb[172].mxu1 %v329_v19  ;;  %2674 = vmatmul.mubr.f32.gmra.mrb[172].mxu0 %v329_v19  ;;  %v239_v19 = vld [vmem:[%s6137_s2 + $0x110] sm:$0xff] }
 0x1e3   : > { %1383 = vmatprep.mubr.f32.mxu1 %v334_v20  ;;  %2678 = vmatprep.mubr.f32.mxu0 %v334_v20  ;;  %v244_v20 = vld [vmem:[%s6137_s2 + $0x138] sm:$0xff] }
 0x1e6   : > { %1384 = vmatmul.mubr.f32.gmra.mrb[174].mxu1 %v333_v21  ;;  %2679 = vmatmul.mubr.f32.gmra.mrb[174].mxu0 %v333_v21  ;;  %v243_v21 = vld [vmem:[%s6137_s2 + $0x130] sm:$0xff] }
 0x1e7   : > { %1388 = vmatprep.mubr.f32.mxu1 %v338_v22  ;;  %2683 = vmatprep.mubr.f32.mxu0 %v338_v22  ;;  %v248_v22 = vld [vmem:[%s6137_s2 + $0x158] sm:$0xff] }
 0x1ea   : > { %1389 = vmatmul.mubr.f32.gmra.mrb[176].mxu1 %v337_v23  ;;  %2684 = vmatmul.mubr.f32.gmra.mrb[176].mxu0 %v337_v23  ;;  %v247_v23 = vld [vmem:[%s6137_s2 + $0x150] sm:$0xff] }
 0x1eb   : > { %1393 = vmatprep.mubr.f32.mxu1 %v342_v24  ;;  %2688 = vmatprep.mubr.f32.mxu0 %v342_v24  ;;  %v252_v24 = vld [vmem:[%s6137_s2 + $0x178] sm:$0xff] }
 0x1ee   : > { %1394 = vmatmul.mubr.f32.gmra.mrb[178].mxu1 %v341_v25  ;;  %2689 = vmatmul.mubr.f32.gmra.mrb[178].mxu0 %v341_v25  ;;  %v251_v25 = vld [vmem:[%s6137_s2 + $0x170] sm:$0xff] }
 0x1ef   : > { %1398 = vmatprep.mubr.f32.mxu1 %v346_v26  ;;  %2693 = vmatprep.mubr.f32.mxu0 %v346_v26  ;;  %v256_v26 = vld [vmem:[%s6137_s2 + $0x198] sm:$0xff] }
 0x1f2   : > { %1399 = vmatmul.mubr.f32.gmra.mrb[180].mxu1 %v345_v27  ;;  %2694 = vmatmul.mubr.f32.gmra.mrb[180].mxu0 %v345_v27  ;;  %v255_v27 = vld [vmem:[%s6137_s2 + $0x190] sm:$0xff] }
 0x1f3   : > { %1403 = vmatprep.mubr.f32.mxu1 %v350_v28  ;;  %2698 = vmatprep.mubr.f32.mxu0 %v350_v28  ;;  %v260_v28 = vld [vmem:[%s6137_s2 + $0x1b8] sm:$0xff] }
 0x1f6   : > { %1404 = vmatmul.mubr.f32.gmra.mrb[182].mxu1 %v349_v29  ;;  %2699 = vmatmul.mubr.f32.gmra.mrb[182].mxu0 %v349_v29  ;;  %v259_v29 = vld [vmem:[%s6137_s2 + $0x1b0] sm:$0xff] }
 0x1f7   : > { %1408 = vmatprep.mubr.f32.mxu1 %v354_v30  ;;  %2703 = vmatprep.mubr.f32.mxu0 %v354_v30  ;;  %v264_v30 = vld [vmem:[%s6137_s2 + $0x1d8] sm:$0xff] }
 0x1fa   : > { %1409 = vmatmul.mubr.f32.gmra.mrb[184].mxu1 %v353_v31  ;;  %2704 = vmatmul.mubr.f32.gmra.mrb[184].mxu0 %v353_v31  ;;  %v263_v31 = vld [vmem:[%s6137_s2 + $0x1d0] sm:$0xff] }
 0x1fb   : > { %1413 = vmatprep.mubr.f32.mxu1 %v358_v32  ;;  %2708 = vmatprep.mubr.f32.mxu0 %v358_v32  ;;  %v268_v32 = vld [vmem:[%s6137_s2 + $0x1f8] sm:$0xff] }
 0x1fe   : > { %1414 = vmatmul.mubr.f32.gmra.mrb[186].mxu1 %v357_v33  ;;  %2709 = vmatmul.mubr.f32.gmra.mrb[186].mxu0 %v357_v33  ;;  %v267_v33 = vld [vmem:[%s6137_s2 + $0x1f0] sm:$0xff] }
 0x1ff   : > { %1418 = vmatprep.mubr.f32.mxu1 %v362_v34  ;;  %2713 = vmatprep.mubr.f32.mxu0 %v362_v34  ;;  %v272_v34 = vld [vmem:[%s6137_s2 + $0x218] sm:$0xff] }
 0x202   : > { %1419 = vmatmul.mubr.f32.gmra.mrb[188].mxu1 %v361_v35  ;;  %2714 = vmatmul.mubr.f32.gmra.mrb[188].mxu0 %v361_v35  ;;  %v271_v35 = vld [vmem:[%s6137_s2 + $0x210] sm:$0xff] }
 0x203   : > { %1423 = vmatprep.mubr.f32.mxu1 %v366_v36  ;;  %2718 = vmatprep.mubr.f32.mxu0 %v366_v36  ;;  %v276_v36 = vld [vmem:[%s6137_s2 + $0x238] sm:$0xff] }
 0x206   : > { %1424 = vmatmul.mubr.f32.gmra.mrb[190].mxu1 %v365_v37  ;;  %2719 = vmatmul.mubr.f32.gmra.mrb[190].mxu0 %v365_v37  ;;  %v275_v37 = vld [vmem:[%s6137_s2 + $0x230] sm:$0xff] }
 0x207   : > { %1428 = vmatprep.mubr.f32.mxu1 %v370_v38  ;;  %2723 = vmatprep.mubr.f32.mxu0 %v370_v38  ;;  %v280_v38 = vld [vmem:[%s6137_s2 + $0x258] sm:$0xff] }
 0x20a   : > { %1429 = vmatmul.mubr.f32.gmra.mrb[192].mxu1 %v369_v39  ;;  %2724 = vmatmul.mubr.f32.gmra.mrb[192].mxu0 %v369_v39  ;;  %v279_v39 = vld [vmem:[%s6137_s2 + $0x250] sm:$0xff] }
 0x20b   : > { %1433 = vmatprep.mubr.f32.mxu1 %v374_v40  ;;  %2728 = vmatprep.mubr.f32.mxu0 %v374_v40  ;;  %v284_v40 = vld [vmem:[%s6137_s2 + $0x278] sm:$0xff] }
 0x20e   : > { %1434 = vmatmul.mubr.f32.gmra.mrb[194].mxu1 %v373_v41  ;;  %2729 = vmatmul.mubr.f32.gmra.mrb[194].mxu0 %v373_v41  ;;  %v283_v41 = vld [vmem:[%s6137_s2 + $0x270] sm:$0xff] }
 0x20f   : > { %1438 = vmatprep.mubr.f32.mxu1 %v378_v42  ;;  %2733 = vmatprep.mubr.f32.mxu0 %v378_v42  ;;  %v288_v42 = vld [vmem:[%s6137_s2 + $0x298] sm:$0xff] }
 0x212   : > { %1439 = vmatmul.mubr.f32.gmra.mrb[196].mxu1 %v377_v43  ;;  %2734 = vmatmul.mubr.f32.gmra.mrb[196].mxu0 %v377_v43  ;;  %v287_v43 = vld [vmem:[%s6137_s2 + $0x290] sm:$0xff] }
 0x213   : > { %1443 = vmatprep.mubr.f32.mxu1 %v382_v44  ;;  %2738 = vmatprep.mubr.f32.mxu0 %v382_v44  ;;  %v292_v44 = vld [vmem:[%s6137_s2 + $0x2b8] sm:$0xff] }
 0x216   : > { %1444 = vmatmul.mubr.f32.gmra.mrb[198].mxu1 %v381_v45  ;;  %2739 = vmatmul.mubr.f32.gmra.mrb[198].mxu0 %v381_v45  ;;  %v291_v45 = vld [vmem:[%s6137_s2 + $0x2b0] sm:$0xff] }
 0x217   : > { %1448 = vmatprep.mubr.f32.mxu1 %v386_v46  ;;  %2743 = vmatprep.mubr.f32.mxu0 %v386_v46  ;;  %v296_v46 = vld [vmem:[%s6137_s2 + $0x2d8] sm:$0xff] }
 0x21a   : > { %1449 = vmatmul.mubr.f32.gmra.mrb[200].mxu1 %v385_v47  ;;  %2744 = vmatmul.mubr.f32.gmra.mrb[200].mxu0 %v385_v47  ;;  %v295_v47 = vld [vmem:[%s6137_s2 + $0x2d0] sm:$0xff] }
 0x21b   : > { %1453 = vmatprep.mubr.f32.mxu1 %v390_v48  ;;  %2748 = vmatprep.mubr.f32.mxu0 %v390_v48  ;;  %v300_v48 = vld [vmem:[%s6137_s2 + $0x2f8] sm:$0xff] }
 0x21e   : > { %1454 = vmatmul.mubr.f32.gmra.mrb[202].mxu1 %v389_v49  ;;  %2749 = vmatmul.mubr.f32.gmra.mrb[202].mxu0 %v389_v49  ;;  %v299_v49 = vld [vmem:[%s6137_s2 + $0x2f0] sm:$0xff] }
 0x21f   : > { %1458 = vmatprep.mubr.f32.mxu1 %v394_v50  ;;  %2753 = vmatprep.mubr.f32.mxu0 %v394_v50  ;;  %v304_v50 = vld [vmem:[%s6137_s2 + $0x318] sm:$0xff] }
 0x222   : > { %1459 = vmatmul.mubr.f32.gmra.mrb[204].mxu1 %v393_v51  ;;  %2754 = vmatmul.mubr.f32.gmra.mrb[204].mxu0 %v393_v51  ;;  %v303_v51 = vld [vmem:[%s6137_s2 + $0x310] sm:$0xff] }
 0x223   : > { %1463 = vmatprep.mubr.f32.mxu1 %v398_v52  ;;  %2758 = vmatprep.mubr.f32.mxu0 %v398_v52  ;;  %v308_v52 = vld [vmem:[%s6137_s2 + $0x338] sm:$0xff] }
 0x226   : > { %1464 = vmatmul.mubr.f32.gmra.mrb[206].mxu1 %v397_v53  ;;  %2759 = vmatmul.mubr.f32.gmra.mrb[206].mxu0 %v397_v53  ;;  %v307_v53 = vld [vmem:[%s6137_s2 + $0x330] sm:$0xff] }
 0x227   : > { %1468 = vmatprep.mubr.f32.mxu1 %v402_v54  ;;  %2763 = vmatprep.mubr.f32.mxu0 %v402_v54  ;;  %v312_v54 = vld [vmem:[%s6137_s2 + $0x358] sm:$0xff] }
 0x22a   : > { %1469 = vmatmul.mubr.f32.gmra.mrb[208].mxu1 %v401_v55  ;;  %2764 = vmatmul.mubr.f32.gmra.mrb[208].mxu0 %v401_v55  ;;  %v311_v55 = vld [vmem:[%s6137_s2 + $0x350] sm:$0xff] }
 0x22b   : > { %1473 = vmatprep.mubr.f32.mxu1 %v406_v56  ;;  %2768 = vmatprep.mubr.f32.mxu0 %v406_v56  ;;  %v316_v56 = vld [vmem:[%s6137_s2 + $0x378] sm:$0xff] }
 0x22e   : > { %1474 = vmatmul.mubr.f32.gmra.mrb[210].mxu1 %v405_v57  ;;  %2769 = vmatmul.mubr.f32.gmra.mrb[210].mxu0 %v405_v57  ;;  %v315_v57 = vld [vmem:[%s6137_s2 + $0x370] sm:$0xff] }
 0x22f   : > { %1478 = vmatprep.mubr.f32.mxu1 %v410_v58  ;;  %2773 = vmatprep.mubr.f32.mxu0 %v410_v58  ;;  %v320_v58 = vld [vmem:[%s6137_s2 + $0x398] sm:$0xff] }
 0x232   : > { %1479 = vmatmul.mubr.f32.gmra.mrb[212].mxu1 %v409_v59  ;;  %2774 = vmatmul.mubr.f32.gmra.mrb[212].mxu0 %v409_v59  ;;  %v319_v59 = vld [vmem:[%s6137_s2 + $0x390] sm:$0xff] }
 0x233   : > { %1483 = vmatprep.mubr.f32.mxu1 %v414_v60  ;;  %2778 = vmatprep.mubr.f32.mxu0 %v414_v60  ;;  %v324_v60 = vld [vmem:[%s6137_s2 + $0x3b8] sm:$0xff] }
 0x236   : > { %1484 = vmatmul.mubr.f32.gmra.mrb[214].mxu1 %v413_v3  ;;  %2779 = vmatmul.mubr.f32.gmra.mrb[214].mxu0 %v413_v3  ;;  %v323_v3 = vld [vmem:[%s6137_s2 + $0x3b0] sm:$0xff] }
 0x237   : > { %1488 = vmatprep.mubr.f32.mxu1 %v418_v61  ;;  %2783 = vmatprep.mubr.f32.mxu0 %v418_v61  ;;  %v328_v61 = vld [vmem:[%s6137_s2 + $0x3d8] sm:$0xff] }
 0x23a   : > { %1489 = vmatmul.mubr.f32.gmra.mrb[216].mxu1 %v417_v62  ;;  %2784 = vmatmul.mubr.f32.gmra.mrb[216].mxu0 %v417_v62  ;;  %v327_v62 = vld [vmem:[%s6137_s2 + $0x3d0] sm:$0xff] }
 0x23b   : > { %1493 = vmatprep.mubr.f32.mxu1 %v422_v63  ;;  %2788 = vmatprep.mubr.f32.mxu0 %v422_v63  ;;  %v332_v63 = vld [vmem:[%s6137_s2 + $0x3f8] sm:$0xff] }
 0x23e   : > { %1494 = vmatmul.mubr.f32.gmra.mrb[218].mxu1 %v421_v0  ;;  %2789 = vmatmul.mubr.f32.gmra.mrb[218].mxu0 %v421_v0  ;;  %v331_v0 = vld [vmem:[%s6137_s2 + $0x3f0] sm:$0xff] }
 0x23f   : > { %3308 = vmatprep.mubr.msk.f32.mxu1 %vm993_vm2, %v208_v1  ;;  %3418 = vmatprep.mubr.msk.f32.mxu0 %vm993_vm2, %v208_v1  ;;  %v336_v1 = vld [vmem:[%s6137_s2 + $0x418] sm:$0xff] }
 0x242   : > { %1564 = vmatmul.mubr.f32.vlgmr.msra.gmra.mrb[110].mxu1 %v207_v2  ;;  %2859 = vmatmul.mubr.f32.vlgmr.msra.gmra.mrb[110].mxu0 %v207_v2  ;;  %v335_v2 = vld [vmem:[%s6137_s2 + $0x410] sm:$0xff] }
 0x243   : > { %3309 = vmatprep.mubr.msk.f32.mxu1 %vm993_vm2, %v212_v4  ;;  %3419 = vmatprep.mubr.msk.f32.mxu0 %vm993_vm2, %v212_v4  ;;  %v340_v4 = vld [vmem:[%s6137_s2 + $0x438] sm:$0xff] }
 0x246   : > { %1569 = vmatmul.mubr.f32.gmra.mrb[112].mxu1 %v211_v6  ;;  %2864 = vmatmul.mubr.f32.gmra.mrb[112].mxu0 %v211_v6  ;;  %v339_v6 = vld [vmem:[%s6137_s2 + $0x430] sm:$0xff] }
 0x247   : > { %3310 = vmatprep.mubr.msk.f32.mxu1 %vm993_vm2, %v216_v5  ;;  %3420 = vmatprep.mubr.msk.f32.mxu0 %vm993_vm2, %v216_v5  ;;  %v344_v5 = vld [vmem:[%s6137_s2 + $0x458] sm:$0xff] }
 0x24a   : > { %1574 = vmatmul.mubr.f32.gmra.mrb[114].mxu1 %v215_v7  ;;  %2869 = vmatmul.mubr.f32.gmra.mrb[114].mxu0 %v215_v7  ;;  %v343_v7 = vld [vmem:[%s6137_s2 + $0x450] sm:$0xff] }
 0x24b   : > { %3311 = vmatprep.mubr.msk.f32.mxu1 %vm993_vm2, %v220_v8  ;;  %3421 = vmatprep.mubr.msk.f32.mxu0 %vm993_vm2, %v220_v8  ;;  %v348_v8 = vld [vmem:[%s6137_s2 + $0x478] sm:$0xff] }
 0x24e   : > { %1579 = vmatmul.mubr.f32.gmra.mrb[116].mxu1 %v219_v9  ;;  %2874 = vmatmul.mubr.f32.gmra.mrb[116].mxu0 %v219_v9  ;;  %v347_v9 = vld [vmem:[%s6137_s2 + $0x470] sm:$0xff] }
 0x24f   : > { %3312 = vmatprep.mubr.msk.f32.mxu1 %vm993_vm2, %v224_v10  ;;  %3422 = vmatprep.mubr.msk.f32.mxu0 %vm993_vm2, %v224_v10  ;;  %v352_v10 = vld [vmem:[%s6137_s2 + $0x498] sm:$0xff] }
 0x252   : > { %1584 = vmatmul.mubr.f32.gmra.mrb[118].mxu1 %v223_v11  ;;  %2879 = vmatmul.mubr.f32.gmra.mrb[118].mxu0 %v223_v11  ;;  %v351_v11 = vld [vmem:[%s6137_s2 + $0x490] sm:$0xff] }
 0x253   : > { %3313 = vmatprep.mubr.msk.f32.mxu1 %vm993_vm2, %v228_v12  ;;  %3423 = vmatprep.mubr.msk.f32.mxu0 %vm993_vm2, %v228_v12  ;;  %v356_v12 = vld [vmem:[%s6137_s2 + $0x4b8] sm:$0xff] }
 0x256   : > { %1589 = vmatmul.mubr.f32.gmra.mrb[120].mxu1 %v227_v13  ;;  %2884 = vmatmul.mubr.f32.gmra.mrb[120].mxu0 %v227_v13  ;;  %v355_v13 = vld [vmem:[%s6137_s2 + $0x4b0] sm:$0xff] }
 0x257   : > { %3314 = vmatprep.mubr.msk.f32.mxu1 %vm993_vm2, %v232_v14  ;;  %3424 = vmatprep.mubr.msk.f32.mxu0 %vm993_vm2, %v232_v14  ;;  %v360_v14 = vld [vmem:[%s6137_s2 + $0x4d8] sm:$0xff] }
 0x25a   : > { %1594 = vmatmul.mubr.f32.gmra.mrb[122].mxu1 %v231_v15  ;;  %2889 = vmatmul.mubr.f32.gmra.mrb[122].mxu0 %v231_v15  ;;  %v359_v15 = vld [vmem:[%s6137_s2 + $0x4d0] sm:$0xff] }
 0x25b   : > { %3315 = vmatprep.mubr.msk.f32.mxu1 %vm993_vm2, %v236_v16  ;;  %3425 = vmatprep.mubr.msk.f32.mxu0 %vm993_vm2, %v236_v16  ;;  %v364_v16 = vld [vmem:[%s6137_s2 + $0x4f8] sm:$0xff] }
 0x25e   : > { %1599 = vmatmul.mubr.f32.gmra.mrb[124].mxu1 %v235_v17  ;;  %2894 = vmatmul.mubr.f32.gmra.mrb[124].mxu0 %v235_v17  ;;  %v363_v17 = vld [vmem:[%s6137_s2 + $0x4f0] sm:$0xff] }
 0x25f   : > { %3316 = vmatprep.mubr.msk.f32.mxu1 %vm993_vm2, %v240_v18  ;;  %3426 = vmatprep.mubr.msk.f32.mxu0 %vm993_vm2, %v240_v18  ;;  %v368_v18 = vld [vmem:[%s6137_s2 + $0x518] sm:$0xff] }
 0x262   : > { %1604 = vmatmul.mubr.f32.gmra.mrb[126].mxu1 %v239_v19  ;;  %2899 = vmatmul.mubr.f32.gmra.mrb[126].mxu0 %v239_v19  ;;  %v367_v19 = vld [vmem:[%s6137_s2 + $0x510] sm:$0xff] }
 0x263   : > { %3317 = vmatprep.mubr.msk.f32.mxu1 %vm993_vm2, %v244_v20  ;;  %3427 = vmatprep.mubr.msk.f32.mxu0 %vm993_vm2, %v244_v20  ;;  %v372_v20 = vld [vmem:[%s6137_s2 + $0x538] sm:$0xff] }
 0x266   : > { %1609 = vmatmul.mubr.f32.gmra.mrb[128].mxu1 %v243_v21  ;;  %2904 = vmatmul.mubr.f32.gmra.mrb[128].mxu0 %v243_v21  ;;  %v371_v21 = vld [vmem:[%s6137_s2 + $0x530] sm:$0xff] }
 0x267   : > { %3318 = vmatprep.mubr.msk.f32.mxu1 %vm993_vm2, %v248_v22  ;;  %3428 = vmatprep.mubr.msk.f32.mxu0 %vm993_vm2, %v248_v22  ;;  %v376_v22 = vld [vmem:[%s6137_s2 + $0x558] sm:$0xff] }
 0x26a   : > { %1614 = vmatmul.mubr.f32.gmra.mrb[130].mxu1 %v247_v23  ;;  %2909 = vmatmul.mubr.f32.gmra.mrb[130].mxu0 %v247_v23  ;;  %v375_v23 = vld [vmem:[%s6137_s2 + $0x550] sm:$0xff] }
 0x26b   : > { %3319 = vmatprep.mubr.msk.f32.mxu1 %vm993_vm2, %v252_v24  ;;  %3429 = vmatprep.mubr.msk.f32.mxu0 %vm993_vm2, %v252_v24  ;;  %v380_v24 = vld [vmem:[%s6137_s2 + $0x578] sm:$0xff] }
 0x26e   : > { %1619 = vmatmul.mubr.f32.gmra.mrb[132].mxu1 %v251_v25  ;;  %2914 = vmatmul.mubr.f32.gmra.mrb[132].mxu0 %v251_v25  ;;  %v379_v25 = vld [vmem:[%s6137_s2 + $0x570] sm:$0xff] }
 0x26f   : > { %3320 = vmatprep.mubr.msk.f32.mxu1 %vm993_vm2, %v256_v26  ;;  %3430 = vmatprep.mubr.msk.f32.mxu0 %vm993_vm2, %v256_v26  ;;  %v384_v26 = vld [vmem:[%s6137_s2 + $0x598] sm:$0xff] }
 0x272   : > { %1624 = vmatmul.mubr.f32.gmra.mrb[134].mxu1 %v255_v27  ;;  %2919 = vmatmul.mubr.f32.gmra.mrb[134].mxu0 %v255_v27  ;;  %v383_v27 = vld [vmem:[%s6137_s2 + $0x590] sm:$0xff] }
 0x273   : > { %3321 = vmatprep.mubr.msk.f32.mxu1 %vm993_vm2, %v260_v28  ;;  %3431 = vmatprep.mubr.msk.f32.mxu0 %vm993_vm2, %v260_v28  ;;  %v388_v28 = vld [vmem:[%s6137_s2 + $0x5b8] sm:$0xff] }
 0x276   : > { %1629 = vmatmul.mubr.f32.gmra.mrb[136].mxu1 %v259_v29  ;;  %2924 = vmatmul.mubr.f32.gmra.mrb[136].mxu0 %v259_v29  ;;  %v387_v29 = vld [vmem:[%s6137_s2 + $0x5b0] sm:$0xff] }
 0x277   : > { %3322 = vmatprep.mubr.msk.f32.mxu1 %vm993_vm2, %v264_v30  ;;  %3432 = vmatprep.mubr.msk.f32.mxu0 %vm993_vm2, %v264_v30  ;;  %v392_v30 = vld [vmem:[%s6137_s2 + $0x5d8] sm:$0xff] }
 0x27a   : > { %1634 = vmatmul.mubr.f32.gmra.mrb[138].mxu1 %v263_v31  ;;  %2929 = vmatmul.mubr.f32.gmra.mrb[138].mxu0 %v263_v31  ;;  %v391_v31 = vld [vmem:[%s6137_s2 + $0x5d0] sm:$0xff] }
 0x27b   : > { %3323 = vmatprep.mubr.msk.f32.mxu1 %vm993_vm2, %v268_v32  ;;  %3433 = vmatprep.mubr.msk.f32.mxu0 %vm993_vm2, %v268_v32  ;;  %v396_v32 = vld [vmem:[%s6137_s2 + $0x5f8] sm:$0xff] }
 0x27e   : > { %1639 = vmatmul.mubr.f32.gmra.mrb[140].mxu1 %v267_v33  ;;  %2934 = vmatmul.mubr.f32.gmra.mrb[140].mxu0 %v267_v33  ;;  %v395_v33 = vld [vmem:[%s6137_s2 + $0x5f0] sm:$0xff] }
 0x27f   : > { %3324 = vmatprep.mubr.msk.f32.mxu1 %vm993_vm2, %v272_v34  ;;  %3434 = vmatprep.mubr.msk.f32.mxu0 %vm993_vm2, %v272_v34  ;;  %v400_v34 = vld [vmem:[%s6137_s2 + $0x618] sm:$0xff] }
 0x282   : > { %1644 = vmatmul.mubr.f32.gmra.mrb[142].mxu1 %v271_v35  ;;  %2939 = vmatmul.mubr.f32.gmra.mrb[142].mxu0 %v271_v35  ;;  %v399_v35 = vld [vmem:[%s6137_s2 + $0x610] sm:$0xff] }
 0x283   : > { %3325 = vmatprep.mubr.msk.f32.mxu1 %vm993_vm2, %v276_v36  ;;  %3435 = vmatprep.mubr.msk.f32.mxu0 %vm993_vm2, %v276_v36  ;;  %v404_v36 = vld [vmem:[%s6137_s2 + $0x638] sm:$0xff] }
 0x286   : > { %1649 = vmatmul.mubr.f32.gmra.mrb[144].mxu1 %v275_v37  ;;  %2944 = vmatmul.mubr.f32.gmra.mrb[144].mxu0 %v275_v37  ;;  %v403_v37 = vld [vmem:[%s6137_s2 + $0x630] sm:$0xff] }
 0x287   : > { %3326 = vmatprep.mubr.msk.f32.mxu1 %vm993_vm2, %v280_v38  ;;  %3436 = vmatprep.mubr.msk.f32.mxu0 %vm993_vm2, %v280_v38  ;;  %v408_v38 = vld [vmem:[%s6137_s2 + $0x658] sm:$0xff] }
 0x28a   : > { %1654 = vmatmul.mubr.f32.gmra.mrb[146].mxu1 %v279_v39  ;;  %2949 = vmatmul.mubr.f32.gmra.mrb[146].mxu0 %v279_v39  ;;  %v407_v39 = vld [vmem:[%s6137_s2 + $0x650] sm:$0xff] }
 0x28b   : > { %3327 = vmatprep.mubr.msk.f32.mxu1 %vm993_vm2, %v284_v40  ;;  %3437 = vmatprep.mubr.msk.f32.mxu0 %vm993_vm2, %v284_v40  ;;  %v412_v40 = vld [vmem:[%s6137_s2 + $0x678] sm:$0xff] }
 0x28e   : > { %1659 = vmatmul.mubr.f32.gmra.mrb[148].mxu1 %v283_v41  ;;  %2954 = vmatmul.mubr.f32.gmra.mrb[148].mxu0 %v283_v41  ;;  %v411_v41 = vld [vmem:[%s6137_s2 + $0x670] sm:$0xff] }
 0x28f   : > { %3328 = vmatprep.mubr.msk.f32.mxu1 %vm993_vm2, %v288_v42  ;;  %3438 = vmatprep.mubr.msk.f32.mxu0 %vm993_vm2, %v288_v42  ;;  %v416_v42 = vld [vmem:[%s6137_s2 + $0x698] sm:$0xff] }
 0x292   : > { %1664 = vmatmul.mubr.f32.gmra.mrb[150].mxu1 %v287_v43  ;;  %2959 = vmatmul.mubr.f32.gmra.mrb[150].mxu0 %v287_v43  ;;  %v415_v43 = vld [vmem:[%s6137_s2 + $0x690] sm:$0xff] }
 0x293   : > { %3329 = vmatprep.mubr.msk.f32.mxu1 %vm993_vm2, %v292_v44  ;;  %3439 = vmatprep.mubr.msk.f32.mxu0 %vm993_vm2, %v292_v44  ;;  %v420_v44 = vld [vmem:[%s6137_s2 + $0x6b8] sm:$0xff] }
 0x296   : > { %1669 = vmatmul.mubr.f32.gmra.mrb[152].mxu1 %v291_v45  ;;  %2964 = vmatmul.mubr.f32.gmra.mrb[152].mxu0 %v291_v45  ;;  %v5780_v45 = vld [vmem:[%s6138_s3] ss:$0 sm:$0xff] }
 0x297   : > { %3330 = vmatprep.mubr.msk.f32.mxu1 %vm993_vm2, %v296_v46  ;;  %3440 = vmatprep.mubr.msk.f32.mxu0 %vm993_vm2, %v296_v46  ;;  %v419_v46 = vld [vmem:[%s6137_s2 + $0x6b0] sm:$0xff] }
 0x29a   : > { %1674 = vmatmul.mubr.f32.gmra.mrb[154].mxu1 %v295_v47  ;;  %2969 = vmatmul.mubr.f32.gmra.mrb[154].mxu0 %v295_v47  ;;  %v424_v47 = vld [vmem:[%s6137_s2 + $0x6d8] sm:$0xff] }
 0x29b   : > { %3331 = vmatprep.mubr.msk.f32.mxu1 %vm993_vm2, %v300_v48  ;;  %3441 = vmatprep.mubr.msk.f32.mxu0 %vm993_vm2, %v300_v48 }
 0x29e   : > { %1679 = vmatmul.mubr.f32.gmra.mrb[156].mxu1 %v299_v49  ;;  %2974 = vmatmul.mubr.f32.gmra.mrb[156].mxu0 %v299_v49 }
 0x29f   : > { %3332 = vmatprep.mubr.msk.f32.mxu1 %vm993_vm2, %v304_v50  ;;  %3442 = vmatprep.mubr.msk.f32.mxu0 %vm993_vm2, %v304_v50 }
 0x2a2   : > { %1684 = vmatmul.mubr.f32.gmra.mrb[158].mxu1 %v303_v51  ;;  %2979 = vmatmul.mubr.f32.gmra.mrb[158].mxu0 %v303_v51 }
 0x2a3   : > { %3333 = vmatprep.mubr.msk.f32.mxu1 %vm993_vm2, %v308_v52  ;;  %3443 = vmatprep.mubr.msk.f32.mxu0 %vm993_vm2, %v308_v52 }
 0x2a6   : > { %1689 = vmatmul.mubr.f32.gmra.mrb[160].mxu1 %v307_v53  ;;  %2984 = vmatmul.mubr.f32.gmra.mrb[160].mxu0 %v307_v53 }
 0x2a7   : > { %3334 = vmatprep.mubr.msk.f32.mxu1 %vm993_vm2, %v312_v54  ;;  %3444 = vmatprep.mubr.msk.f32.mxu0 %vm993_vm2, %v312_v54  ;;  %v423_v54 = vld [vmem:[%s6137_s2 + $0x6d0] sm:$0xff] }
 0x2aa   : > { %1694 = vmatmul.mubr.f32.gmra.mrb[162].mxu1 %v311_v55  ;;  %2989 = vmatmul.mubr.f32.gmra.mrb[162].mxu0 %v311_v55 }
 0x2ab   : > { %3335 = vmatprep.mubr.msk.f32.mxu1 %vm993_vm2, %v316_v56  ;;  %3445 = vmatprep.mubr.msk.f32.mxu0 %vm993_vm2, %v316_v56 }
 0x2ae   : > { %1699 = vmatmul.mubr.f32.gmra.mrb[164].mxu1 %v315_v57  ;;  %2994 = vmatmul.mubr.f32.gmra.mrb[164].mxu0 %v315_v57 }
 0x2af   : > { %3336 = vmatprep.mubr.msk.f32.mxu1 %vm993_vm2, %v320_v58  ;;  %3446 = vmatprep.mubr.msk.f32.mxu0 %vm993_vm2, %v320_v58 }
 0x2b2   : > { %1704 = vmatmul.mubr.f32.gmra.mrb[166].mxu1 %v319_v59  ;;  %2999 = vmatmul.mubr.f32.gmra.mrb[166].mxu0 %v319_v59 }
 0x2b3   : > { %3337 = vmatprep.mubr.msk.f32.mxu1 %vm993_vm2, %v324_v60  ;;  %3447 = vmatprep.mubr.msk.f32.mxu0 %vm993_vm2, %v324_v60 }
 0x2b6   : > { %1709 = vmatmul.mubr.f32.gmra.mrb[168].mxu1 %v323_v3  ;;  %3004 = vmatmul.mubr.f32.gmra.mrb[168].mxu0 %v323_v3 }
 0x2b7   : > { %3338 = vmatprep.mubr.msk.f32.mxu1 %vm993_vm2, %v328_v61  ;;  %3448 = vmatprep.mubr.msk.f32.mxu0 %vm993_vm2, %v328_v61 }
 0x2ba   : > { %1714 = vmatmul.mubr.f32.gmra.mrb[170].mxu1 %v327_v62  ;;  %3009 = vmatmul.mubr.f32.gmra.mrb[170].mxu0 %v327_v62 }
 0x2bb   : > { %3339 = vmatprep.mubr.msk.f32.mxu1 %vm993_vm2, %v332_v63  ;;  %3449 = vmatprep.mubr.msk.f32.mxu0 %vm993_vm2, %v332_v63 }
 0x2be   : > { %1719 = vmatmul.mubr.f32.gmra.mrb[172].mxu1 %v331_v0  ;;  %3014 = vmatmul.mubr.f32.gmra.mrb[172].mxu0 %v331_v0 }
 0x2bf   : > { %3340 = vmatprep.mubr.msk.f32.mxu1 %vm993_vm2, %v336_v1  ;;  %3450 = vmatprep.mubr.msk.f32.mxu0 %vm993_vm2, %v336_v1 }
 0x2c2   : > { %1724 = vmatmul.mubr.f32.gmra.mrb[174].mxu1 %v335_v2  ;;  %3019 = vmatmul.mubr.f32.gmra.mrb[174].mxu0 %v335_v2 }
 0x2c3   : > { %3341 = vmatprep.mubr.msk.f32.mxu1 %vm993_vm2, %v340_v4  ;;  %3451 = vmatprep.mubr.msk.f32.mxu0 %vm993_vm2, %v340_v4 }
 0x2c6   : > { %1729 = vmatmul.mubr.f32.gmra.mrb[176].mxu1 %v339_v6  ;;  %3024 = vmatmul.mubr.f32.gmra.mrb[176].mxu0 %v339_v6 }
 0x2c7   : > { %3342 = vmatprep.mubr.msk.f32.mxu1 %vm993_vm2, %v344_v5  ;;  %3452 = vmatprep.mubr.msk.f32.mxu0 %vm993_vm2, %v344_v5 }
 0x2ca   : > { %1734 = vmatmul.mubr.f32.gmra.mrb[178].mxu1 %v343_v7  ;;  %3029 = vmatmul.mubr.f32.gmra.mrb[178].mxu0 %v343_v7 }
 0x2cb   : > { %3343 = vmatprep.mubr.msk.f32.mxu1 %vm993_vm2, %v348_v8  ;;  %3453 = vmatprep.mubr.msk.f32.mxu0 %vm993_vm2, %v348_v8 }
 0x2ce   : > { %1739 = vmatmul.mubr.f32.gmra.mrb[180].mxu1 %v347_v9  ;;  %3034 = vmatmul.mubr.f32.gmra.mrb[180].mxu0 %v347_v9 }
 0x2cf   : > { %3344 = vmatprep.mubr.msk.f32.mxu1 %vm993_vm2, %v352_v10  ;;  %3454 = vmatprep.mubr.msk.f32.mxu0 %vm993_vm2, %v352_v10 }
 0x2d2   : > { %1744 = vmatmul.mubr.f32.gmra.mrb[182].mxu1 %v351_v11  ;;  %3039 = vmatmul.mubr.f32.gmra.mrb[182].mxu0 %v351_v11 }
 0x2d3   : > { %3345 = vmatprep.mubr.msk.f32.mxu1 %vm993_vm2, %v356_v12  ;;  %3455 = vmatprep.mubr.msk.f32.mxu0 %vm993_vm2, %v356_v12 }
 0x2d6   : > { %1749 = vmatmul.mubr.f32.gmra.mrb[184].mxu1 %v355_v13  ;;  %3044 = vmatmul.mubr.f32.gmra.mrb[184].mxu0 %v355_v13 }
 0x2d7   : > { %3346 = vmatprep.mubr.msk.f32.mxu1 %vm993_vm2, %v360_v14  ;;  %3456 = vmatprep.mubr.msk.f32.mxu0 %vm993_vm2, %v360_v14 }
 0x2da   : > { %1754 = vmatmul.mubr.f32.gmra.mrb[186].mxu1 %v359_v15  ;;  %3049 = vmatmul.mubr.f32.gmra.mrb[186].mxu0 %v359_v15 }
 0x2db   : > { %3347 = vmatprep.mubr.msk.f32.mxu1 %vm993_vm2, %v364_v16  ;;  %3457 = vmatprep.mubr.msk.f32.mxu0 %vm993_vm2, %v364_v16 }
 0x2de   : > { %1759 = vmatmul.mubr.f32.gmra.mrb[188].mxu1 %v363_v17  ;;  %3054 = vmatmul.mubr.f32.gmra.mrb[188].mxu0 %v363_v17 }
 0x2df   : > { %3348 = vmatprep.mubr.msk.f32.mxu1 %vm993_vm2, %v368_v18  ;;  %3458 = vmatprep.mubr.msk.f32.mxu0 %vm993_vm2, %v368_v18 }
 0x2e2   : > { %1764 = vmatmul.mubr.f32.gmra.mrb[190].mxu1 %v367_v19  ;;  %3059 = vmatmul.mubr.f32.gmra.mrb[190].mxu0 %v367_v19 }
 0x2e3   : > { %3349 = vmatprep.mubr.msk.f32.mxu1 %vm993_vm2, %v372_v20  ;;  %3459 = vmatprep.mubr.msk.f32.mxu0 %vm993_vm2, %v372_v20 }
 0x2e6   : > { %1769 = vmatmul.mubr.f32.gmra.mrb[192].mxu1 %v371_v21  ;;  %3064 = vmatmul.mubr.f32.gmra.mrb[192].mxu0 %v371_v21 }
 0x2e7   : > { %3350 = vmatprep.mubr.msk.f32.mxu1 %vm993_vm2, %v376_v22  ;;  %3460 = vmatprep.mubr.msk.f32.mxu0 %vm993_vm2, %v376_v22 }
 0x2ea   : > { %1774 = vmatmul.mubr.f32.gmra.mrb[194].mxu1 %v375_v23  ;;  %3069 = vmatmul.mubr.f32.gmra.mrb[194].mxu0 %v375_v23 }
 0x2eb   : > { %3351 = vmatprep.mubr.msk.f32.mxu1 %vm993_vm2, %v380_v24  ;;  %3461 = vmatprep.mubr.msk.f32.mxu0 %vm993_vm2, %v380_v24 }
 0x2ee   : > { %1779 = vmatmul.mubr.f32.gmra.mrb[196].mxu1 %v379_v25  ;;  %3074 = vmatmul.mubr.f32.gmra.mrb[196].mxu0 %v379_v25 }
 0x2ef   : > { %3352 = vmatprep.mubr.msk.f32.mxu1 %vm993_vm2, %v384_v26  ;;  %3462 = vmatprep.mubr.msk.f32.mxu0 %vm993_vm2, %v384_v26 }
 0x2f2   : > { %1784 = vmatmul.mubr.f32.gmra.mrb[198].mxu1 %v383_v27  ;;  %3079 = vmatmul.mubr.f32.gmra.mrb[198].mxu0 %v383_v27 }
 0x2f3   : > { %3353 = vmatprep.mubr.msk.f32.mxu1 %vm993_vm2, %v388_v28  ;;  %3463 = vmatprep.mubr.msk.f32.mxu0 %vm993_vm2, %v388_v28 }
 0x2f6   : > { %1789 = vmatmul.mubr.f32.gmra.mrb[200].mxu1 %v387_v29  ;;  %3084 = vmatmul.mubr.f32.gmra.mrb[200].mxu0 %v387_v29 }
 0x2f7   : > { %3354 = vmatprep.mubr.msk.f32.mxu1 %vm993_vm2, %v392_v30  ;;  %3464 = vmatprep.mubr.msk.f32.mxu0 %vm993_vm2, %v392_v30 }
 0x2fa   : > { %1794 = vmatmul.mubr.f32.gmra.mrb[202].mxu1 %v391_v31  ;;  %3089 = vmatmul.mubr.f32.gmra.mrb[202].mxu0 %v391_v31 }
 0x2fb   : > { %3355 = vmatprep.mubr.msk.f32.mxu1 %vm993_vm2, %v396_v32  ;;  %3465 = vmatprep.mubr.msk.f32.mxu0 %vm993_vm2, %v396_v32 }
 0x2fe   : > { %1799 = vmatmul.mubr.f32.gmra.mrb[204].mxu1 %v395_v33  ;;  %3094 = vmatmul.mubr.f32.gmra.mrb[204].mxu0 %v395_v33 }
 0x2ff   : > { %3356 = vmatprep.mubr.msk.f32.mxu1 %vm993_vm2, %v400_v34  ;;  %3466 = vmatprep.mubr.msk.f32.mxu0 %vm993_vm2, %v400_v34 }
 0x302   : > { %1804 = vmatmul.mubr.f32.gmra.mrb[206].mxu1 %v399_v35  ;;  %3099 = vmatmul.mubr.f32.gmra.mrb[206].mxu0 %v399_v35 }
 0x303   : > { %3357 = vmatprep.mubr.msk.f32.mxu1 %vm993_vm2, %v404_v36  ;;  %3467 = vmatprep.mubr.msk.f32.mxu0 %vm993_vm2, %v404_v36 }
 0x306   : > { %1809 = vmatmul.mubr.f32.gmra.mrb[208].mxu1 %v403_v37  ;;  %3104 = vmatmul.mubr.f32.gmra.mrb[208].mxu0 %v403_v37 }
 0x307   : > { %3358 = vmatprep.mubr.msk.f32.mxu1 %vm993_vm2, %v408_v38  ;;  %3468 = vmatprep.mubr.msk.f32.mxu0 %vm993_vm2, %v408_v38 }
 0x30a   : > { %1814 = vmatmul.mubr.f32.gmra.mrb[210].mxu1 %v407_v39  ;;  %3109 = vmatmul.mubr.f32.gmra.mrb[210].mxu0 %v407_v39 }
 0x30b   : > { %3359 = vmatprep.mubr.msk.f32.mxu1 %vm993_vm2, %v412_v40  ;;  %3469 = vmatprep.mubr.msk.f32.mxu0 %vm993_vm2, %v412_v40 }
 0x30e   : > { %1819 = vmatmul.mubr.f32.gmra.mrb[212].mxu1 %v411_v41  ;;  %3114 = vmatmul.mubr.f32.gmra.mrb[212].mxu0 %v411_v41 }
 0x30f   : > { %3360 = vmatprep.mubr.msk.f32.mxu1 %vm993_vm2, %v416_v42  ;;  %3470 = vmatprep.mubr.msk.f32.mxu0 %vm993_vm2, %v416_v42 }
 0x312   : > { %1824 = vmatmul.mubr.f32.gmra.mrb[214].mxu1 %v415_v43  ;;  %3119 = vmatmul.mubr.f32.gmra.mrb[214].mxu0 %v415_v43 }
 0x313   : > { %3361 = vmatprep.mubr.msk.f32.mxu1 %vm993_vm2, %v420_v44  ;;  %3471 = vmatprep.mubr.msk.f32.mxu0 %vm993_vm2, %v420_v44 }
 0x315   : > { %v1565_v48 = vpop.f32.mrb[110].mxu1  ;;  %v2860_v49 = vpop.f32.mrb[110].mxu0 }
 0x316   : > { %v4113_v50 = vadd.f32 %v5780_v45, %v1565_v48  ;;  %v4168_v51 = vadd.f32 %v5780_v45, %v2860_v49  ;;  %v1567_v52 = vpop.f32.mrb[111].mxu1  ;;  %1829 = vmatmul.mubr.f32.gmra.mrb[216].mxu1 %v419_v46  ;;  %v2862_v53 = vpop.f32.mrb[111].mxu0  ;;  %3124 = vmatmul.mubr.f32.gmra.mrb[216].mxu0 %v419_v46 }
 0x317   : > { %3362 = vmatprep.mubr.msk.f32.mxu1 %vm993_vm2, %v424_v47  ;;  %3472 = vmatprep.mubr.msk.f32.mxu0 %vm993_vm2, %v424_v47 }
 0x318   : > { %1839 = vst.msk [vmem:[%s5795_s9] sm:$0xff] %vm481_vm1, %v4113_v50  ;;  %3134 = vst.msk [vmem:[%s5795_s9 + $0x1b8] sm:$0xff] %vm481_vm1, %v4168_v51 }
 0x319   : > { %v1570_v55 = vpop.f32.mrb[112].mxu1  ;;  %v2865_v56 = vpop.f32.mrb[112].mxu0 }
 0x31a   : > { %v4114_v57 = vadd.f32 %v5780_v45, %v1570_v55  ;;  %v4169_v58 = vadd.f32 %v5780_v45, %v2865_v56  ;;  %v1572_v59 = vpop.f32.mrb[113].mxu1  ;;  %1834 = vmatmul.mubr.f32.gmra.mrb[218].mxu1 %v423_v54  ;;  %v2867_v60 = vpop.f32.mrb[113].mxu0  ;;  %3129 = vmatmul.mubr.f32.gmra.mrb[218].mxu0 %v423_v54 }
 0x31c   : > { %1840 = vst.msk [vmem:[%s5795_s9 + $0x8] sm:$0xff] %vm481_vm1, %v4114_v57  ;;  %3135 = vst.msk [vmem:[%s5795_s9 + $0x1c0] sm:$0xff] %vm481_vm1, %v4169_v58 }
 0x31d   : > { %v1575_v3 = vpop.f32.mrb[114].mxu1  ;;  %v2870_v61 = vpop.f32.mrb[114].mxu0 }
 0x31e   : > { %v4115_v62 = vadd.f32 %v5780_v45, %v1575_v3  ;;  %v4170_v63 = vadd.f32 %v5780_v45, %v2870_v61  ;;  %v1577_v0 = vpop.f32.mrb[115].mxu1  ;;  %v2872_v1 = vpop.f32.mrb[115].mxu0 }
 0x320   : > { %1841 = vst.msk [vmem:[%s5795_s9 + $0x10] sm:$0xff] %vm481_vm1, %v4115_v62  ;;  %3136 = vst.msk [vmem:[%s5795_s9 + $0x1c8] sm:$0xff] %vm481_vm1, %v4170_v63 }
 0x321   : > { %v1580_v2 = vpop.f32.mrb[116].mxu1  ;;  %v2875_v4 = vpop.f32.mrb[116].mxu0 }
 0x322   : > { %v4116_v6 = vadd.f32 %v5780_v45, %v1580_v2  ;;  %v4171_v5 = vadd.f32 %v5780_v45, %v2875_v4  ;;  %v1582_v7 = vpop.f32.mrb[117].mxu1  ;;  %v2877_v8 = vpop.f32.mrb[117].mxu0 }
 0x324   : > { %1842 = vst.msk [vmem:[%s5795_s9 + $0x18] sm:$0xff] %vm481_vm1, %v4116_v6  ;;  %3137 = vst.msk [vmem:[%s5795_s9 + $0x1d0] sm:$0xff] %vm481_vm1, %v4171_v5 }
 0x325   : > { %v1585_v9 = vpop.f32.mrb[118].mxu1  ;;  %v2880_v10 = vpop.f32.mrb[118].mxu0 }
 0x326   : > { %v4117_v11 = vadd.f32 %v5780_v45, %v1585_v9  ;;  %v4172_v12 = vadd.f32 %v5780_v45, %v2880_v10  ;;  %v1587_v13 = vpop.f32.mrb[119].mxu1  ;;  %v2882_v14 = vpop.f32.mrb[119].mxu0 }
 0x328   : > { %1843 = vst.msk [vmem:[%s5795_s9 + $0x20] sm:$0xff] %vm481_vm1, %v4117_v11  ;;  %3138 = vst.msk [vmem:[%s5795_s9 + $0x1d8] sm:$0xff] %vm481_vm1, %v4172_v12 }
 0x329   : > { %v1590_v15 = vpop.f32.mrb[120].mxu1  ;;  %v2885_v16 = vpop.f32.mrb[120].mxu0 }
 0x32a   : > { %v4118_v17 = vadd.f32 %v5780_v45, %v1590_v15  ;;  %v4173_v18 = vadd.f32 %v5780_v45, %v2885_v16  ;;  %v1592_v19 = vpop.f32.mrb[121].mxu1  ;;  %v2887_v20 = vpop.f32.mrb[121].mxu0 }
 0x32c   : > { %1844 = vst.msk [vmem:[%s5795_s9 + $0x28] sm:$0xff] %vm481_vm1, %v4118_v17  ;;  %3139 = vst.msk [vmem:[%s5795_s9 + $0x1e0] sm:$0xff] %vm481_vm1, %v4173_v18 }
 0x32d   : > { %v1595_v21 = vpop.f32.mrb[122].mxu1  ;;  %v2890_v22 = vpop.f32.mrb[122].mxu0 }
 0x32e   : > { %v4119_v23 = vadd.f32 %v5780_v45, %v1595_v21  ;;  %v4174_v24 = vadd.f32 %v5780_v45, %v2890_v22  ;;  %v1597_v25 = vpop.f32.mrb[123].mxu1  ;;  %v2892_v26 = vpop.f32.mrb[123].mxu0 }
 0x330   : > { %1845 = vst.msk [vmem:[%s5795_s9 + $0x30] sm:$0xff] %vm481_vm1, %v4119_v23  ;;  %3140 = vst.msk [vmem:[%s5795_s9 + $0x1e8] sm:$0xff] %vm481_vm1, %v4174_v24 }
 0x331   : > { %v1600_v27 = vpop.f32.mrb[124].mxu1  ;;  %v2895_v28 = vpop.f32.mrb[124].mxu0 }
 0x332   : > { %v4120_v29 = vadd.f32 %v5780_v45, %v1600_v27  ;;  %v4175_v30 = vadd.f32 %v5780_v45, %v2895_v28  ;;  %v1602_v31 = vpop.f32.mrb[125].mxu1  ;;  %v2897_v32 = vpop.f32.mrb[125].mxu0 }
 0x334   : > { %1846 = vst.msk [vmem:[%s5795_s9 + $0x38] sm:$0xff] %vm481_vm1, %v4120_v29  ;;  %3141 = vst.msk [vmem:[%s5795_s9 + $0x1f0] sm:$0xff] %vm481_vm1, %v4175_v30 }
 0x335   : > { %v1605_v33 = vpop.f32.mrb[126].mxu1  ;;  %v2900_v34 = vpop.f32.mrb[126].mxu0 }
 0x336   : > { %v4121_v35 = vadd.f32 %v5780_v45, %v1605_v33  ;;  %v4176_v36 = vadd.f32 %v5780_v45, %v2900_v34  ;;  %v1607_v37 = vpop.f32.mrb[127].mxu1  ;;  %v2902_v38 = vpop.f32.mrb[127].mxu0 }
 0x338   : > { %1847 = vst.msk [vmem:[%s5795_s9 + $0x40] sm:$0xff] %vm481_vm1, %v4121_v35  ;;  %3142 = vst.msk [vmem:[%s5795_s9 + $0x1f8] sm:$0xff] %vm481_vm1, %v4176_v36 }
 0x339   : > { %v1610_v39 = vpop.f32.mrb[128].mxu1  ;;  %v2905_v40 = vpop.f32.mrb[128].mxu0 }
 0x33a   : > { %v4122_v41 = vadd.f32 %v5780_v45, %v1610_v39  ;;  %v4177_v42 = vadd.f32 %v5780_v45, %v2905_v40  ;;  %v1612_v43 = vpop.f32.mrb[129].mxu1  ;;  %v2907_v44 = vpop.f32.mrb[129].mxu0 }
 0x33c   : > { %1848 = vst.msk [vmem:[%s5795_s9 + $0x48] sm:$0xff] %vm481_vm1, %v4122_v41  ;;  %3143 = vst.msk [vmem:[%s5795_s9 + $0x200] sm:$0xff] %vm481_vm1, %v4177_v42 }
 0x33d   : > { %v1615_v46 = vpop.f32.mrb[130].mxu1  ;;  %v2910_v47 = vpop.f32.mrb[130].mxu0 }
 0x33e   : > { %v4123_v48 = vadd.f32 %v5780_v45, %v1615_v46  ;;  %v4178_v49 = vadd.f32 %v5780_v45, %v2910_v47  ;;  %v1617_v50 = vpop.f32.mrb[131].mxu1  ;;  %v2912_v51 = vpop.f32.mrb[131].mxu0 }
 0x340   : > { %1849 = vst.msk [vmem:[%s5795_s9 + $0x50] sm:$0xff] %vm481_vm1, %v4123_v48  ;;  %3144 = vst.msk [vmem:[%s5795_s9 + $0x208] sm:$0xff] %vm481_vm1, %v4178_v49 }
 0x341   : > { %v1620_v52 = vpop.f32.mrb[132].mxu1  ;;  %v2915_v53 = vpop.f32.mrb[132].mxu0 }
 0x342   : > { %v4124_v54 = vadd.f32 %v5780_v45, %v1620_v52  ;;  %v4179_v55 = vadd.f32 %v5780_v45, %v2915_v53  ;;  %v1622_v56 = vpop.f32.mrb[133].mxu1  ;;  %v2917_v57 = vpop.f32.mrb[133].mxu0 }
 0x344   : > { %1850 = vst.msk [vmem:[%s5795_s9 + $0x58] sm:$0xff] %vm481_vm1, %v4124_v54  ;;  %3145 = vst.msk [vmem:[%s5795_s9 + $0x210] sm:$0xff] %vm481_vm1, %v4179_v55 }
 0x345   : > { %v1625_v58 = vpop.f32.mrb[134].mxu1  ;;  %v2920_v59 = vpop.f32.mrb[134].mxu0 }
 0x346   : > { %v4125_v60 = vadd.f32 %v5780_v45, %v1625_v58  ;;  %v4180_v3 = vadd.f32 %v5780_v45, %v2920_v59  ;;  %v1627_v61 = vpop.f32.mrb[135].mxu1  ;;  %v2922_v62 = vpop.f32.mrb[135].mxu0 }
 0x348   : > { %1851 = vst.msk [vmem:[%s5795_s9 + $0x60] sm:$0xff] %vm481_vm1, %v4125_v60  ;;  %3146 = vst.msk [vmem:[%s5795_s9 + $0x218] sm:$0xff] %vm481_vm1, %v4180_v3 }
 0x349   : > { %v1630_v63 = vpop.f32.mrb[136].mxu1  ;;  %v2925_v0 = vpop.f32.mrb[136].mxu0 }
 0x34a   : > { %v4126_v1 = vadd.f32 %v5780_v45, %v1630_v63  ;;  %v4181_v2 = vadd.f32 %v5780_v45, %v2925_v0  ;;  %v1632_v4 = vpop.f32.mrb[137].mxu1  ;;  %v2927_v6 = vpop.f32.mrb[137].mxu0 }
 0x34c   : > { %1852 = vst.msk [vmem:[%s5795_s9 + $0x68] sm:$0xff] %vm481_vm1, %v4126_v1  ;;  %3147 = vst.msk [vmem:[%s5795_s9 + $0x220] sm:$0xff] %vm481_vm1, %v4181_v2 }
 0x34d   : > { %v1635_v5 = vpop.f32.mrb[138].mxu1  ;;  %v2930_v7 = vpop.f32.mrb[138].mxu0 }
 0x34e   : > { %v4127_v8 = vadd.f32 %v5780_v45, %v1635_v5  ;;  %v4182_v9 = vadd.f32 %v5780_v45, %v2930_v7  ;;  %v1637_v10 = vpop.f32.mrb[139].mxu1  ;;  %v2932_v11 = vpop.f32.mrb[139].mxu0 }
 0x350   : > { %1853 = vst.msk [vmem:[%s5795_s9 + $0x70] sm:$0xff] %vm481_vm1, %v4127_v8  ;;  %3148 = vst.msk [vmem:[%s5795_s9 + $0x228] sm:$0xff] %vm481_vm1, %v4182_v9 }
 0x351   : > { %v1640_v12 = vpop.f32.mrb[140].mxu1  ;;  %v2935_v13 = vpop.f32.mrb[140].mxu0 }
 0x352   : > { %v4128_v14 = vadd.f32 %v5780_v45, %v1640_v12  ;;  %v4183_v15 = vadd.f32 %v5780_v45, %v2935_v13  ;;  %v1642_v16 = vpop.f32.mrb[141].mxu1  ;;  %v2937_v17 = vpop.f32.mrb[141].mxu0 }
 0x354   : > { %1854 = vst.msk [vmem:[%s5795_s9 + $0x78] sm:$0xff] %vm481_vm1, %v4128_v14  ;;  %3149 = vst.msk [vmem:[%s5795_s9 + $0x230] sm:$0xff] %vm481_vm1, %v4183_v15 }
 0x355   : > { %v1645_v18 = vpop.f32.mrb[142].mxu1  ;;  %v2940_v19 = vpop.f32.mrb[142].mxu0 }
 0x356   : > { %v4129_v20 = vadd.f32 %v5780_v45, %v1645_v18  ;;  %v4184_v21 = vadd.f32 %v5780_v45, %v2940_v19  ;;  %v1647_v22 = vpop.f32.mrb[143].mxu1  ;;  %v2942_v23 = vpop.f32.mrb[143].mxu0 }
 0x358   : > { %1855 = vst.msk [vmem:[%s5795_s9 + $0x80] sm:$0xff] %vm481_vm1, %v4129_v20  ;;  %3150 = vst.msk [vmem:[%s5795_s9 + $0x238] sm:$0xff] %vm481_vm1, %v4184_v21 }
 0x359   : > { %v1650_v24 = vpop.f32.mrb[144].mxu1  ;;  %v2945_v25 = vpop.f32.mrb[144].mxu0 }
 0x35a   : > { %v4130_v26 = vadd.f32 %v5780_v45, %v1650_v24  ;;  %v4185_v27 = vadd.f32 %v5780_v45, %v2945_v25  ;;  %v1652_v28 = vpop.f32.mrb[145].mxu1  ;;  %v2947_v29 = vpop.f32.mrb[145].mxu0 }
 0x35c   : > { %1856 = vst.msk [vmem:[%s5795_s9 + $0x88] sm:$0xff] %vm481_vm1, %v4130_v26  ;;  %3151 = vst.msk [vmem:[%s5795_s9 + $0x240] sm:$0xff] %vm481_vm1, %v4185_v27 }
 0x35d   : > { %v1655_v30 = vpop.f32.mrb[146].mxu1  ;;  %v2950_v31 = vpop.f32.mrb[146].mxu0 }
 0x35e   : > { %v4131_v32 = vadd.f32 %v5780_v45, %v1655_v30  ;;  %v4186_v33 = vadd.f32 %v5780_v45, %v2950_v31  ;;  %v1657_v34 = vpop.f32.mrb[147].mxu1  ;;  %v2952_v35 = vpop.f32.mrb[147].mxu0 }
 0x360   : > { %1857 = vst.msk [vmem:[%s5795_s9 + $0x90] sm:$0xff] %vm481_vm1, %v4131_v32  ;;  %3152 = vst.msk [vmem:[%s5795_s9 + $0x248] sm:$0xff] %vm481_vm1, %v4186_v33 }
 0x361   : > { %v1660_v36 = vpop.f32.mrb[148].mxu1  ;;  %v2955_v37 = vpop.f32.mrb[148].mxu0 }
 0x362   : > { %v4132_v38 = vadd.f32 %v5780_v45, %v1660_v36  ;;  %v4187_v39 = vadd.f32 %v5780_v45, %v2955_v37  ;;  %v1662_v40 = vpop.f32.mrb[149].mxu1  ;;  %v2957_v41 = vpop.f32.mrb[149].mxu0 }
 0x364   : > { %1858 = vst.msk [vmem:[%s5795_s9 + $0x98] sm:$0xff] %vm481_vm1, %v4132_v38  ;;  %3153 = vst.msk [vmem:[%s5795_s9 + $0x250] sm:$0xff] %vm481_vm1, %v4187_v39 }
 0x365   : > { %v1665_v42 = vpop.f32.mrb[150].mxu1  ;;  %v2960_v43 = vpop.f32.mrb[150].mxu0 }
 0x366   : > { %v4133_v44 = vadd.f32 %v5780_v45, %v1665_v42  ;;  %v4188_v46 = vadd.f32 %v5780_v45, %v2960_v43  ;;  %v1667_v47 = vpop.f32.mrb[151].mxu1  ;;  %v2962_v48 = vpop.f32.mrb[151].mxu0 }
 0x368   : > { %1859 = vst.msk [vmem:[%s5795_s9 + $0xa0] sm:$0xff] %vm481_vm1, %v4133_v44  ;;  %3154 = vst.msk [vmem:[%s5795_s9 + $0x258] sm:$0xff] %vm481_vm1, %v4188_v46 }
 0x369   : > { %v1670_v49 = vpop.f32.mrb[152].mxu1  ;;  %v2965_v50 = vpop.f32.mrb[152].mxu0 }
 0x36a   : > { %v4134_v51 = vadd.f32 %v5780_v45, %v1670_v49  ;;  %v4189_v52 = vadd.f32 %v5780_v45, %v2965_v50  ;;  %v1672_v53 = vpop.f32.mrb[153].mxu1  ;;  %v2967_v54 = vpop.f32.mrb[153].mxu0 }
 0x36c   : > { %1860 = vst.msk [vmem:[%s5795_s9 + $0xa8] sm:$0xff] %vm481_vm1, %v4134_v51  ;;  %3155 = vst.msk [vmem:[%s5795_s9 + $0x260] sm:$0xff] %vm481_vm1, %v4189_v52 }
 0x36d   : > { %v1675_v55 = vpop.f32.mrb[154].mxu1  ;;  %v2970_v56 = vpop.f32.mrb[154].mxu0 }
 0x36e   : > { %v4135_v57 = vadd.f32 %v5780_v45, %v1675_v55  ;;  %v4190_v58 = vadd.f32 %v5780_v45, %v2970_v56  ;;  %v1677_v59 = vpop.f32.mrb[155].mxu1  ;;  %v2972_v60 = vpop.f32.mrb[155].mxu0 }
 0x370   : > { %1861 = vst.msk [vmem:[%s5795_s9 + $0xb0] sm:$0xff] %vm481_vm1, %v4135_v57  ;;  %3156 = vst.msk [vmem:[%s5795_s9 + $0x268] sm:$0xff] %vm481_vm1, %v4190_v58 }
 0x371   : > { %v1680_v3 = vpop.f32.mrb[156].mxu1  ;;  %v2975_v61 = vpop.f32.mrb[156].mxu0 }
 0x372   : > { %v4136_v62 = vadd.f32 %v5780_v45, %v1680_v3  ;;  %v4191_v63 = vadd.f32 %v5780_v45, %v2975_v61  ;;  %v1682_v0 = vpop.f32.mrb[157].mxu1  ;;  %v2977_v1 = vpop.f32.mrb[157].mxu0 }
 0x374   : > { %1862 = vst.msk [vmem:[%s5795_s9 + $0xb8] sm:$0xff] %vm481_vm1, %v4136_v62  ;;  %3157 = vst.msk [vmem:[%s5795_s9 + $0x270] sm:$0xff] %vm481_vm1, %v4191_v63 }
 0x375   : > { %v1685_v2 = vpop.f32.mrb[158].mxu1  ;;  %v2980_v4 = vpop.f32.mrb[158].mxu0 }
 0x376   : > { %v4137_v6 = vadd.f32 %v5780_v45, %v1685_v2  ;;  %v4192_v5 = vadd.f32 %v5780_v45, %v2980_v4  ;;  %v1687_v7 = vpop.f32.mrb[159].mxu1  ;;  %v2982_v8 = vpop.f32.mrb[159].mxu0 }
 0x378   : > { %1863 = vst.msk [vmem:[%s5795_s9 + $0xc0] sm:$0xff] %vm481_vm1, %v4137_v6  ;;  %3158 = vst.msk [vmem:[%s5795_s9 + $0x278] sm:$0xff] %vm481_vm1, %v4192_v5 }
 0x379   : > { %v1690_v9 = vpop.f32.mrb[160].mxu1  ;;  %v2985_v10 = vpop.f32.mrb[160].mxu0 }
 0x37a   : > { %v4138_v11 = vadd.f32 %v5780_v45, %v1690_v9  ;;  %v4193_v12 = vadd.f32 %v5780_v45, %v2985_v10  ;;  %v1692_v13 = vpop.f32.mrb[161].mxu1  ;;  %v2987_v14 = vpop.f32.mrb[161].mxu0 }
 0x37c   : > { %1864 = vst.msk [vmem:[%s5795_s9 + $0xc8] sm:$0xff] %vm481_vm1, %v4138_v11  ;;  %3159 = vst.msk [vmem:[%s5795_s9 + $0x280] sm:$0xff] %vm481_vm1, %v4193_v12 }
 0x37d   : > { %v1695_v15 = vpop.f32.mrb[162].mxu1  ;;  %v2990_v16 = vpop.f32.mrb[162].mxu0 }
 0x37e   : > { %v4139_v17 = vadd.f32 %v5780_v45, %v1695_v15  ;;  %v4194_v18 = vadd.f32 %v5780_v45, %v2990_v16  ;;  %v1697_v19 = vpop.f32.mrb[163].mxu1  ;;  %v2992_v20 = vpop.f32.mrb[163].mxu0 }
 0x380   : > { %1865 = vst.msk [vmem:[%s5795_s9 + $0xd0] sm:$0xff] %vm481_vm1, %v4139_v17  ;;  %3160 = vst.msk [vmem:[%s5795_s9 + $0x288] sm:$0xff] %vm481_vm1, %v4194_v18 }
 0x381   : > { %v1700_v21 = vpop.f32.mrb[164].mxu1  ;;  %v2995_v22 = vpop.f32.mrb[164].mxu0 }
 0x382   : > { %v4140_v23 = vadd.f32 %v5780_v45, %v1700_v21  ;;  %v4195_v24 = vadd.f32 %v5780_v45, %v2995_v22  ;;  %v1702_v25 = vpop.f32.mrb[165].mxu1  ;;  %v2997_v26 = vpop.f32.mrb[165].mxu0 }
 0x384   : > { %1866 = vst.msk [vmem:[%s5795_s9 + $0xd8] sm:$0xff] %vm481_vm1, %v4140_v23  ;;  %3161 = vst.msk [vmem:[%s5795_s9 + $0x290] sm:$0xff] %vm481_vm1, %v4195_v24 }
 0x385   : > { %v1705_v27 = vpop.f32.mrb[166].mxu1  ;;  %v3000_v28 = vpop.f32.mrb[166].mxu0 }
 0x386   : > { %v4141_v29 = vadd.f32 %v5780_v45, %v1705_v27  ;;  %v4196_v30 = vadd.f32 %v5780_v45, %v3000_v28  ;;  %v1707_v31 = vpop.f32.mrb[167].mxu1  ;;  %v3002_v32 = vpop.f32.mrb[167].mxu0 }
 0x388   : > { %1867 = vst.msk [vmem:[%s5795_s9 + $0xe0] sm:$0xff] %vm481_vm1, %v4141_v29  ;;  %3162 = vst.msk [vmem:[%s5795_s9 + $0x298] sm:$0xff] %vm481_vm1, %v4196_v30 }
 0x389   : > { %v1710_v33 = vpop.f32.mrb[168].mxu1  ;;  %v3005_v34 = vpop.f32.mrb[168].mxu0 }
 0x38a   : > { %v4142_v35 = vadd.f32 %v5780_v45, %v1710_v33  ;;  %v4197_v36 = vadd.f32 %v5780_v45, %v3005_v34  ;;  %v1712_v37 = vpop.f32.mrb[169].mxu1  ;;  %v3007_v38 = vpop.f32.mrb[169].mxu0 }
 0x38c   : > { %1868 = vst.msk [vmem:[%s5795_s9 + $0xe8] sm:$0xff] %vm481_vm1, %v4142_v35  ;;  %3163 = vst.msk [vmem:[%s5795_s9 + $0x2a0] sm:$0xff] %vm481_vm1, %v4197_v36 }
 0x38d   : > { %v1715_v39 = vpop.f32.mrb[170].mxu1  ;;  %v3010_v40 = vpop.f32.mrb[170].mxu0 }
 0x38e   : > { %v4143_v41 = vadd.f32 %v5780_v45, %v1715_v39  ;;  %v4198_v42 = vadd.f32 %v5780_v45, %v3010_v40  ;;  %v1717_v43 = vpop.f32.mrb[171].mxu1  ;;  %v3012_v44 = vpop.f32.mrb[171].mxu0 }
 0x390   : > { %1869 = vst.msk [vmem:[%s5795_s9 + $0xf0] sm:$0xff] %vm481_vm1, %v4143_v41  ;;  %3164 = vst.msk [vmem:[%s5795_s9 + $0x2a8] sm:$0xff] %vm481_vm1, %v4198_v42 }
 0x391   : > { %v1720_v46 = vpop.f32.mrb[172].mxu1  ;;  %v3015_v47 = vpop.f32.mrb[172].mxu0 }
 0x392   : > { %v4144_v48 = vadd.f32 %v5780_v45, %v1720_v46  ;;  %v4199_v49 = vadd.f32 %v5780_v45, %v3015_v47  ;;  %v1722_v50 = vpop.f32.mrb[173].mxu1  ;;  %v3017_v51 = vpop.f32.mrb[173].mxu0 }
 0x394   : > { %1870 = vst.msk [vmem:[%s5795_s9 + $0xf8] sm:$0xff] %vm481_vm1, %v4144_v48  ;;  %3165 = vst.msk [vmem:[%s5795_s9 + $0x2b0] sm:$0xff] %vm481_vm1, %v4199_v49 }
 0x395   : > { %v1725_v52 = vpop.f32.mrb[174].mxu1  ;;  %v3020_v53 = vpop.f32.mrb[174].mxu0 }
 0x396   : > { %v4145_v54 = vadd.f32 %v5780_v45, %v1725_v52  ;;  %v4200_v55 = vadd.f32 %v5780_v45, %v3020_v53  ;;  %v1727_v56 = vpop.f32.mrb[175].mxu1  ;;  %v3022_v57 = vpop.f32.mrb[175].mxu0 }
 0x398   : > { %1871 = vst.msk [vmem:[%s5795_s9 + $0x100] sm:$0xff] %vm481_vm1, %v4145_v54  ;;  %3166 = vst.msk [vmem:[%s5795_s9 + $0x2b8] sm:$0xff] %vm481_vm1, %v4200_v55 }
 0x399   : > { %v1730_v58 = vpop.f32.mrb[176].mxu1  ;;  %v3025_v59 = vpop.f32.mrb[176].mxu0 }
 0x39a   : > { %v4146_v60 = vadd.f32 %v5780_v45, %v1730_v58  ;;  %v4201_v3 = vadd.f32 %v5780_v45, %v3025_v59  ;;  %v1732_v61 = vpop.f32.mrb[177].mxu1  ;;  %v3027_v62 = vpop.f32.mrb[177].mxu0 }
 0x39c   : > { %1872 = vst.msk [vmem:[%s5795_s9 + $0x108] sm:$0xff] %vm481_vm1, %v4146_v60  ;;  %3167 = vst.msk [vmem:[%s5795_s9 + $0x2c0] sm:$0xff] %vm481_vm1, %v4201_v3 }
 0x39d   : > { %v1735_v63 = vpop.f32.mrb[178].mxu1  ;;  %v3030_v0 = vpop.f32.mrb[178].mxu0 }
 0x39e   : > { %v4147_v1 = vadd.f32 %v5780_v45, %v1735_v63  ;;  %v4202_v2 = vadd.f32 %v5780_v45, %v3030_v0  ;;  %v1737_v4 = vpop.f32.mrb[179].mxu1  ;;  %v3032_v6 = vpop.f32.mrb[179].mxu0 }
 0x3a0   : > { %1873 = vst.msk [vmem:[%s5795_s9 + $0x110] sm:$0xff] %vm481_vm1, %v4147_v1  ;;  %3168 = vst.msk [vmem:[%s5795_s9 + $0x2c8] sm:$0xff] %vm481_vm1, %v4202_v2 }
 0x3a1   : > { %v1740_v5 = vpop.f32.mrb[180].mxu1  ;;  %v3035_v7 = vpop.f32.mrb[180].mxu0 }
 0x3a2   : > { %v4148_v8 = vadd.f32 %v5780_v45, %v1740_v5  ;;  %v4203_v9 = vadd.f32 %v5780_v45, %v3035_v7  ;;  %v1742_v10 = vpop.f32.mrb[181].mxu1  ;;  %v3037_v11 = vpop.f32.mrb[181].mxu0 }
 0x3a4   : > { %1874 = vst.msk [vmem:[%s5795_s9 + $0x118] sm:$0xff] %vm481_vm1, %v4148_v8  ;;  %3169 = vst.msk [vmem:[%s5795_s9 + $0x2d0] sm:$0xff] %vm481_vm1, %v4203_v9 }
 0x3a5   : > { %v1745_v12 = vpop.f32.mrb[182].mxu1  ;;  %v3040_v13 = vpop.f32.mrb[182].mxu0 }
 0x3a6   : > { %v4149_v14 = vadd.f32 %v5780_v45, %v1745_v12  ;;  %v4204_v15 = vadd.f32 %v5780_v45, %v3040_v13  ;;  %v1747_v16 = vpop.f32.mrb[183].mxu1  ;;  %v3042_v17 = vpop.f32.mrb[183].mxu0 }
 0x3a8   : > { %1875 = vst.msk [vmem:[%s5795_s9 + $0x120] sm:$0xff] %vm481_vm1, %v4149_v14  ;;  %3170 = vst.msk [vmem:[%s5795_s9 + $0x2d8] sm:$0xff] %vm481_vm1, %v4204_v15 }
 0x3a9   : > { %v1750_v18 = vpop.f32.mrb[184].mxu1  ;;  %v3045_v19 = vpop.f32.mrb[184].mxu0 }
 0x3aa   : > { %v4150_v20 = vadd.f32 %v5780_v45, %v1750_v18  ;;  %v4205_v21 = vadd.f32 %v5780_v45, %v3045_v19  ;;  %v1752_v22 = vpop.f32.mrb[185].mxu1  ;;  %v3047_v23 = vpop.f32.mrb[185].mxu0 }
 0x3ac   : > { %1876 = vst.msk [vmem:[%s5795_s9 + $0x128] sm:$0xff] %vm481_vm1, %v4150_v20  ;;  %3171 = vst.msk [vmem:[%s5795_s9 + $0x2e0] sm:$0xff] %vm481_vm1, %v4205_v21 }
 0x3ad   : > { %v1755_v24 = vpop.f32.mrb[186].mxu1  ;;  %v3050_v25 = vpop.f32.mrb[186].mxu0 }
 0x3ae   : > { %v4151_v26 = vadd.f32 %v5780_v45, %v1755_v24  ;;  %v4206_v27 = vadd.f32 %v5780_v45, %v3050_v25  ;;  %v1757_v28 = vpop.f32.mrb[187].mxu1  ;;  %v3052_v29 = vpop.f32.mrb[187].mxu0 }
 0x3b0   : > { %1877 = vst.msk [vmem:[%s5795_s9 + $0x130] sm:$0xff] %vm481_vm1, %v4151_v26  ;;  %3172 = vst.msk [vmem:[%s5795_s9 + $0x2e8] sm:$0xff] %vm481_vm1, %v4206_v27 }
 0x3b1   : > { %v1760_v30 = vpop.f32.mrb[188].mxu1  ;;  %v3055_v31 = vpop.f32.mrb[188].mxu0 }
 0x3b2   : > { %v4152_v32 = vadd.f32 %v5780_v45, %v1760_v30  ;;  %v4207_v33 = vadd.f32 %v5780_v45, %v3055_v31  ;;  %v1762_v34 = vpop.f32.mrb[189].mxu1  ;;  %v3057_v35 = vpop.f32.mrb[189].mxu0 }
 0x3b4   : > { %1878 = vst.msk [vmem:[%s5795_s9 + $0x138] sm:$0xff] %vm481_vm1, %v4152_v32  ;;  %3173 = vst.msk [vmem:[%s5795_s9 + $0x2f0] sm:$0xff] %vm481_vm1, %v4207_v33 }
 0x3b5   : > { %v1765_v36 = vpop.f32.mrb[190].mxu1  ;;  %v3060_v37 = vpop.f32.mrb[190].mxu0 }
 0x3b6   : > { %v4153_v38 = vadd.f32 %v5780_v45, %v1765_v36  ;;  %v4208_v39 = vadd.f32 %v5780_v45, %v3060_v37  ;;  %v1767_v40 = vpop.f32.mrb[191].mxu1  ;;  %v3062_v41 = vpop.f32.mrb[191].mxu0 }
 0x3b8   : > { %1879 = vst.msk [vmem:[%s5795_s9 + $0x140] sm:$0xff] %vm481_vm1, %v4153_v38  ;;  %3174 = vst.msk [vmem:[%s5795_s9 + $0x2f8] sm:$0xff] %vm481_vm1, %v4208_v39 }
 0x3b9   : > { %v1770_v42 = vpop.f32.mrb[192].mxu1  ;;  %v3065_v43 = vpop.f32.mrb[192].mxu0 }
 0x3ba   : > { %v4154_v44 = vadd.f32 %v5780_v45, %v1770_v42  ;;  %v4209_v46 = vadd.f32 %v5780_v45, %v3065_v43  ;;  %v1772_v47 = vpop.f32.mrb[193].mxu1  ;;  %v3067_v48 = vpop.f32.mrb[193].mxu0 }
 0x3bc   : > { %1880 = vst.msk [vmem:[%s5795_s9 + $0x148] sm:$0xff] %vm481_vm1, %v4154_v44  ;;  %3175 = vst.msk [vmem:[%s5795_s9 + $0x300] sm:$0xff] %vm481_vm1, %v4209_v46 }
 0x3bd   : > { %v1775_v49 = vpop.f32.mrb[194].mxu1  ;;  %v3070_v50 = vpop.f32.mrb[194].mxu0 }
 0x3be   : > { %v4155_v51 = vadd.f32 %v5780_v45, %v1775_v49  ;;  %v4210_v52 = vadd.f32 %v5780_v45, %v3070_v50  ;;  %v1777_v53 = vpop.f32.mrb[195].mxu1  ;;  %v3072_v54 = vpop.f32.mrb[195].mxu0 }
 0x3c0   : > { %1881 = vst.msk [vmem:[%s5795_s9 + $0x150] sm:$0xff] %vm481_vm1, %v4155_v51  ;;  %3176 = vst.msk [vmem:[%s5795_s9 + $0x308] sm:$0xff] %vm481_vm1, %v4210_v52 }
 0x3c1   : > { %v1780_v55 = vpop.f32.mrb[196].mxu1  ;;  %v3075_v56 = vpop.f32.mrb[196].mxu0 }
 0x3c2   : > { %v4156_v57 = vadd.f32 %v5780_v45, %v1780_v55  ;;  %v4211_v58 = vadd.f32 %v5780_v45, %v3075_v56  ;;  %v1782_v59 = vpop.f32.mrb[197].mxu1  ;;  %v3077_v60 = vpop.f32.mrb[197].mxu0 }
 0x3c4   : > { %1882 = vst.msk [vmem:[%s5795_s9 + $0x158] sm:$0xff] %vm481_vm1, %v4156_v57  ;;  %3177 = vst.msk [vmem:[%s5795_s9 + $0x310] sm:$0xff] %vm481_vm1, %v4211_v58 }
 0x3c5   : > { %v1785_v3 = vpop.f32.mrb[198].mxu1  ;;  %v3080_v61 = vpop.f32.mrb[198].mxu0 }
 0x3c6   : > { %v4157_v62 = vadd.f32 %v5780_v45, %v1785_v3  ;;  %v4212_v63 = vadd.f32 %v5780_v45, %v3080_v61  ;;  %v1787_v0 = vpop.f32.mrb[199].mxu1  ;;  %v3082_v1 = vpop.f32.mrb[199].mxu0 }
 0x3c8   : > { %1883 = vst.msk [vmem:[%s5795_s9 + $0x160] sm:$0xff] %vm481_vm1, %v4157_v62  ;;  %3178 = vst.msk [vmem:[%s5795_s9 + $0x318] sm:$0xff] %vm481_vm1, %v4212_v63 }
 0x3c9   : > { %v1790_v2 = vpop.f32.mrb[200].mxu1  ;;  %v3085_v4 = vpop.f32.mrb[200].mxu0 }
 0x3ca   : > { %v4158_v6 = vadd.f32 %v5780_v45, %v1790_v2  ;;  %v4213_v5 = vadd.f32 %v5780_v45, %v3085_v4  ;;  %v1792_v7 = vpop.f32.mrb[201].mxu1  ;;  %v3087_v8 = vpop.f32.mrb[201].mxu0 }
 0x3cc   : > { %1884 = vst.msk [vmem:[%s5795_s9 + $0x168] sm:$0xff] %vm481_vm1, %v4158_v6  ;;  %3179 = vst.msk [vmem:[%s5795_s9 + $0x320] sm:$0xff] %vm481_vm1, %v4213_v5 }
 0x3cd   : > { %v1795_v9 = vpop.f32.mrb[202].mxu1  ;;  %v3090_v10 = vpop.f32.mrb[202].mxu0 }
 0x3ce   : > { %v4159_v11 = vadd.f32 %v5780_v45, %v1795_v9  ;;  %v4214_v12 = vadd.f32 %v5780_v45, %v3090_v10  ;;  %v1797_v13 = vpop.f32.mrb[203].mxu1  ;;  %v3092_v14 = vpop.f32.mrb[203].mxu0 }
 0x3d0   : > { %1885 = vst.msk [vmem:[%s5795_s9 + $0x170] sm:$0xff] %vm481_vm1, %v4159_v11  ;;  %3180 = vst.msk [vmem:[%s5795_s9 + $0x328] sm:$0xff] %vm481_vm1, %v4214_v12 }
 0x3d1   : > { %v1800_v15 = vpop.f32.mrb[204].mxu1  ;;  %v3095_v16 = vpop.f32.mrb[204].mxu0 }
 0x3d2   : > { %v4160_v17 = vadd.f32 %v5780_v45, %v1800_v15  ;;  %v4215_v18 = vadd.f32 %v5780_v45, %v3095_v16  ;;  %v1802_v19 = vpop.f32.mrb[205].mxu1  ;;  %v3097_v20 = vpop.f32.mrb[205].mxu0 }
 0x3d4   : > { %1886 = vst.msk [vmem:[%s5795_s9 + $0x178] sm:$0xff] %vm481_vm1, %v4160_v17  ;;  %3181 = vst.msk [vmem:[%s5795_s9 + $0x330] sm:$0xff] %vm481_vm1, %v4215_v18 }
 0x3d5   : > { %v1805_v21 = vpop.f32.mrb[206].mxu1  ;;  %v3100_v22 = vpop.f32.mrb[206].mxu0 }
 0x3d6   : > { %v4161_v23 = vadd.f32 %v5780_v45, %v1805_v21  ;;  %v4216_v24 = vadd.f32 %v5780_v45, %v3100_v22  ;;  %v1807_v25 = vpop.f32.mrb[207].mxu1  ;;  %v3102_v26 = vpop.f32.mrb[207].mxu0 }
 0x3d8   : > { %1887 = vst.msk [vmem:[%s5795_s9 + $0x180] sm:$0xff] %vm481_vm1, %v4161_v23  ;;  %3182 = vst.msk [vmem:[%s5795_s9 + $0x338] sm:$0xff] %vm481_vm1, %v4216_v24 }
 0x3d9   : > { %v1810_v27 = vpop.f32.mrb[208].mxu1  ;;  %v3105_v28 = vpop.f32.mrb[208].mxu0 }
 0x3da   : > { %v4162_v29 = vadd.f32 %v5780_v45, %v1810_v27  ;;  %v4217_v30 = vadd.f32 %v5780_v45, %v3105_v28  ;;  %v1812_v31 = vpop.f32.mrb[209].mxu1  ;;  %v3107_v32 = vpop.f32.mrb[209].mxu0 }
 0x3dc   : > { %1888 = vst.msk [vmem:[%s5795_s9 + $0x188] sm:$0xff] %vm481_vm1, %v4162_v29  ;;  %3183 = vst.msk [vmem:[%s5795_s9 + $0x340] sm:$0xff] %vm481_vm1, %v4217_v30 }
 0x3dd   : > { %v1815_v33 = vpop.f32.mrb[210].mxu1  ;;  %v3110_v34 = vpop.f32.mrb[210].mxu0 }
 0x3de   : > { %v4163_v35 = vadd.f32 %v5780_v45, %v1815_v33  ;;  %v4218_v36 = vadd.f32 %v5780_v45, %v3110_v34  ;;  %v1817_v37 = vpop.f32.mrb[211].mxu1  ;;  %v3112_v38 = vpop.f32.mrb[211].mxu0 }
 0x3e0   : > { %1889 = vst.msk [vmem:[%s5795_s9 + $0x190] sm:$0xff] %vm481_vm1, %v4163_v35  ;;  %3184 = vst.msk [vmem:[%s5795_s9 + $0x348] sm:$0xff] %vm481_vm1, %v4218_v36 }
 0x3e1   : > { %v1820_v39 = vpop.f32.mrb[212].mxu1  ;;  %v3115_v40 = vpop.f32.mrb[212].mxu0 }
 0x3e2   : > { %v4164_v41 = vadd.f32 %v5780_v45, %v1820_v39  ;;  %v4219_v42 = vadd.f32 %v5780_v45, %v3115_v40  ;;  %v1822_v43 = vpop.f32.mrb[213].mxu1  ;;  %v3117_v44 = vpop.f32.mrb[213].mxu0 }
 0x3e4   : > { %1890 = vst.msk [vmem:[%s5795_s9 + $0x198] sm:$0xff] %vm481_vm1, %v4164_v41  ;;  %3185 = vst.msk [vmem:[%s5795_s9 + $0x350] sm:$0xff] %vm481_vm1, %v4219_v42 }
 0x3e5   : > { %v1825_v46 = vpop.f32.mrb[214].mxu1  ;;  %v3120_v47 = vpop.f32.mrb[214].mxu0 }
 0x3e6   : > { %v4165_v48 = vadd.f32 %v5780_v45, %v1825_v46  ;;  %v4220_v49 = vadd.f32 %v5780_v45, %v3120_v47  ;;  %v1827_v50 = vpop.f32.mrb[215].mxu1  ;;  %v3122_v51 = vpop.f32.mrb[215].mxu0 }
 0x3e8   : > { %1891 = vst.msk [vmem:[%s5795_s9 + $0x1a0] sm:$0xff] %vm481_vm1, %v4165_v48  ;;  %3186 = vst.msk [vmem:[%s5795_s9 + $0x358] sm:$0xff] %vm481_vm1, %v4220_v49 }
 0x3e9   : > { %v1830_v52 = vpop.f32.mrb[216].mxu1  ;;  %v3125_v53 = vpop.f32.mrb[216].mxu0 }
 0x3ea   : > { %v4166_v54 = vadd.f32 %v5780_v45, %v1830_v52  ;;  %v4221_v55 = vadd.f32 %v5780_v45, %v3125_v53  ;;  %v1832_v56 = vpop.f32.mrb[217].mxu1  ;;  %v3127_v57 = vpop.f32.mrb[217].mxu0 }
 0x3ec   : > { %1892 = vst.msk [vmem:[%s5795_s9 + $0x1a8] sm:$0xff] %vm481_vm1, %v4166_v54  ;;  %3187 = vst.msk [vmem:[%s5795_s9 + $0x360] sm:$0xff] %vm481_vm1, %v4221_v55 }
 0x3ed   : > { %v1835_v58 = vpop.f32.mrb[218].mxu1  ;;  %v3130_v59 = vpop.f32.mrb[218].mxu0 }
 0x3ee   : > { %v4167_v60 = vadd.f32 %v5780_v45, %v1835_v58  ;;  %v4222_v3 = vadd.f32 %v5780_v45, %v3130_v59  ;;  %v1837_v61 = vpop.f32.mrb[219].mxu1  ;;  %v3132_v62 = vpop.f32.mrb[219].mxu0 }
 0x3f0   : > { %1893 = vst.msk [vmem:[%s5795_s9 + $0x1b0] sm:$0xff] %vm481_vm1, %v4167_v60  ;;  %3188 = vst.msk [vmem:[%s5795_s9 + $0x368] sm:$0xff] %vm481_vm1, %v4222_v3 }
 0x3f1 PF: > { %s14_s15 = sadd.s32 1, %s4460_s15  }
 0x3f2   : > { %p11_p4 = scmp.ge.s32.totalorder %s14_s15, 4  }
 0x3f4   :  { %13 = sbr.rel (!%p11_p4) target bundleno = 1 (0x1), region = 66 }

</bundles_post_ra>
